<compile_context>
chip_gen: v7x
topology: tpu7x:2x2x1
jax: 0.10.0
libtpu: 0.0.40
codegen_flags: <defaults>
</compile_context>

<pallas_src>
import functools
import math

import jax
import jax.numpy as jnp
from jax.experimental import pallas as pl
from jax.experimental.pallas import tpu as pltpu


def _embed_kernel(ids_ref, emb_hbm, out_ref, rows_vmem, copy_sems, *,
                  scale, tokens_per_block):
    # ids_ref:   [n_pad] int32 token ids in SMEM (scalar prefetch)
    # emb_hbm:   [vocab, d_model] embedding table, left in HBM (pl.ANY)
    # out_ref:   [T, d_model] output slab (VMEM, auto-pipelined)
    # rows_vmem: [T, d_model] gathered rows (VMEM scratch)
    # copy_sems: [T] DMA semaphores, one per in-flight row fetch
    blk = pl.program_id(0)
    base = blk * tokens_per_block

    # Issue all row-gather DMAs first so many fetches are outstanding.
    for t in range(tokens_per_block):
        tok = ids_ref[base + t]
        pltpu.make_async_copy(
            emb_hbm.at[pl.ds(tok, 1), :],
            rows_vmem.at[pl.ds(t, 1), :],
            copy_sems.at[t],
        ).start()

    # Then wait on them all.
    for t in range(tokens_per_block):
        pltpu.make_async_copy(
            emb_hbm.at[pl.ds(0, 1), :],
            rows_vmem.at[pl.ds(t, 1), :],
            copy_sems.at[t],
        ).wait()

    # One dense (T, d_model) write; scale in f32 then cast back.
    out_ref[...] = (rows_vmem[...].astype(jnp.float32) * scale).astype(out_ref.dtype)


def token_embedding(token_ids, emb_table, *, tokens_per_block=32):
    """token_ids: [B, S] int, emb_table: [vocab, d_model] -> [B, S, d_model]."""
    assert tokens_per_block % 8 == 0, "tokens_per_block must be a multiple of 8"
    B, S = token_ids.shape
    _, d_model = emb_table.shape
    n_tok = B * S
    scale = math.sqrt(d_model)

    # Pad the flat token stream to a whole number of blocks (pad ids with 0,
    # a valid row; the padded output rows are dropped afterwards).
    n_blocks = pl.cdiv(n_tok, tokens_per_block)
    n_pad = n_blocks * tokens_per_block
    flat_ids = token_ids.reshape(n_tok).astype(jnp.int32)
    flat_ids = jnp.pad(flat_ids, (0, n_pad - n_tok))

    grid_spec = pltpu.PrefetchScalarGridSpec(
        num_scalar_prefetch=1,
        grid=(n_blocks,),
        in_specs=[
            # Embedding table stays in HBM; rows are gathered with manual DMAs.
            pl.BlockSpec(memory_space=pl.ANY),
        ],
        out_specs=pl.BlockSpec((tokens_per_block, d_model),
                               lambda i, ids: (i, 0)),
        scratch_shapes=[
            pltpu.VMEM((tokens_per_block, d_model), emb_table.dtype),
            pltpu.SemaphoreType.DMA((tokens_per_block,)),
        ],
    )

    out = pl.pallas_call(
        functools.partial(_embed_kernel, scale=scale,
                          tokens_per_block=tokens_per_block),
        grid_spec=grid_spec,
        out_shape=jax.ShapeDtypeStruct((n_pad, d_model), emb_table.dtype),
        compiler_params=pltpu.CompilerParams(
            dimension_semantics=("parallel",)),
    )(flat_ids, emb_table)

    return out[:n_tok].reshape(B, S, d_model)


if __name__ == "__main__":
    vocab_size = 64
    d_model = 128     # multiple of 128 -> lane-dense output stores
    batch, seq = 2, 32  # n_tok = 64 -> two 32-token grid blocks

    key = jax.random.PRNGKey(0)
    k_w, k_ids = jax.random.split(key)

    # nn.Embedding weight with normal(mean=0, std=d_model**-0.5) init.
    emb_weight = (jax.random.normal(k_w, (vocab_size, d_model), jnp.float32)
                  * (d_model ** -0.5))
    token_ids = jax.random.randint(k_ids, (batch, seq), 0, vocab_size,
                                   dtype=jnp.int32)

    out = token_embedding(token_ids, emb_weight)
    out = jax.block_until_ready(out)

    # Reference check (plain JAX gather).
    ref = jnp.take(emb_weight, token_ids, axis=0) * math.sqrt(d_model)
    assert out.shape == (batch, seq, d_model)
    assert jnp.allclose(out, ref, atol=1e-5, rtol=1e-5)

    print("KERNEL_OK")
</pallas_src>

<mosaic_0001>
module attributes {stable_mosaic.version = 11 : i64} {
  func.func @_embed_kernel(%arg0: i32, %arg1: memref<64xi32, #tpu.memory_space<smem>>, %arg2: memref<64x128xf32, #tpu.memory_space<any>>, %arg3: memref<32x128xf32, #tpu.memory_space<vmem>>, %arg4: memref<32x128xf32, #tpu.memory_space<vmem>>, %arg5: memref<32x!tpu.dma_semaphore, #tpu.memory_space<semaphore_mem>>) attributes {dimension_semantics = [#tpu.dimension_semantics<parallel>], iteration_bounds = array<i64: 2>, scalar_prefetch = 1 : i64, scratch_operands = 2 : i64, tpu.core_type = #tpu.core_type<tc>, window_params = [{}, {transform_indices = @transform_1, window_bounds = array<i64: 32, 128>}]} {
    %c32_i32 = arith.constant 32 : i32
    %0 = arith.muli %arg0, %c32_i32 : i32
    %c0_i32 = arith.constant 0 : i32
    %1 = arith.addi %0, %c0_i32 : i32
    %2 = arith.index_cast %1 : i32 to index
    %3 = memref.load %arg1[%2] : memref<64xi32, #tpu.memory_space<smem>>
    %c0_i32_0 = arith.constant 0 : i32
    %c0_i32_1 = arith.constant 0 : i32
    %4 = tpu.memref_slice %arg2[%3, %c0_i32_1] : memref<64x128xf32, #tpu.memory_space<any>> -> memref<1x128xf32, #tpu.memory_space<any>>
    %c0_i32_2 = arith.constant 0 : i32
    %c0_i32_3 = arith.constant 0 : i32
    %5 = tpu.memref_slice %arg4[%c0_i32_2, %c0_i32_3] : memref<32x128xf32, #tpu.memory_space<vmem>> -> memref<1x128xf32, #tpu.memory_space<vmem>>
    %6 = tpu.memref_slice %arg5[%c0_i32_0] : memref<32x!tpu.dma_semaphore, #tpu.memory_space<semaphore_mem>> -> memref<1x!tpu.dma_semaphore, #tpu.memory_space<semaphore_mem>>
    %7 = tpu.memref_squeeze %6 : memref<1x!tpu.dma_semaphore, #tpu.memory_space<semaphore_mem>> -> memref<!tpu.dma_semaphore, #tpu.memory_space<semaphore_mem>>
    tpu.enqueue_dma source(%4 : memref<1x128xf32, #tpu.memory_space<any>>) target(%5 : memref<1x128xf32, #tpu.memory_space<vmem>>) target_semaphore(%7 : memref<!tpu.dma_semaphore, #tpu.memory_space<semaphore_mem>>)
    %c1_i32 = arith.constant 1 : i32
    %8 = arith.addi %0, %c1_i32 : i32
    %9 = arith.index_cast %8 : i32 to index
    %10 = memref.load %arg1[%9] : memref<64xi32, #tpu.memory_space<smem>>
    %c1_i32_4 = arith.constant 1 : i32
    %c0_i32_5 = arith.constant 0 : i32
    %11 = tpu.memref_slice %arg2[%10, %c0_i32_5] : memref<64x128xf32, #tpu.memory_space<any>> -> memref<1x128xf32, #tpu.memory_space<any>>
    %c1_i32_6 = arith.constant 1 : i32
    %c0_i32_7 = arith.constant 0 : i32
    %12 = tpu.memref_slice %arg4[%c1_i32_6, %c0_i32_7] : memref<32x128xf32, #tpu.memory_space<vmem>> -> memref<1x128xf32, #tpu.memory_space<vmem>>
    %13 = tpu.memref_slice %arg5[%c1_i32_4] : memref<32x!tpu.dma_semaphore, #tpu.memory_space<semaphore_mem>> -> memref<1x!tpu.dma_semaphore, #tpu.memory_space<semaphore_mem>>
    %14 = tpu.memref_squeeze %13 : memref<1x!tpu.dma_semaphore, #tpu.memory_space<semaphore_mem>> -> memref<!tpu.dma_semaphore, #tpu.memory_space<semaphore_mem>>
    tpu.enqueue_dma source(%11 : memref<1x128xf32, #tpu.memory_space<any>>) target(%12 : memref<1x128xf32, #tpu.memory_space<vmem>>) target_semaphore(%14 : memref<!tpu.dma_semaphore, #tpu.memory_space<semaphore_mem>>)
    %c2_i32 = arith.constant 2 : i32
    %15 = arith.addi %0, %c2_i32 : i32
    %16 = arith.index_cast %15 : i32 to index
    %17 = memref.load %arg1[%16] : memref<64xi32, #tpu.memory_space<smem>>
    %c2_i32_8 = arith.constant 2 : i32
    %c0_i32_9 = arith.constant 0 : i32
    %18 = tpu.memref_slice %arg2[%17, %c0_i32_9] : memref<64x128xf32, #tpu.memory_space<any>> -> memref<1x128xf32, #tpu.memory_space<any>>
    %c2_i32_10 = arith.constant 2 : i32
    %c0_i32_11 = arith.constant 0 : i32
    %19 = tpu.memref_slice %arg4[%c2_i32_10, %c0_i32_11] : memref<32x128xf32, #tpu.memory_space<vmem>> -> memref<1x128xf32, #tpu.memory_space<vmem>>
    %20 = tpu.memref_slice %arg5[%c2_i32_8] : memref<32x!tpu.dma_semaphore, #tpu.memory_space<semaphore_mem>> -> memref<1x!tpu.dma_semaphore, #tpu.memory_space<semaphore_mem>>
    %21 = tpu.memref_squeeze %20 : memref<1x!tpu.dma_semaphore, #tpu.memory_space<semaphore_mem>> -> memref<!tpu.dma_semaphore, #tpu.memory_space<semaphore_mem>>
    tpu.enqueue_dma source(%18 : memref<1x128xf32, #tpu.memory_space<any>>) target(%19 : memref<1x128xf32, #tpu.memory_space<vmem>>) target_semaphore(%21 : memref<!tpu.dma_semaphore, #tpu.memory_space<semaphore_mem>>)
    %c3_i32 = arith.constant 3 : i32
    %22 = arith.addi %0, %c3_i32 : i32
    %23 = arith.index_cast %22 : i32 to index
    %24 = memref.load %arg1[%23] : memref<64xi32, #tpu.memory_space<smem>>
    %c3_i32_12 = arith.constant 3 : i32
    %c0_i32_13 = arith.constant 0 : i32
    %25 = tpu.memref_slice %arg2[%24, %c0_i32_13] : memref<64x128xf32, #tpu.memory_space<any>> -> memref<1x128xf32, #tpu.memory_space<any>>
    %c3_i32_14 = arith.constant 3 : i32
    %c0_i32_15 = arith.constant 0 : i32
    %26 = tpu.memref_slice %arg4[%c3_i32_14, %c0_i32_15] : memref<32x128xf32, #tpu.memory_space<vmem>> -> memref<1x128xf32, #tpu.memory_space<vmem>>
    %27 = tpu.memref_slice %arg5[%c3_i32_12] : memref<32x!tpu.dma_semaphore, #tpu.memory_space<semaphore_mem>> -> memref<1x!tpu.dma_semaphore, #tpu.memory_space<semaphore_mem>>
    %28 = tpu.memref_squeeze %27 : memref<1x!tpu.dma_semaphore, #tpu.memory_space<semaphore_mem>> -> memref<!tpu.dma_semaphore, #tpu.memory_space<semaphore_mem>>
    tpu.enqueue_dma source(%25 : memref<1x128xf32, #tpu.memory_space<any>>) target(%26 : memref<1x128xf32, #tpu.memory_space<vmem>>) target_semaphore(%28 : memref<!tpu.dma_semaphore, #tpu.memory_space<semaphore_mem>>)
    %c4_i32 = arith.constant 4 : i32
    %29 = arith.addi %0, %c4_i32 : i32
    %30 = arith.index_cast %29 : i32 to index
    %31 = memref.load %arg1[%30] : memref<64xi32, #tpu.memory_space<smem>>
    %c4_i32_16 = arith.constant 4 : i32
    %c0_i32_17 = arith.constant 0 : i32
    %32 = tpu.memref_slice %arg2[%31, %c0_i32_17] : memref<64x128xf32, #tpu.memory_space<any>> -> memref<1x128xf32, #tpu.memory_space<any>>
    %c4_i32_18 = arith.constant 4 : i32
    %c0_i32_19 = arith.constant 0 : i32
    %33 = tpu.memref_slice %arg4[%c4_i32_18, %c0_i32_19] : memref<32x128xf32, #tpu.memory_space<vmem>> -> memref<1x128xf32, #tpu.memory_space<vmem>>
    %34 = tpu.memref_slice %arg5[%c4_i32_16] : memref<32x!tpu.dma_semaphore, #tpu.memory_space<semaphore_mem>> -> memref<1x!tpu.dma_semaphore, #tpu.memory_space<semaphore_mem>>
    %35 = tpu.memref_squeeze %34 : memref<1x!tpu.dma_semaphore, #tpu.memory_space<semaphore_mem>> -> memref<!tpu.dma_semaphore, #tpu.memory_space<semaphore_mem>>
    tpu.enqueue_dma source(%32 : memref<1x128xf32, #tpu.memory_space<any>>) target(%33 : memref<1x128xf32, #tpu.memory_space<vmem>>) target_semaphore(%35 : memref<!tpu.dma_semaphore, #tpu.memory_space<semaphore_mem>>)
    %c5_i32 = arith.constant 5 : i32
    %36 = arith.addi %0, %c5_i32 : i32
    %37 = arith.index_cast %36 : i32 to index
    %38 = memref.load %arg1[%37] : memref<64xi32, #tpu.memory_space<smem>>
    %c5_i32_20 = arith.constant 5 : i32
    %c0_i32_21 = arith.constant 0 : i32
    %39 = tpu.memref_slice %arg2[%38, %c0_i32_21] : memref<64x128xf32, #tpu.memory_space<any>> -> memref<1x128xf32, #tpu.memory_space<any>>
    %c5_i32_22 = arith.constant 5 : i32
    %c0_i32_23 = arith.constant 0 : i32
    %40 = tpu.memref_slice %arg4[%c5_i32_22, %c0_i32_23] : memref<32x128xf32, #tpu.memory_space<vmem>> -> memref<1x128xf32, #tpu.memory_space<vmem>>
    %41 = tpu.memref_slice %arg5[%c5_i32_20] : memref<32x!tpu.dma_semaphore, #tpu.memory_space<semaphore_mem>> -> memref<1x!tpu.dma_semaphore, #tpu.memory_space<semaphore_mem>>
    %42 = tpu.memref_squeeze %41 : memref<1x!tpu.dma_semaphore, #tpu.memory_space<semaphore_mem>> -> memref<!tpu.dma_semaphore, #tpu.memory_space<semaphore_mem>>
    tpu.enqueue_dma source(%39 : memref<1x128xf32, #tpu.memory_space<any>>) target(%40 : memref<1x128xf32, #tpu.memory_space<vmem>>) target_semaphore(%42 : memref<!tpu.dma_semaphore, #tpu.memory_space<semaphore_mem>>)
    %c6_i32 = arith.constant 6 : i32
    %43 = arith.addi %0, %c6_i32 : i32
    %44 = arith.index_cast %43 : i32 to index
    %45 = memref.load %arg1[%44] : memref<64xi32, #tpu.memory_space<smem>>
    %c6_i32_24 = arith.constant 6 : i32
    %c0_i32_25 = arith.constant 0 : i32
    %46 = tpu.memref_slice %arg2[%45, %c0_i32_25] : memref<64x128xf32, #tpu.memory_space<any>> -> memref<1x128xf32, #tpu.memory_space<any>>
    %c6_i32_26 = arith.constant 6 : i32
    %c0_i32_27 = arith.constant 0 : i32
    %47 = tpu.memref_slice %arg4[%c6_i32_26, %c0_i32_27] : memref<32x128xf32, #tpu.memory_space<vmem>> -> memref<1x128xf32, #tpu.memory_space<vmem>>
    %48 = tpu.memref_slice %arg5[%c6_i32_24] : memref<32x!tpu.dma_semaphore, #tpu.memory_space<semaphore_mem>> -> memref<1x!tpu.dma_semaphore, #tpu.memory_space<semaphore_mem>>
    %49 = tpu.memref_squeeze %48 : memref<1x!tpu.dma_semaphore, #tpu.memory_space<semaphore_mem>> -> memref<!tpu.dma_semaphore, #tpu.memory_space<semaphore_mem>>
    tpu.enqueue_dma source(%46 : memref<1x128xf32, #tpu.memory_space<any>>) target(%47 : memref<1x128xf32, #tpu.memory_space<vmem>>) target_semaphore(%49 : memref<!tpu.dma_semaphore, #tpu.memory_space<semaphore_mem>>)
    %c7_i32 = arith.constant 7 : i32
    %50 = arith.addi %0, %c7_i32 : i32
    %51 = arith.index_cast %50 : i32 to index
    %52 = memref.load %arg1[%51] : memref<64xi32, #tpu.memory_space<smem>>
    %c7_i32_28 = arith.constant 7 : i32
    %c0_i32_29 = arith.constant 0 : i32
    %53 = tpu.memref_slice %arg2[%52, %c0_i32_29] : memref<64x128xf32, #tpu.memory_space<any>> -> memref<1x128xf32, #tpu.memory_space<any>>
    %c7_i32_30 = arith.constant 7 : i32
    %c0_i32_31 = arith.constant 0 : i32
    %54 = tpu.memref_slice %arg4[%c7_i32_30, %c0_i32_31] : memref<32x128xf32, #tpu.memory_space<vmem>> -> memref<1x128xf32, #tpu.memory_space<vmem>>
    %55 = tpu.memref_slice %arg5[%c7_i32_28] : memref<32x!tpu.dma_semaphore, #tpu.memory_space<semaphore_mem>> -> memref<1x!tpu.dma_semaphore, #tpu.memory_space<semaphore_mem>>
    %56 = tpu.memref_squeeze %55 : memref<1x!tpu.dma_semaphore, #tpu.memory_space<semaphore_mem>> -> memref<!tpu.dma_semaphore, #tpu.memory_space<semaphore_mem>>
    tpu.enqueue_dma source(%53 : memref<1x128xf32, #tpu.memory_space<any>>) target(%54 : memref<1x128xf32, #tpu.memory_space<vmem>>) target_semaphore(%56 : memref<!tpu.dma_semaphore, #tpu.memory_space<semaphore_mem>>)
    %c8_i32 = arith.constant 8 : i32
    %57 = arith.addi %0, %c8_i32 : i32
    %58 = arith.index_cast %57 : i32 to index
    %59 = memref.load %arg1[%58] : memref<64xi32, #tpu.memory_space<smem>>
    %c8_i32_32 = arith.constant 8 : i32
    %c0_i32_33 = arith.constant 0 : i32
    %60 = tpu.memref_slice %arg2[%59, %c0_i32_33] : memref<64x128xf32, #tpu.memory_space<any>> -> memref<1x128xf32, #tpu.memory_space<any>>
    %c8_i32_34 = arith.constant 8 : i32
    %c0_i32_35 = arith.constant 0 : i32
    %61 = tpu.memref_slice %arg4[%c8_i32_34, %c0_i32_35] : memref<32x128xf32, #tpu.memory_space<vmem>> -> memref<1x128xf32, #tpu.memory_space<vmem>>
    %62 = tpu.memref_slice %arg5[%c8_i32_32] : memref<32x!tpu.dma_semaphore, #tpu.memory_space<semaphore_mem>> -> memref<1x!tpu.dma_semaphore, #tpu.memory_space<semaphore_mem>>
    %63 = tpu.memref_squeeze %62 : memref<1x!tpu.dma_semaphore, #tpu.memory_space<semaphore_mem>> -> memref<!tpu.dma_semaphore, #tpu.memory_space<semaphore_mem>>
    tpu.enqueue_dma source(%60 : memref<1x128xf32, #tpu.memory_space<any>>) target(%61 : memref<1x128xf32, #tpu.memory_space<vmem>>) target_semaphore(%63 : memref<!tpu.dma_semaphore, #tpu.memory_space<semaphore_mem>>)
    %c9_i32 = arith.constant 9 : i32
    %64 = arith.addi %0, %c9_i32 : i32
    %65 = arith.index_cast %64 : i32 to index
    %66 = memref.load %arg1[%65] : memref<64xi32, #tpu.memory_space<smem>>
    %c9_i32_36 = arith.constant 9 : i32
    %c0_i32_37 = arith.constant 0 : i32
    %67 = tpu.memref_slice %arg2[%66, %c0_i32_37] : memref<64x128xf32, #tpu.memory_space<any>> -> memref<1x128xf32, #tpu.memory_space<any>>
    %c9_i32_38 = arith.constant 9 : i32
    %c0_i32_39 = arith.constant 0 : i32
    %68 = tpu.memref_slice %arg4[%c9_i32_38, %c0_i32_39] : memref<32x128xf32, #tpu.memory_space<vmem>> -> memref<1x128xf32, #tpu.memory_space<vmem>>
    %69 = tpu.memref_slice %arg5[%c9_i32_36] : memref<32x!tpu.dma_semaphore, #tpu.memory_space<semaphore_mem>> -> memref<1x!tpu.dma_semaphore, #tpu.memory_space<semaphore_mem>>
    %70 = tpu.memref_squeeze %69 : memref<1x!tpu.dma_semaphore, #tpu.memory_space<semaphore_mem>> -> memref<!tpu.dma_semaphore, #tpu.memory_space<semaphore_mem>>
    tpu.enqueue_dma source(%67 : memref<1x128xf32, #tpu.memory_space<any>>) target(%68 : memref<1x128xf32, #tpu.memory_space<vmem>>) target_semaphore(%70 : memref<!tpu.dma_semaphore, #tpu.memory_space<semaphore_mem>>)
    %c10_i32 = arith.constant 10 : i32
    %71 = arith.addi %0, %c10_i32 : i32
    %72 = arith.index_cast %71 : i32 to index
    %73 = memref.load %arg1[%72] : memref<64xi32, #tpu.memory_space<smem>>
    %c10_i32_40 = arith.constant 10 : i32
    %c0_i32_41 = arith.constant 0 : i32
    %74 = tpu.memref_slice %arg2[%73, %c0_i32_41] : memref<64x128xf32, #tpu.memory_space<any>> -> memref<1x128xf32, #tpu.memory_space<any>>
    %c10_i32_42 = arith.constant 10 : i32
    %c0_i32_43 = arith.constant 0 : i32
    %75 = tpu.memref_slice %arg4[%c10_i32_42, %c0_i32_43] : memref<32x128xf32, #tpu.memory_space<vmem>> -> memref<1x128xf32, #tpu.memory_space<vmem>>
    %76 = tpu.memref_slice %arg5[%c10_i32_40] : memref<32x!tpu.dma_semaphore, #tpu.memory_space<semaphore_mem>> -> memref<1x!tpu.dma_semaphore, #tpu.memory_space<semaphore_mem>>
    %77 = tpu.memref_squeeze %76 : memref<1x!tpu.dma_semaphore, #tpu.memory_space<semaphore_mem>> -> memref<!tpu.dma_semaphore, #tpu.memory_space<semaphore_mem>>
    tpu.enqueue_dma source(%74 : memref<1x128xf32, #tpu.memory_space<any>>) target(%75 : memref<1x128xf32, #tpu.memory_space<vmem>>) target_semaphore(%77 : memref<!tpu.dma_semaphore, #tpu.memory_space<semaphore_mem>>)
    %c11_i32 = arith.constant 11 : i32
    %78 = arith.addi %0, %c11_i32 : i32
    %79 = arith.index_cast %78 : i32 to index
    %80 = memref.load %arg1[%79] : memref<64xi32, #tpu.memory_space<smem>>
    %c11_i32_44 = arith.constant 11 : i32
    %c0_i32_45 = arith.constant 0 : i32
    %81 = tpu.memref_slice %arg2[%80, %c0_i32_45] : memref<64x128xf32, #tpu.memory_space<any>> -> memref<1x128xf32, #tpu.memory_space<any>>
    %c11_i32_46 = arith.constant 11 : i32
    %c0_i32_47 = arith.constant 0 : i32
    %82 = tpu.memref_slice %arg4[%c11_i32_46, %c0_i32_47] : memref<32x128xf32, #tpu.memory_space<vmem>> -> memref<1x128xf32, #tpu.memory_space<vmem>>
    %83 = tpu.memref_slice %arg5[%c11_i32_44] : memref<32x!tpu.dma_semaphore, #tpu.memory_space<semaphore_mem>> -> memref<1x!tpu.dma_semaphore, #tpu.memory_space<semaphore_mem>>
    %84 = tpu.memref_squeeze %83 : memref<1x!tpu.dma_semaphore, #tpu.memory_space<semaphore_mem>> -> memref<!tpu.dma_semaphore, #tpu.memory_space<semaphore_mem>>
    tpu.enqueue_dma source(%81 : memref<1x128xf32, #tpu.memory_space<any>>) target(%82 : memref<1x128xf32, #tpu.memory_space<vmem>>) target_semaphore(%84 : memref<!tpu.dma_semaphore, #tpu.memory_space<semaphore_mem>>)
    %c12_i32 = arith.constant 12 : i32
    %85 = arith.addi %0, %c12_i32 : i32
    %86 = arith.index_cast %85 : i32 to index
    %87 = memref.load %arg1[%86] : memref<64xi32, #tpu.memory_space<smem>>
    %c12_i32_48 = arith.constant 12 : i32
    %c0_i32_49 = arith.constant 0 : i32
    %88 = tpu.memref_slice %arg2[%87, %c0_i32_49] : memref<64x128xf32, #tpu.memory_space<any>> -> memref<1x128xf32, #tpu.memory_space<any>>
    %c12_i32_50 = arith.constant 12 : i32
    %c0_i32_51 = arith.constant 0 : i32
    %89 = tpu.memref_slice %arg4[%c12_i32_50, %c0_i32_51] : memref<32x128xf32, #tpu.memory_space<vmem>> -> memref<1x128xf32, #tpu.memory_space<vmem>>
    %90 = tpu.memref_slice %arg5[%c12_i32_48] : memref<32x!tpu.dma_semaphore, #tpu.memory_space<semaphore_mem>> -> memref<1x!tpu.dma_semaphore, #tpu.memory_space<semaphore_mem>>
    %91 = tpu.memref_squeeze %90 : memref<1x!tpu.dma_semaphore, #tpu.memory_space<semaphore_mem>> -> memref<!tpu.dma_semaphore, #tpu.memory_space<semaphore_mem>>
    tpu.enqueue_dma source(%88 : memref<1x128xf32, #tpu.memory_space<any>>) target(%89 : memref<1x128xf32, #tpu.memory_space<vmem>>) target_semaphore(%91 : memref<!tpu.dma_semaphore, #tpu.memory_space<semaphore_mem>>)
    %c13_i32 = arith.constant 13 : i32
    %92 = arith.addi %0, %c13_i32 : i32
    %93 = arith.index_cast %92 : i32 to index
    %94 = memref.load %arg1[%93] : memref<64xi32, #tpu.memory_space<smem>>
    %c13_i32_52 = arith.constant 13 : i32
    %c0_i32_53 = arith.constant 0 : i32
    %95 = tpu.memref_slice %arg2[%94, %c0_i32_53] : memref<64x128xf32, #tpu.memory_space<any>> -> memref<1x128xf32, #tpu.memory_space<any>>
    %c13_i32_54 = arith.constant 13 : i32
    %c0_i32_55 = arith.constant 0 : i32
    %96 = tpu.memref_slice %arg4[%c13_i32_54, %c0_i32_55] : memref<32x128xf32, #tpu.memory_space<vmem>> -> memref<1x128xf32, #tpu.memory_space<vmem>>
    %97 = tpu.memref_slice %arg5[%c13_i32_52] : memref<32x!tpu.dma_semaphore, #tpu.memory_space<semaphore_mem>> -> memref<1x!tpu.dma_semaphore, #tpu.memory_space<semaphore_mem>>
    %98 = tpu.memref_squeeze %97 : memref<1x!tpu.dma_semaphore, #tpu.memory_space<semaphore_mem>> -> memref<!tpu.dma_semaphore, #tpu.memory_space<semaphore_mem>>
    tpu.enqueue_dma source(%95 : memref<1x128xf32, #tpu.memory_space<any>>) target(%96 : memref<1x128xf32, #tpu.memory_space<vmem>>) target_semaphore(%98 : memref<!tpu.dma_semaphore, #tpu.memory_space<semaphore_mem>>)
    %c14_i32 = arith.constant 14 : i32
    %99 = arith.addi %0, %c14_i32 : i32
    %100 = arith.index_cast %99 : i32 to index
    %101 = memref.load %arg1[%100] : memref<64xi32, #tpu.memory_space<smem>>
    %c14_i32_56 = arith.constant 14 : i32
    %c0_i32_57 = arith.constant 0 : i32
    %102 = tpu.memref_slice %arg2[%101, %c0_i32_57] : memref<64x128xf32, #tpu.memory_space<any>> -> memref<1x128xf32, #tpu.memory_space<any>>
    %c14_i32_58 = arith.constant 14 : i32
    %c0_i32_59 = arith.constant 0 : i32
    %103 = tpu.memref_slice %arg4[%c14_i32_58, %c0_i32_59] : memref<32x128xf32, #tpu.memory_space<vmem>> -> memref<1x128xf32, #tpu.memory_space<vmem>>
    %104 = tpu.memref_slice %arg5[%c14_i32_56] : memref<32x!tpu.dma_semaphore, #tpu.memory_space<semaphore_mem>> -> memref<1x!tpu.dma_semaphore, #tpu.memory_space<semaphore_mem>>
    %105 = tpu.memref_squeeze %104 : memref<1x!tpu.dma_semaphore, #tpu.memory_space<semaphore_mem>> -> memref<!tpu.dma_semaphore, #tpu.memory_space<semaphore_mem>>
    tpu.enqueue_dma source(%102 : memref<1x128xf32, #tpu.memory_space<any>>) target(%103 : memref<1x128xf32, #tpu.memory_space<vmem>>) target_semaphore(%105 : memref<!tpu.dma_semaphore, #tpu.memory_space<semaphore_mem>>)
    %c15_i32 = arith.constant 15 : i32
    %106 = arith.addi %0, %c15_i32 : i32
    %107 = arith.index_cast %106 : i32 to index
    %108 = memref.load %arg1[%107] : memref<64xi32, #tpu.memory_space<smem>>
    %c15_i32_60 = arith.constant 15 : i32
    %c0_i32_61 = arith.constant 0 : i32
    %109 = tpu.memref_slice %arg2[%108, %c0_i32_61] : memref<64x128xf32, #tpu.memory_space<any>> -> memref<1x128xf32, #tpu.memory_space<any>>
    %c15_i32_62 = arith.constant 15 : i32
    %c0_i32_63 = arith.constant 0 : i32
    %110 = tpu.memref_slice %arg4[%c15_i32_62, %c0_i32_63] : memref<32x128xf32, #tpu.memory_space<vmem>> -> memref<1x128xf32, #tpu.memory_space<vmem>>
    %111 = tpu.memref_slice %arg5[%c15_i32_60] : memref<32x!tpu.dma_semaphore, #tpu.memory_space<semaphore_mem>> -> memref<1x!tpu.dma_semaphore, #tpu.memory_space<semaphore_mem>>
    %112 = tpu.memref_squeeze %111 : memref<1x!tpu.dma_semaphore, #tpu.memory_space<semaphore_mem>> -> memref<!tpu.dma_semaphore, #tpu.memory_space<semaphore_mem>>
    tpu.enqueue_dma source(%109 : memref<1x128xf32, #tpu.memory_space<any>>) target(%110 : memref<1x128xf32, #tpu.memory_space<vmem>>) target_semaphore(%112 : memref<!tpu.dma_semaphore, #tpu.memory_space<semaphore_mem>>)
    %c16_i32 = arith.constant 16 : i32
    %113 = arith.addi %0, %c16_i32 : i32
    %114 = arith.index_cast %113 : i32 to index
    %115 = memref.load %arg1[%114] : memref<64xi32, #tpu.memory_space<smem>>
    %c16_i32_64 = arith.constant 16 : i32
    %c0_i32_65 = arith.constant 0 : i32
    %116 = tpu.memref_slice %arg2[%115, %c0_i32_65] : memref<64x128xf32, #tpu.memory_space<any>> -> memref<1x128xf32, #tpu.memory_space<any>>
    %c16_i32_66 = arith.constant 16 : i32
    %c0_i32_67 = arith.constant 0 : i32
    %117 = tpu.memref_slice %arg4[%c16_i32_66, %c0_i32_67] : memref<32x128xf32, #tpu.memory_space<vmem>> -> memref<1x128xf32, #tpu.memory_space<vmem>>
    %118 = tpu.memref_slice %arg5[%c16_i32_64] : memref<32x!tpu.dma_semaphore, #tpu.memory_space<semaphore_mem>> -> memref<1x!tpu.dma_semaphore, #tpu.memory_space<semaphore_mem>>
    %119 = tpu.memref_squeeze %118 : memref<1x!tpu.dma_semaphore, #tpu.memory_space<semaphore_mem>> -> memref<!tpu.dma_semaphore, #tpu.memory_space<semaphore_mem>>
    tpu.enqueue_dma source(%116 : memref<1x128xf32, #tpu.memory_space<any>>) target(%117 : memref<1x128xf32, #tpu.memory_space<vmem>>) target_semaphore(%119 : memref<!tpu.dma_semaphore, #tpu.memory_space<semaphore_mem>>)
    %c17_i32 = arith.constant 17 : i32
    %120 = arith.addi %0, %c17_i32 : i32
    %121 = arith.index_cast %120 : i32 to index
    %122 = memref.load %arg1[%121] : memref<64xi32, #tpu.memory_space<smem>>
    %c17_i32_68 = arith.constant 17 : i32
    %c0_i32_69 = arith.constant 0 : i32
    %123 = tpu.memref_slice %arg2[%122, %c0_i32_69] : memref<64x128xf32, #tpu.memory_space<any>> -> memref<1x128xf32, #tpu.memory_space<any>>
    %c17_i32_70 = arith.constant 17 : i32
    %c0_i32_71 = arith.constant 0 : i32
    %124 = tpu.memref_slice %arg4[%c17_i32_70, %c0_i32_71] : memref<32x128xf32, #tpu.memory_space<vmem>> -> memref<1x128xf32, #tpu.memory_space<vmem>>
    %125 = tpu.memref_slice %arg5[%c17_i32_68] : memref<32x!tpu.dma_semaphore, #tpu.memory_space<semaphore_mem>> -> memref<1x!tpu.dma_semaphore, #tpu.memory_space<semaphore_mem>>
    %126 = tpu.memref_squeeze %125 : memref<1x!tpu.dma_semaphore, #tpu.memory_space<semaphore_mem>> -> memref<!tpu.dma_semaphore, #tpu.memory_space<semaphore_mem>>
    tpu.enqueue_dma source(%123 : memref<1x128xf32, #tpu.memory_space<any>>) target(%124 : memref<1x128xf32, #tpu.memory_space<vmem>>) target_semaphore(%126 : memref<!tpu.dma_semaphore, #tpu.memory_space<semaphore_mem>>)
    %c18_i32 = arith.constant 18 : i32
    %127 = arith.addi %0, %c18_i32 : i32
    %128 = arith.index_cast %127 : i32 to index
    %129 = memref.load %arg1[%128] : memref<64xi32, #tpu.memory_space<smem>>
    %c18_i32_72 = arith.constant 18 : i32
    %c0_i32_73 = arith.constant 0 : i32
    %130 = tpu.memref_slice %arg2[%129, %c0_i32_73] : memref<64x128xf32, #tpu.memory_space<any>> -> memref<1x128xf32, #tpu.memory_space<any>>
    %c18_i32_74 = arith.constant 18 : i32
    %c0_i32_75 = arith.constant 0 : i32
    %131 = tpu.memref_slice %arg4[%c18_i32_74, %c0_i32_75] : memref<32x128xf32, #tpu.memory_space<vmem>> -> memref<1x128xf32, #tpu.memory_space<vmem>>
    %132 = tpu.memref_slice %arg5[%c18_i32_72] : memref<32x!tpu.dma_semaphore, #tpu.memory_space<semaphore_mem>> -> memref<1x!tpu.dma_semaphore, #tpu.memory_space<semaphore_mem>>
    %133 = tpu.memref_squeeze %132 : memref<1x!tpu.dma_semaphore, #tpu.memory_space<semaphore_mem>> -> memref<!tpu.dma_semaphore, #tpu.memory_space<semaphore_mem>>
    tpu.enqueue_dma source(%130 : memref<1x128xf32, #tpu.memory_space<any>>) target(%131 : memref<1x128xf32, #tpu.memory_space<vmem>>) target_semaphore(%133 : memref<!tpu.dma_semaphore, #tpu.memory_space<semaphore_mem>>)
    %c19_i32 = arith.constant 19 : i32
    %134 = arith.addi %0, %c19_i32 : i32
    %135 = arith.index_cast %134 : i32 to index
    %136 = memref.load %arg1[%135] : memref<64xi32, #tpu.memory_space<smem>>
    %c19_i32_76 = arith.constant 19 : i32
    %c0_i32_77 = arith.constant 0 : i32
    %137 = tpu.memref_slice %arg2[%136, %c0_i32_77] : memref<64x128xf32, #tpu.memory_space<any>> -> memref<1x128xf32, #tpu.memory_space<any>>
    %c19_i32_78 = arith.constant 19 : i32
    %c0_i32_79 = arith.constant 0 : i32
    %138 = tpu.memref_slice %arg4[%c19_i32_78, %c0_i32_79] : memref<32x128xf32, #tpu.memory_space<vmem>> -> memref<1x128xf32, #tpu.memory_space<vmem>>
    %139 = tpu.memref_slice %arg5[%c19_i32_76] : memref<32x!tpu.dma_semaphore, #tpu.memory_space<semaphore_mem>> -> memref<1x!tpu.dma_semaphore, #tpu.memory_space<semaphore_mem>>
    %140 = tpu.memref_squeeze %139 : memref<1x!tpu.dma_semaphore, #tpu.memory_space<semaphore_mem>> -> memref<!tpu.dma_semaphore, #tpu.memory_space<semaphore_mem>>
    tpu.enqueue_dma source(%137 : memref<1x128xf32, #tpu.memory_space<any>>) target(%138 : memref<1x128xf32, #tpu.memory_space<vmem>>) target_semaphore(%140 : memref<!tpu.dma_semaphore, #tpu.memory_space<semaphore_mem>>)
    %c20_i32 = arith.constant 20 : i32
    %141 = arith.addi %0, %c20_i32 : i32
    %142 = arith.index_cast %141 : i32 to index
    %143 = memref.load %arg1[%142] : memref<64xi32, #tpu.memory_space<smem>>
    %c20_i32_80 = arith.constant 20 : i32
    %c0_i32_81 = arith.constant 0 : i32
    %144 = tpu.memref_slice %arg2[%143, %c0_i32_81] : memref<64x128xf32, #tpu.memory_space<any>> -> memref<1x128xf32, #tpu.memory_space<any>>
    %c20_i32_82 = arith.constant 20 : i32
    %c0_i32_83 = arith.constant 0 : i32
    %145 = tpu.memref_slice %arg4[%c20_i32_82, %c0_i32_83] : memref<32x128xf32, #tpu.memory_space<vmem>> -> memref<1x128xf32, #tpu.memory_space<vmem>>
    %146 = tpu.memref_slice %arg5[%c20_i32_80] : memref<32x!tpu.dma_semaphore, #tpu.memory_space<semaphore_mem>> -> memref<1x!tpu.dma_semaphore, #tpu.memory_space<semaphore_mem>>
    %147 = tpu.memref_squeeze %146 : memref<1x!tpu.dma_semaphore, #tpu.memory_space<semaphore_mem>> -> memref<!tpu.dma_semaphore, #tpu.memory_space<semaphore_mem>>
    tpu.enqueue_dma source(%144 : memref<1x128xf32, #tpu.memory_space<any>>) target(%145 : memref<1x128xf32, #tpu.memory_space<vmem>>) target_semaphore(%147 : memref<!tpu.dma_semaphore, #tpu.memory_space<semaphore_mem>>)
    %c21_i32 = arith.constant 21 : i32
    %148 = arith.addi %0, %c21_i32 : i32
    %149 = arith.index_cast %148 : i32 to index
    %150 = memref.load %arg1[%149] : memref<64xi32, #tpu.memory_space<smem>>
    %c21_i32_84 = arith.constant 21 : i32
    %c0_i32_85 = arith.constant 0 : i32
    %151 = tpu.memref_slice %arg2[%150, %c0_i32_85] : memref<64x128xf32, #tpu.memory_space<any>> -> memref<1x128xf32, #tpu.memory_space<any>>
    %c21_i32_86 = arith.constant 21 : i32
    %c0_i32_87 = arith.constant 0 : i32
    %152 = tpu.memref_slice %arg4[%c21_i32_86, %c0_i32_87] : memref<32x128xf32, #tpu.memory_space<vmem>> -> memref<1x128xf32, #tpu.memory_space<vmem>>
    %153 = tpu.memref_slice %arg5[%c21_i32_84] : memref<32x!tpu.dma_semaphore, #tpu.memory_space<semaphore_mem>> -> memref<1x!tpu.dma_semaphore, #tpu.memory_space<semaphore_mem>>
    %154 = tpu.memref_squeeze %153 : memref<1x!tpu.dma_semaphore, #tpu.memory_space<semaphore_mem>> -> memref<!tpu.dma_semaphore, #tpu.memory_space<semaphore_mem>>
    tpu.enqueue_dma source(%151 : memref<1x128xf32, #tpu.memory_space<any>>) target(%152 : memref<1x128xf32, #tpu.memory_space<vmem>>) target_semaphore(%154 : memref<!tpu.dma_semaphore, #tpu.memory_space<semaphore_mem>>)
    %c22_i32 = arith.constant 22 : i32
    %155 = arith.addi %0, %c22_i32 : i32
    %156 = arith.index_cast %155 : i32 to index
    %157 = memref.load %arg1[%156] : memref<64xi32, #tpu.memory_space<smem>>
    %c22_i32_88 = arith.constant 22 : i32
    %c0_i32_89 = arith.constant 0 : i32
    %158 = tpu.memref_slice %arg2[%157, %c0_i32_89] : memref<64x128xf32, #tpu.memory_space<any>> -> memref<1x128xf32, #tpu.memory_space<any>>
    %c22_i32_90 = arith.constant 22 : i32
    %c0_i32_91 = arith.constant 0 : i32
    %159 = tpu.memref_slice %arg4[%c22_i32_90, %c0_i32_91] : memref<32x128xf32, #tpu.memory_space<vmem>> -> memref<1x128xf32, #tpu.memory_space<vmem>>
    %160 = tpu.memref_slice %arg5[%c22_i32_88] : memref<32x!tpu.dma_semaphore, #tpu.memory_space<semaphore_mem>> -> memref<1x!tpu.dma_semaphore, #tpu.memory_space<semaphore_mem>>
    %161 = tpu.memref_squeeze %160 : memref<1x!tpu.dma_semaphore, #tpu.memory_space<semaphore_mem>> -> memref<!tpu.dma_semaphore, #tpu.memory_space<semaphore_mem>>
    tpu.enqueue_dma source(%158 : memref<1x128xf32, #tpu.memory_space<any>>) target(%159 : memref<1x128xf32, #tpu.memory_space<vmem>>) target_semaphore(%161 : memref<!tpu.dma_semaphore, #tpu.memory_space<semaphore_mem>>)
    %c23_i32 = arith.constant 23 : i32
    %162 = arith.addi %0, %c23_i32 : i32
    %163 = arith.index_cast %162 : i32 to index
    %164 = memref.load %arg1[%163] : memref<64xi32, #tpu.memory_space<smem>>
    %c23_i32_92 = arith.constant 23 : i32
    %c0_i32_93 = arith.constant 0 : i32
    %165 = tpu.memref_slice %arg2[%164, %c0_i32_93] : memref<64x128xf32, #tpu.memory_space<any>> -> memref<1x128xf32, #tpu.memory_space<any>>
    %c23_i32_94 = arith.constant 23 : i32
    %c0_i32_95 = arith.constant 0 : i32
    %166 = tpu.memref_slice %arg4[%c23_i32_94, %c0_i32_95] : memref<32x128xf32, #tpu.memory_space<vmem>> -> memref<1x128xf32, #tpu.memory_space<vmem>>
    %167 = tpu.memref_slice %arg5[%c23_i32_92] : memref<32x!tpu.dma_semaphore, #tpu.memory_space<semaphore_mem>> -> memref<1x!tpu.dma_semaphore, #tpu.memory_space<semaphore_mem>>
    %168 = tpu.memref_squeeze %167 : memref<1x!tpu.dma_semaphore, #tpu.memory_space<semaphore_mem>> -> memref<!tpu.dma_semaphore, #tpu.memory_space<semaphore_mem>>
    tpu.enqueue_dma source(%165 : memref<1x128xf32, #tpu.memory_space<any>>) target(%166 : memref<1x128xf32, #tpu.memory_space<vmem>>) target_semaphore(%168 : memref<!tpu.dma_semaphore, #tpu.memory_space<semaphore_mem>>)
    %c24_i32 = arith.constant 24 : i32
    %169 = arith.addi %0, %c24_i32 : i32
    %170 = arith.index_cast %169 : i32 to index
    %171 = memref.load %arg1[%170] : memref<64xi32, #tpu.memory_space<smem>>
    %c24_i32_96 = arith.constant 24 : i32
    %c0_i32_97 = arith.constant 0 : i32
    %172 = tpu.memref_slice %arg2[%171, %c0_i32_97] : memref<64x128xf32, #tpu.memory_space<any>> -> memref<1x128xf32, #tpu.memory_space<any>>
    %c24_i32_98 = arith.constant 24 : i32
    %c0_i32_99 = arith.constant 0 : i32
    %173 = tpu.memref_slice %arg4[%c24_i32_98, %c0_i32_99] : memref<32x128xf32, #tpu.memory_space<vmem>> -> memref<1x128xf32, #tpu.memory_space<vmem>>
    %174 = tpu.memref_slice %arg5[%c24_i32_96] : memref<32x!tpu.dma_semaphore, #tpu.memory_space<semaphore_mem>> -> memref<1x!tpu.dma_semaphore, #tpu.memory_space<semaphore_mem>>
    %175 = tpu.memref_squeeze %174 : memref<1x!tpu.dma_semaphore, #tpu.memory_space<semaphore_mem>> -> memref<!tpu.dma_semaphore, #tpu.memory_space<semaphore_mem>>
    tpu.enqueue_dma source(%172 : memref<1x128xf32, #tpu.memory_space<any>>) target(%173 : memref<1x128xf32, #tpu.memory_space<vmem>>) target_semaphore(%175 : memref<!tpu.dma_semaphore, #tpu.memory_space<semaphore_mem>>)
    %c25_i32 = arith.constant 25 : i32
    %176 = arith.addi %0, %c25_i32 : i32
    %177 = arith.index_cast %176 : i32 to index
    %178 = memref.load %arg1[%177] : memref<64xi32, #tpu.memory_space<smem>>
    %c25_i32_100 = arith.constant 25 : i32
    %c0_i32_101 = arith.constant 0 : i32
    %179 = tpu.memref_slice %arg2[%178, %c0_i32_101] : memref<64x128xf32, #tpu.memory_space<any>> -> memref<1x128xf32, #tpu.memory_space<any>>
    %c25_i32_102 = arith.constant 25 : i32
    %c0_i32_103 = arith.constant 0 : i32
    %180 = tpu.memref_slice %arg4[%c25_i32_102, %c0_i32_103] : memref<32x128xf32, #tpu.memory_space<vmem>> -> memref<1x128xf32, #tpu.memory_space<vmem>>
    %181 = tpu.memref_slice %arg5[%c25_i32_100] : memref<32x!tpu.dma_semaphore, #tpu.memory_space<semaphore_mem>> -> memref<1x!tpu.dma_semaphore, #tpu.memory_space<semaphore_mem>>
    %182 = tpu.memref_squeeze %181 : memref<1x!tpu.dma_semaphore, #tpu.memory_space<semaphore_mem>> -> memref<!tpu.dma_semaphore, #tpu.memory_space<semaphore_mem>>
    tpu.enqueue_dma source(%179 : memref<1x128xf32, #tpu.memory_space<any>>) target(%180 : memref<1x128xf32, #tpu.memory_space<vmem>>) target_semaphore(%182 : memref<!tpu.dma_semaphore, #tpu.memory_space<semaphore_mem>>)
    %c26_i32 = arith.constant 26 : i32
    %183 = arith.addi %0, %c26_i32 : i32
    %184 = arith.index_cast %183 : i32 to index
    %185 = memref.load %arg1[%184] : memref<64xi32, #tpu.memory_space<smem>>
    %c26_i32_104 = arith.constant 26 : i32
    %c0_i32_105 = arith.constant 0 : i32
    %186 = tpu.memref_slice %arg2[%185, %c0_i32_105] : memref<64x128xf32, #tpu.memory_space<any>> -> memref<1x128xf32, #tpu.memory_space<any>>
    %c26_i32_106 = arith.constant 26 : i32
    %c0_i32_107 = arith.constant 0 : i32
    %187 = tpu.memref_slice %arg4[%c26_i32_106, %c0_i32_107] : memref<32x128xf32, #tpu.memory_space<vmem>> -> memref<1x128xf32, #tpu.memory_space<vmem>>
    %188 = tpu.memref_slice %arg5[%c26_i32_104] : memref<32x!tpu.dma_semaphore, #tpu.memory_space<semaphore_mem>> -> memref<1x!tpu.dma_semaphore, #tpu.memory_space<semaphore_mem>>
    %189 = tpu.memref_squeeze %188 : memref<1x!tpu.dma_semaphore, #tpu.memory_space<semaphore_mem>> -> memref<!tpu.dma_semaphore, #tpu.memory_space<semaphore_mem>>
    tpu.enqueue_dma source(%186 : memref<1x128xf32, #tpu.memory_space<any>>) target(%187 : memref<1x128xf32, #tpu.memory_space<vmem>>) target_semaphore(%189 : memref<!tpu.dma_semaphore, #tpu.memory_space<semaphore_mem>>)
    %c27_i32 = arith.constant 27 : i32
    %190 = arith.addi %0, %c27_i32 : i32
    %191 = arith.index_cast %190 : i32 to index
    %192 = memref.load %arg1[%191] : memref<64xi32, #tpu.memory_space<smem>>
    %c27_i32_108 = arith.constant 27 : i32
    %c0_i32_109 = arith.constant 0 : i32
    %193 = tpu.memref_slice %arg2[%192, %c0_i32_109] : memref<64x128xf32, #tpu.memory_space<any>> -> memref<1x128xf32, #tpu.memory_space<any>>
    %c27_i32_110 = arith.constant 27 : i32
    %c0_i32_111 = arith.constant 0 : i32
    %194 = tpu.memref_slice %arg4[%c27_i32_110, %c0_i32_111] : memref<32x128xf32, #tpu.memory_space<vmem>> -> memref<1x128xf32, #tpu.memory_space<vmem>>
    %195 = tpu.memref_slice %arg5[%c27_i32_108] : memref<32x!tpu.dma_semaphore, #tpu.memory_space<semaphore_mem>> -> memref<1x!tpu.dma_semaphore, #tpu.memory_space<semaphore_mem>>
    %196 = tpu.memref_squeeze %195 : memref<1x!tpu.dma_semaphore, #tpu.memory_space<semaphore_mem>> -> memref<!tpu.dma_semaphore, #tpu.memory_space<semaphore_mem>>
    tpu.enqueue_dma source(%193 : memref<1x128xf32, #tpu.memory_space<any>>) target(%194 : memref<1x128xf32, #tpu.memory_space<vmem>>) target_semaphore(%196 : memref<!tpu.dma_semaphore, #tpu.memory_space<semaphore_mem>>)
    %c28_i32 = arith.constant 28 : i32
    %197 = arith.addi %0, %c28_i32 : i32
    %198 = arith.index_cast %197 : i32 to index
    %199 = memref.load %arg1[%198] : memref<64xi32, #tpu.memory_space<smem>>
    %c28_i32_112 = arith.constant 28 : i32
    %c0_i32_113 = arith.constant 0 : i32
    %200 = tpu.memref_slice %arg2[%199, %c0_i32_113] : memref<64x128xf32, #tpu.memory_space<any>> -> memref<1x128xf32, #tpu.memory_space<any>>
    %c28_i32_114 = arith.constant 28 : i32
    %c0_i32_115 = arith.constant 0 : i32
    %201 = tpu.memref_slice %arg4[%c28_i32_114, %c0_i32_115] : memref<32x128xf32, #tpu.memory_space<vmem>> -> memref<1x128xf32, #tpu.memory_space<vmem>>
    %202 = tpu.memref_slice %arg5[%c28_i32_112] : memref<32x!tpu.dma_semaphore, #tpu.memory_space<semaphore_mem>> -> memref<1x!tpu.dma_semaphore, #tpu.memory_space<semaphore_mem>>
    %203 = tpu.memref_squeeze %202 : memref<1x!tpu.dma_semaphore, #tpu.memory_space<semaphore_mem>> -> memref<!tpu.dma_semaphore, #tpu.memory_space<semaphore_mem>>
    tpu.enqueue_dma source(%200 : memref<1x128xf32, #tpu.memory_space<any>>) target(%201 : memref<1x128xf32, #tpu.memory_space<vmem>>) target_semaphore(%203 : memref<!tpu.dma_semaphore, #tpu.memory_space<semaphore_mem>>)
    %c29_i32 = arith.constant 29 : i32
    %204 = arith.addi %0, %c29_i32 : i32
    %205 = arith.index_cast %204 : i32 to index
    %206 = memref.load %arg1[%205] : memref<64xi32, #tpu.memory_space<smem>>
    %c29_i32_116 = arith.constant 29 : i32
    %c0_i32_117 = arith.constant 0 : i32
    %207 = tpu.memref_slice %arg2[%206, %c0_i32_117] : memref<64x128xf32, #tpu.memory_space<any>> -> memref<1x128xf32, #tpu.memory_space<any>>
    %c29_i32_118 = arith.constant 29 : i32
    %c0_i32_119 = arith.constant 0 : i32
    %208 = tpu.memref_slice %arg4[%c29_i32_118, %c0_i32_119] : memref<32x128xf32, #tpu.memory_space<vmem>> -> memref<1x128xf32, #tpu.memory_space<vmem>>
    %209 = tpu.memref_slice %arg5[%c29_i32_116] : memref<32x!tpu.dma_semaphore, #tpu.memory_space<semaphore_mem>> -> memref<1x!tpu.dma_semaphore, #tpu.memory_space<semaphore_mem>>
    %210 = tpu.memref_squeeze %209 : memref<1x!tpu.dma_semaphore, #tpu.memory_space<semaphore_mem>> -> memref<!tpu.dma_semaphore, #tpu.memory_space<semaphore_mem>>
    tpu.enqueue_dma source(%207 : memref<1x128xf32, #tpu.memory_space<any>>) target(%208 : memref<1x128xf32, #tpu.memory_space<vmem>>) target_semaphore(%210 : memref<!tpu.dma_semaphore, #tpu.memory_space<semaphore_mem>>)
    %c30_i32 = arith.constant 30 : i32
    %211 = arith.addi %0, %c30_i32 : i32
    %212 = arith.index_cast %211 : i32 to index
    %213 = memref.load %arg1[%212] : memref<64xi32, #tpu.memory_space<smem>>
    %c30_i32_120 = arith.constant 30 : i32
    %c0_i32_121 = arith.constant 0 : i32
    %214 = tpu.memref_slice %arg2[%213, %c0_i32_121] : memref<64x128xf32, #tpu.memory_space<any>> -> memref<1x128xf32, #tpu.memory_space<any>>
    %c30_i32_122 = arith.constant 30 : i32
    %c0_i32_123 = arith.constant 0 : i32
    %215 = tpu.memref_slice %arg4[%c30_i32_122, %c0_i32_123] : memref<32x128xf32, #tpu.memory_space<vmem>> -> memref<1x128xf32, #tpu.memory_space<vmem>>
    %216 = tpu.memref_slice %arg5[%c30_i32_120] : memref<32x!tpu.dma_semaphore, #tpu.memory_space<semaphore_mem>> -> memref<1x!tpu.dma_semaphore, #tpu.memory_space<semaphore_mem>>
    %217 = tpu.memref_squeeze %216 : memref<1x!tpu.dma_semaphore, #tpu.memory_space<semaphore_mem>> -> memref<!tpu.dma_semaphore, #tpu.memory_space<semaphore_mem>>
    tpu.enqueue_dma source(%214 : memref<1x128xf32, #tpu.memory_space<any>>) target(%215 : memref<1x128xf32, #tpu.memory_space<vmem>>) target_semaphore(%217 : memref<!tpu.dma_semaphore, #tpu.memory_space<semaphore_mem>>)
    %c31_i32 = arith.constant 31 : i32
    %218 = arith.addi %0, %c31_i32 : i32
    %219 = arith.index_cast %218 : i32 to index
    %220 = memref.load %arg1[%219] : memref<64xi32, #tpu.memory_space<smem>>
    %c31_i32_124 = arith.constant 31 : i32
    %c0_i32_125 = arith.constant 0 : i32
    %221 = tpu.memref_slice %arg2[%220, %c0_i32_125] : memref<64x128xf32, #tpu.memory_space<any>> -> memref<1x128xf32, #tpu.memory_space<any>>
    %c31_i32_126 = arith.constant 31 : i32
    %c0_i32_127 = arith.constant 0 : i32
    %222 = tpu.memref_slice %arg4[%c31_i32_126, %c0_i32_127] : memref<32x128xf32, #tpu.memory_space<vmem>> -> memref<1x128xf32, #tpu.memory_space<vmem>>
    %223 = tpu.memref_slice %arg5[%c31_i32_124] : memref<32x!tpu.dma_semaphore, #tpu.memory_space<semaphore_mem>> -> memref<1x!tpu.dma_semaphore, #tpu.memory_space<semaphore_mem>>
    %224 = tpu.memref_squeeze %223 : memref<1x!tpu.dma_semaphore, #tpu.memory_space<semaphore_mem>> -> memref<!tpu.dma_semaphore, #tpu.memory_space<semaphore_mem>>
    tpu.enqueue_dma source(%221 : memref<1x128xf32, #tpu.memory_space<any>>) target(%222 : memref<1x128xf32, #tpu.memory_space<vmem>>) target_semaphore(%224 : memref<!tpu.dma_semaphore, #tpu.memory_space<semaphore_mem>>)
    %c0_i32_128 = arith.constant 0 : i32
    %c0_i32_129 = arith.constant 0 : i32
    %c0_i32_130 = arith.constant 0 : i32
    %225 = tpu.memref_slice %arg2[%c0_i32_129, %c0_i32_130] : memref<64x128xf32, #tpu.memory_space<any>> -> memref<1x128xf32, #tpu.memory_space<any>>
    %c0_i32_131 = arith.constant 0 : i32
    %c0_i32_132 = arith.constant 0 : i32
    %226 = tpu.memref_slice %arg4[%c0_i32_131, %c0_i32_132] : memref<32x128xf32, #tpu.memory_space<vmem>> -> memref<1x128xf32, #tpu.memory_space<vmem>>
    %227 = tpu.memref_slice %arg5[%c0_i32_128] : memref<32x!tpu.dma_semaphore, #tpu.memory_space<semaphore_mem>> -> memref<1x!tpu.dma_semaphore, #tpu.memory_space<semaphore_mem>>
    %228 = tpu.memref_squeeze %227 : memref<1x!tpu.dma_semaphore, #tpu.memory_space<semaphore_mem>> -> memref<!tpu.dma_semaphore, #tpu.memory_space<semaphore_mem>>
    tpu.wait_dma2 semaphore(%228 : memref<!tpu.dma_semaphore, #tpu.memory_space<semaphore_mem>>) src(%225 : memref<1x128xf32, #tpu.memory_space<any>>) dst(%226 : memref<1x128xf32, #tpu.memory_space<vmem>>)
    %c1_i32_133 = arith.constant 1 : i32
    %c0_i32_134 = arith.constant 0 : i32
    %c0_i32_135 = arith.constant 0 : i32
    %229 = tpu.memref_slice %arg2[%c0_i32_134, %c0_i32_135] : memref<64x128xf32, #tpu.memory_space<any>> -> memref<1x128xf32, #tpu.memory_space<any>>
    %c1_i32_136 = arith.constant 1 : i32
    %c0_i32_137 = arith.constant 0 : i32
    %230 = tpu.memref_slice %arg4[%c1_i32_136, %c0_i32_137] : memref<32x128xf32, #tpu.memory_space<vmem>> -> memref<1x128xf32, #tpu.memory_space<vmem>>
    %231 = tpu.memref_slice %arg5[%c1_i32_133] : memref<32x!tpu.dma_semaphore, #tpu.memory_space<semaphore_mem>> -> memref<1x!tpu.dma_semaphore, #tpu.memory_space<semaphore_mem>>
    %232 = tpu.memref_squeeze %231 : memref<1x!tpu.dma_semaphore, #tpu.memory_space<semaphore_mem>> -> memref<!tpu.dma_semaphore, #tpu.memory_space<semaphore_mem>>
    tpu.wait_dma2 semaphore(%232 : memref<!tpu.dma_semaphore, #tpu.memory_space<semaphore_mem>>) src(%229 : memref<1x128xf32, #tpu.memory_space<any>>) dst(%230 : memref<1x128xf32, #tpu.memory_space<vmem>>)
    %c2_i32_138 = arith.constant 2 : i32
    %c0_i32_139 = arith.constant 0 : i32
    %c0_i32_140 = arith.constant 0 : i32
    %233 = tpu.memref_slice %arg2[%c0_i32_139, %c0_i32_140] : memref<64x128xf32, #tpu.memory_space<any>> -> memref<1x128xf32, #tpu.memory_space<any>>
    %c2_i32_141 = arith.constant 2 : i32
    %c0_i32_142 = arith.constant 0 : i32
    %234 = tpu.memref_slice %arg4[%c2_i32_141, %c0_i32_142] : memref<32x128xf32, #tpu.memory_space<vmem>> -> memref<1x128xf32, #tpu.memory_space<vmem>>
    %235 = tpu.memref_slice %arg5[%c2_i32_138] : memref<32x!tpu.dma_semaphore, #tpu.memory_space<semaphore_mem>> -> memref<1x!tpu.dma_semaphore, #tpu.memory_space<semaphore_mem>>
    %236 = tpu.memref_squeeze %235 : memref<1x!tpu.dma_semaphore, #tpu.memory_space<semaphore_mem>> -> memref<!tpu.dma_semaphore, #tpu.memory_space<semaphore_mem>>
    tpu.wait_dma2 semaphore(%236 : memref<!tpu.dma_semaphore, #tpu.memory_space<semaphore_mem>>) src(%233 : memref<1x128xf32, #tpu.memory_space<any>>) dst(%234 : memref<1x128xf32, #tpu.memory_space<vmem>>)
    %c3_i32_143 = arith.constant 3 : i32
    %c0_i32_144 = arith.constant 0 : i32
    %c0_i32_145 = arith.constant 0 : i32
    %237 = tpu.memref_slice %arg2[%c0_i32_144, %c0_i32_145] : memref<64x128xf32, #tpu.memory_space<any>> -> memref<1x128xf32, #tpu.memory_space<any>>
    %c3_i32_146 = arith.constant 3 : i32
    %c0_i32_147 = arith.constant 0 : i32
    %238 = tpu.memref_slice %arg4[%c3_i32_146, %c0_i32_147] : memref<32x128xf32, #tpu.memory_space<vmem>> -> memref<1x128xf32, #tpu.memory_space<vmem>>
    %239 = tpu.memref_slice %arg5[%c3_i32_143] : memref<32x!tpu.dma_semaphore, #tpu.memory_space<semaphore_mem>> -> memref<1x!tpu.dma_semaphore, #tpu.memory_space<semaphore_mem>>
    %240 = tpu.memref_squeeze %239 : memref<1x!tpu.dma_semaphore, #tpu.memory_space<semaphore_mem>> -> memref<!tpu.dma_semaphore, #tpu.memory_space<semaphore_mem>>
    tpu.wait_dma2 semaphore(%240 : memref<!tpu.dma_semaphore, #tpu.memory_space<semaphore_mem>>) src(%237 : memref<1x128xf32, #tpu.memory_space<any>>) dst(%238 : memref<1x128xf32, #tpu.memory_space<vmem>>)
    %c4_i32_148 = arith.constant 4 : i32
    %c0_i32_149 = arith.constant 0 : i32
    %c0_i32_150 = arith.constant 0 : i32
    %241 = tpu.memref_slice %arg2[%c0_i32_149, %c0_i32_150] : memref<64x128xf32, #tpu.memory_space<any>> -> memref<1x128xf32, #tpu.memory_space<any>>
    %c4_i32_151 = arith.constant 4 : i32
    %c0_i32_152 = arith.constant 0 : i32
    %242 = tpu.memref_slice %arg4[%c4_i32_151, %c0_i32_152] : memref<32x128xf32, #tpu.memory_space<vmem>> -> memref<1x128xf32, #tpu.memory_space<vmem>>
    %243 = tpu.memref_slice %arg5[%c4_i32_148] : memref<32x!tpu.dma_semaphore, #tpu.memory_space<semaphore_mem>> -> memref<1x!tpu.dma_semaphore, #tpu.memory_space<semaphore_mem>>
    %244 = tpu.memref_squeeze %243 : memref<1x!tpu.dma_semaphore, #tpu.memory_space<semaphore_mem>> -> memref<!tpu.dma_semaphore, #tpu.memory_space<semaphore_mem>>
    tpu.wait_dma2 semaphore(%244 : memref<!tpu.dma_semaphore, #tpu.memory_space<semaphore_mem>>) src(%241 : memref<1x128xf32, #tpu.memory_space<any>>) dst(%242 : memref<1x128xf32, #tpu.memory_space<vmem>>)
    %c5_i32_153 = arith.constant 5 : i32
    %c0_i32_154 = arith.constant 0 : i32
    %c0_i32_155 = arith.constant 0 : i32
    %245 = tpu.memref_slice %arg2[%c0_i32_154, %c0_i32_155] : memref<64x128xf32, #tpu.memory_space<any>> -> memref<1x128xf32, #tpu.memory_space<any>>
    %c5_i32_156 = arith.constant 5 : i32
    %c0_i32_157 = arith.constant 0 : i32
    %246 = tpu.memref_slice %arg4[%c5_i32_156, %c0_i32_157] : memref<32x128xf32, #tpu.memory_space<vmem>> -> memref<1x128xf32, #tpu.memory_space<vmem>>
    %247 = tpu.memref_slice %arg5[%c5_i32_153] : memref<32x!tpu.dma_semaphore, #tpu.memory_space<semaphore_mem>> -> memref<1x!tpu.dma_semaphore, #tpu.memory_space<semaphore_mem>>
    %248 = tpu.memref_squeeze %247 : memref<1x!tpu.dma_semaphore, #tpu.memory_space<semaphore_mem>> -> memref<!tpu.dma_semaphore, #tpu.memory_space<semaphore_mem>>
    tpu.wait_dma2 semaphore(%248 : memref<!tpu.dma_semaphore, #tpu.memory_space<semaphore_mem>>) src(%245 : memref<1x128xf32, #tpu.memory_space<any>>) dst(%246 : memref<1x128xf32, #tpu.memory_space<vmem>>)
    %c6_i32_158 = arith.constant 6 : i32
    %c0_i32_159 = arith.constant 0 : i32
    %c0_i32_160 = arith.constant 0 : i32
    %249 = tpu.memref_slice %arg2[%c0_i32_159, %c0_i32_160] : memref<64x128xf32, #tpu.memory_space<any>> -> memref<1x128xf32, #tpu.memory_space<any>>
    %c6_i32_161 = arith.constant 6 : i32
    %c0_i32_162 = arith.constant 0 : i32
    %250 = tpu.memref_slice %arg4[%c6_i32_161, %c0_i32_162] : memref<32x128xf32, #tpu.memory_space<vmem>> -> memref<1x128xf32, #tpu.memory_space<vmem>>
    %251 = tpu.memref_slice %arg5[%c6_i32_158] : memref<32x!tpu.dma_semaphore, #tpu.memory_space<semaphore_mem>> -> memref<1x!tpu.dma_semaphore, #tpu.memory_space<semaphore_mem>>
    %252 = tpu.memref_squeeze %251 : memref<1x!tpu.dma_semaphore, #tpu.memory_space<semaphore_mem>> -> memref<!tpu.dma_semaphore, #tpu.memory_space<semaphore_mem>>
    tpu.wait_dma2 semaphore(%252 : memref<!tpu.dma_semaphore, #tpu.memory_space<semaphore_mem>>) src(%249 : memref<1x128xf32, #tpu.memory_space<any>>) dst(%250 : memref<1x128xf32, #tpu.memory_space<vmem>>)
    %c7_i32_163 = arith.constant 7 : i32
    %c0_i32_164 = arith.constant 0 : i32
    %c0_i32_165 = arith.constant 0 : i32
    %253 = tpu.memref_slice %arg2[%c0_i32_164, %c0_i32_165] : memref<64x128xf32, #tpu.memory_space<any>> -> memref<1x128xf32, #tpu.memory_space<any>>
    %c7_i32_166 = arith.constant 7 : i32
    %c0_i32_167 = arith.constant 0 : i32
    %254 = tpu.memref_slice %arg4[%c7_i32_166, %c0_i32_167] : memref<32x128xf32, #tpu.memory_space<vmem>> -> memref<1x128xf32, #tpu.memory_space<vmem>>
    %255 = tpu.memref_slice %arg5[%c7_i32_163] : memref<32x!tpu.dma_semaphore, #tpu.memory_space<semaphore_mem>> -> memref<1x!tpu.dma_semaphore, #tpu.memory_space<semaphore_mem>>
    %256 = tpu.memref_squeeze %255 : memref<1x!tpu.dma_semaphore, #tpu.memory_space<semaphore_mem>> -> memref<!tpu.dma_semaphore, #tpu.memory_space<semaphore_mem>>
    tpu.wait_dma2 semaphore(%256 : memref<!tpu.dma_semaphore, #tpu.memory_space<semaphore_mem>>) src(%253 : memref<1x128xf32, #tpu.memory_space<any>>) dst(%254 : memref<1x128xf32, #tpu.memory_space<vmem>>)
    %c8_i32_168 = arith.constant 8 : i32
    %c0_i32_169 = arith.constant 0 : i32
    %c0_i32_170 = arith.constant 0 : i32
    %257 = tpu.memref_slice %arg2[%c0_i32_169, %c0_i32_170] : memref<64x128xf32, #tpu.memory_space<any>> -> memref<1x128xf32, #tpu.memory_space<any>>
    %c8_i32_171 = arith.constant 8 : i32
    %c0_i32_172 = arith.constant 0 : i32
    %258 = tpu.memref_slice %arg4[%c8_i32_171, %c0_i32_172] : memref<32x128xf32, #tpu.memory_space<vmem>> -> memref<1x128xf32, #tpu.memory_space<vmem>>
    %259 = tpu.memref_slice %arg5[%c8_i32_168] : memref<32x!tpu.dma_semaphore, #tpu.memory_space<semaphore_mem>> -> memref<1x!tpu.dma_semaphore, #tpu.memory_space<semaphore_mem>>
    %260 = tpu.memref_squeeze %259 : memref<1x!tpu.dma_semaphore, #tpu.memory_space<semaphore_mem>> -> memref<!tpu.dma_semaphore, #tpu.memory_space<semaphore_mem>>
    tpu.wait_dma2 semaphore(%260 : memref<!tpu.dma_semaphore, #tpu.memory_space<semaphore_mem>>) src(%257 : memref<1x128xf32, #tpu.memory_space<any>>) dst(%258 : memref<1x128xf32, #tpu.memory_space<vmem>>)
    %c9_i32_173 = arith.constant 9 : i32
    %c0_i32_174 = arith.constant 0 : i32
    %c0_i32_175 = arith.constant 0 : i32
    %261 = tpu.memref_slice %arg2[%c0_i32_174, %c0_i32_175] : memref<64x128xf32, #tpu.memory_space<any>> -> memref<1x128xf32, #tpu.memory_space<any>>
    %c9_i32_176 = arith.constant 9 : i32
    %c0_i32_177 = arith.constant 0 : i32
    %262 = tpu.memref_slice %arg4[%c9_i32_176, %c0_i32_177] : memref<32x128xf32, #tpu.memory_space<vmem>> -> memref<1x128xf32, #tpu.memory_space<vmem>>
    %263 = tpu.memref_slice %arg5[%c9_i32_173] : memref<32x!tpu.dma_semaphore, #tpu.memory_space<semaphore_mem>> -> memref<1x!tpu.dma_semaphore, #tpu.memory_space<semaphore_mem>>
    %264 = tpu.memref_squeeze %263 : memref<1x!tpu.dma_semaphore, #tpu.memory_space<semaphore_mem>> -> memref<!tpu.dma_semaphore, #tpu.memory_space<semaphore_mem>>
    tpu.wait_dma2 semaphore(%264 : memref<!tpu.dma_semaphore, #tpu.memory_space<semaphore_mem>>) src(%261 : memref<1x128xf32, #tpu.memory_space<any>>) dst(%262 : memref<1x128xf32, #tpu.memory_space<vmem>>)
    %c10_i32_178 = arith.constant 10 : i32
    %c0_i32_179 = arith.constant 0 : i32
    %c0_i32_180 = arith.constant 0 : i32
    %265 = tpu.memref_slice %arg2[%c0_i32_179, %c0_i32_180] : memref<64x128xf32, #tpu.memory_space<any>> -> memref<1x128xf32, #tpu.memory_space<any>>
    %c10_i32_181 = arith.constant 10 : i32
    %c0_i32_182 = arith.constant 0 : i32
    %266 = tpu.memref_slice %arg4[%c10_i32_181, %c0_i32_182] : memref<32x128xf32, #tpu.memory_space<vmem>> -> memref<1x128xf32, #tpu.memory_space<vmem>>
    %267 = tpu.memref_slice %arg5[%c10_i32_178] : memref<32x!tpu.dma_semaphore, #tpu.memory_space<semaphore_mem>> -> memref<1x!tpu.dma_semaphore, #tpu.memory_space<semaphore_mem>>
    %268 = tpu.memref_squeeze %267 : memref<1x!tpu.dma_semaphore, #tpu.memory_space<semaphore_mem>> -> memref<!tpu.dma_semaphore, #tpu.memory_space<semaphore_mem>>
    tpu.wait_dma2 semaphore(%268 : memref<!tpu.dma_semaphore, #tpu.memory_space<semaphore_mem>>) src(%265 : memref<1x128xf32, #tpu.memory_space<any>>) dst(%266 : memref<1x128xf32, #tpu.memory_space<vmem>>)
    %c11_i32_183 = arith.constant 11 : i32
    %c0_i32_184 = arith.constant 0 : i32
    %c0_i32_185 = arith.constant 0 : i32
    %269 = tpu.memref_slice %arg2[%c0_i32_184, %c0_i32_185] : memref<64x128xf32, #tpu.memory_space<any>> -> memref<1x128xf32, #tpu.memory_space<any>>
    %c11_i32_186 = arith.constant 11 : i32
    %c0_i32_187 = arith.constant 0 : i32
    %270 = tpu.memref_slice %arg4[%c11_i32_186, %c0_i32_187] : memref<32x128xf32, #tpu.memory_space<vmem>> -> memref<1x128xf32, #tpu.memory_space<vmem>>
    %271 = tpu.memref_slice %arg5[%c11_i32_183] : memref<32x!tpu.dma_semaphore, #tpu.memory_space<semaphore_mem>> -> memref<1x!tpu.dma_semaphore, #tpu.memory_space<semaphore_mem>>
    %272 = tpu.memref_squeeze %271 : memref<1x!tpu.dma_semaphore, #tpu.memory_space<semaphore_mem>> -> memref<!tpu.dma_semaphore, #tpu.memory_space<semaphore_mem>>
    tpu.wait_dma2 semaphore(%272 : memref<!tpu.dma_semaphore, #tpu.memory_space<semaphore_mem>>) src(%269 : memref<1x128xf32, #tpu.memory_space<any>>) dst(%270 : memref<1x128xf32, #tpu.memory_space<vmem>>)
    %c12_i32_188 = arith.constant 12 : i32
    %c0_i32_189 = arith.constant 0 : i32
    %c0_i32_190 = arith.constant 0 : i32
    %273 = tpu.memref_slice %arg2[%c0_i32_189, %c0_i32_190] : memref<64x128xf32, #tpu.memory_space<any>> -> memref<1x128xf32, #tpu.memory_space<any>>
    %c12_i32_191 = arith.constant 12 : i32
    %c0_i32_192 = arith.constant 0 : i32
    %274 = tpu.memref_slice %arg4[%c12_i32_191, %c0_i32_192] : memref<32x128xf32, #tpu.memory_space<vmem>> -> memref<1x128xf32, #tpu.memory_space<vmem>>
    %275 = tpu.memref_slice %arg5[%c12_i32_188] : memref<32x!tpu.dma_semaphore, #tpu.memory_space<semaphore_mem>> -> memref<1x!tpu.dma_semaphore, #tpu.memory_space<semaphore_mem>>
    %276 = tpu.memref_squeeze %275 : memref<1x!tpu.dma_semaphore, #tpu.memory_space<semaphore_mem>> -> memref<!tpu.dma_semaphore, #tpu.memory_space<semaphore_mem>>
    tpu.wait_dma2 semaphore(%276 : memref<!tpu.dma_semaphore, #tpu.memory_space<semaphore_mem>>) src(%273 : memref<1x128xf32, #tpu.memory_space<any>>) dst(%274 : memref<1x128xf32, #tpu.memory_space<vmem>>)
    %c13_i32_193 = arith.constant 13 : i32
    %c0_i32_194 = arith.constant 0 : i32
    %c0_i32_195 = arith.constant 0 : i32
    %277 = tpu.memref_slice %arg2[%c0_i32_194, %c0_i32_195] : memref<64x128xf32, #tpu.memory_space<any>> -> memref<1x128xf32, #tpu.memory_space<any>>
    %c13_i32_196 = arith.constant 13 : i32
    %c0_i32_197 = arith.constant 0 : i32
    %278 = tpu.memref_slice %arg4[%c13_i32_196, %c0_i32_197] : memref<32x128xf32, #tpu.memory_space<vmem>> -> memref<1x128xf32, #tpu.memory_space<vmem>>
    %279 = tpu.memref_slice %arg5[%c13_i32_193] : memref<32x!tpu.dma_semaphore, #tpu.memory_space<semaphore_mem>> -> memref<1x!tpu.dma_semaphore, #tpu.memory_space<semaphore_mem>>
    %280 = tpu.memref_squeeze %279 : memref<1x!tpu.dma_semaphore, #tpu.memory_space<semaphore_mem>> -> memref<!tpu.dma_semaphore, #tpu.memory_space<semaphore_mem>>
    tpu.wait_dma2 semaphore(%280 : memref<!tpu.dma_semaphore, #tpu.memory_space<semaphore_mem>>) src(%277 : memref<1x128xf32, #tpu.memory_space<any>>) dst(%278 : memref<1x128xf32, #tpu.memory_space<vmem>>)
    %c14_i32_198 = arith.constant 14 : i32
    %c0_i32_199 = arith.constant 0 : i32
    %c0_i32_200 = arith.constant 0 : i32
    %281 = tpu.memref_slice %arg2[%c0_i32_199, %c0_i32_200] : memref<64x128xf32, #tpu.memory_space<any>> -> memref<1x128xf32, #tpu.memory_space<any>>
    %c14_i32_201 = arith.constant 14 : i32
    %c0_i32_202 = arith.constant 0 : i32
    %282 = tpu.memref_slice %arg4[%c14_i32_201, %c0_i32_202] : memref<32x128xf32, #tpu.memory_space<vmem>> -> memref<1x128xf32, #tpu.memory_space<vmem>>
    %283 = tpu.memref_slice %arg5[%c14_i32_198] : memref<32x!tpu.dma_semaphore, #tpu.memory_space<semaphore_mem>> -> memref<1x!tpu.dma_semaphore, #tpu.memory_space<semaphore_mem>>
    %284 = tpu.memref_squeeze %283 : memref<1x!tpu.dma_semaphore, #tpu.memory_space<semaphore_mem>> -> memref<!tpu.dma_semaphore, #tpu.memory_space<semaphore_mem>>
    tpu.wait_dma2 semaphore(%284 : memref<!tpu.dma_semaphore, #tpu.memory_space<semaphore_mem>>) src(%281 : memref<1x128xf32, #tpu.memory_space<any>>) dst(%282 : memref<1x128xf32, #tpu.memory_space<vmem>>)
    %c15_i32_203 = arith.constant 15 : i32
    %c0_i32_204 = arith.constant 0 : i32
    %c0_i32_205 = arith.constant 0 : i32
    %285 = tpu.memref_slice %arg2[%c0_i32_204, %c0_i32_205] : memref<64x128xf32, #tpu.memory_space<any>> -> memref<1x128xf32, #tpu.memory_space<any>>
    %c15_i32_206 = arith.constant 15 : i32
    %c0_i32_207 = arith.constant 0 : i32
    %286 = tpu.memref_slice %arg4[%c15_i32_206, %c0_i32_207] : memref<32x128xf32, #tpu.memory_space<vmem>> -> memref<1x128xf32, #tpu.memory_space<vmem>>
    %287 = tpu.memref_slice %arg5[%c15_i32_203] : memref<32x!tpu.dma_semaphore, #tpu.memory_space<semaphore_mem>> -> memref<1x!tpu.dma_semaphore, #tpu.memory_space<semaphore_mem>>
    %288 = tpu.memref_squeeze %287 : memref<1x!tpu.dma_semaphore, #tpu.memory_space<semaphore_mem>> -> memref<!tpu.dma_semaphore, #tpu.memory_space<semaphore_mem>>
    tpu.wait_dma2 semaphore(%288 : memref<!tpu.dma_semaphore, #tpu.memory_space<semaphore_mem>>) src(%285 : memref<1x128xf32, #tpu.memory_space<any>>) dst(%286 : memref<1x128xf32, #tpu.memory_space<vmem>>)
    %c16_i32_208 = arith.constant 16 : i32
    %c0_i32_209 = arith.constant 0 : i32
    %c0_i32_210 = arith.constant 0 : i32
    %289 = tpu.memref_slice %arg2[%c0_i32_209, %c0_i32_210] : memref<64x128xf32, #tpu.memory_space<any>> -> memref<1x128xf32, #tpu.memory_space<any>>
    %c16_i32_211 = arith.constant 16 : i32
    %c0_i32_212 = arith.constant 0 : i32
    %290 = tpu.memref_slice %arg4[%c16_i32_211, %c0_i32_212] : memref<32x128xf32, #tpu.memory_space<vmem>> -> memref<1x128xf32, #tpu.memory_space<vmem>>
    %291 = tpu.memref_slice %arg5[%c16_i32_208] : memref<32x!tpu.dma_semaphore, #tpu.memory_space<semaphore_mem>> -> memref<1x!tpu.dma_semaphore, #tpu.memory_space<semaphore_mem>>
    %292 = tpu.memref_squeeze %291 : memref<1x!tpu.dma_semaphore, #tpu.memory_space<semaphore_mem>> -> memref<!tpu.dma_semaphore, #tpu.memory_space<semaphore_mem>>
    tpu.wait_dma2 semaphore(%292 : memref<!tpu.dma_semaphore, #tpu.memory_space<semaphore_mem>>) src(%289 : memref<1x128xf32, #tpu.memory_space<any>>) dst(%290 : memref<1x128xf32, #tpu.memory_space<vmem>>)
    %c17_i32_213 = arith.constant 17 : i32
    %c0_i32_214 = arith.constant 0 : i32
    %c0_i32_215 = arith.constant 0 : i32
    %293 = tpu.memref_slice %arg2[%c0_i32_214, %c0_i32_215] : memref<64x128xf32, #tpu.memory_space<any>> -> memref<1x128xf32, #tpu.memory_space<any>>
    %c17_i32_216 = arith.constant 17 : i32
    %c0_i32_217 = arith.constant 0 : i32
    %294 = tpu.memref_slice %arg4[%c17_i32_216, %c0_i32_217] : memref<32x128xf32, #tpu.memory_space<vmem>> -> memref<1x128xf32, #tpu.memory_space<vmem>>
    %295 = tpu.memref_slice %arg5[%c17_i32_213] : memref<32x!tpu.dma_semaphore, #tpu.memory_space<semaphore_mem>> -> memref<1x!tpu.dma_semaphore, #tpu.memory_space<semaphore_mem>>
    %296 = tpu.memref_squeeze %295 : memref<1x!tpu.dma_semaphore, #tpu.memory_space<semaphore_mem>> -> memref<!tpu.dma_semaphore, #tpu.memory_space<semaphore_mem>>
    tpu.wait_dma2 semaphore(%296 : memref<!tpu.dma_semaphore, #tpu.memory_space<semaphore_mem>>) src(%293 : memref<1x128xf32, #tpu.memory_space<any>>) dst(%294 : memref<1x128xf32, #tpu.memory_space<vmem>>)
    %c18_i32_218 = arith.constant 18 : i32
    %c0_i32_219 = arith.constant 0 : i32
    %c0_i32_220 = arith.constant 0 : i32
    %297 = tpu.memref_slice %arg2[%c0_i32_219, %c0_i32_220] : memref<64x128xf32, #tpu.memory_space<any>> -> memref<1x128xf32, #tpu.memory_space<any>>
    %c18_i32_221 = arith.constant 18 : i32
    %c0_i32_222 = arith.constant 0 : i32
    %298 = tpu.memref_slice %arg4[%c18_i32_221, %c0_i32_222] : memref<32x128xf32, #tpu.memory_space<vmem>> -> memref<1x128xf32, #tpu.memory_space<vmem>>
    %299 = tpu.memref_slice %arg5[%c18_i32_218] : memref<32x!tpu.dma_semaphore, #tpu.memory_space<semaphore_mem>> -> memref<1x!tpu.dma_semaphore, #tpu.memory_space<semaphore_mem>>
    %300 = tpu.memref_squeeze %299 : memref<1x!tpu.dma_semaphore, #tpu.memory_space<semaphore_mem>> -> memref<!tpu.dma_semaphore, #tpu.memory_space<semaphore_mem>>
    tpu.wait_dma2 semaphore(%300 : memref<!tpu.dma_semaphore, #tpu.memory_space<semaphore_mem>>) src(%297 : memref<1x128xf32, #tpu.memory_space<any>>) dst(%298 : memref<1x128xf32, #tpu.memory_space<vmem>>)
    %c19_i32_223 = arith.constant 19 : i32
    %c0_i32_224 = arith.constant 0 : i32
    %c0_i32_225 = arith.constant 0 : i32
    %301 = tpu.memref_slice %arg2[%c0_i32_224, %c0_i32_225] : memref<64x128xf32, #tpu.memory_space<any>> -> memref<1x128xf32, #tpu.memory_space<any>>
    %c19_i32_226 = arith.constant 19 : i32
    %c0_i32_227 = arith.constant 0 : i32
    %302 = tpu.memref_slice %arg4[%c19_i32_226, %c0_i32_227] : memref<32x128xf32, #tpu.memory_space<vmem>> -> memref<1x128xf32, #tpu.memory_space<vmem>>
    %303 = tpu.memref_slice %arg5[%c19_i32_223] : memref<32x!tpu.dma_semaphore, #tpu.memory_space<semaphore_mem>> -> memref<1x!tpu.dma_semaphore, #tpu.memory_space<semaphore_mem>>
    %304 = tpu.memref_squeeze %303 : memref<1x!tpu.dma_semaphore, #tpu.memory_space<semaphore_mem>> -> memref<!tpu.dma_semaphore, #tpu.memory_space<semaphore_mem>>
    tpu.wait_dma2 semaphore(%304 : memref<!tpu.dma_semaphore, #tpu.memory_space<semaphore_mem>>) src(%301 : memref<1x128xf32, #tpu.memory_space<any>>) dst(%302 : memref<1x128xf32, #tpu.memory_space<vmem>>)
    %c20_i32_228 = arith.constant 20 : i32
    %c0_i32_229 = arith.constant 0 : i32
    %c0_i32_230 = arith.constant 0 : i32
    %305 = tpu.memref_slice %arg2[%c0_i32_229, %c0_i32_230] : memref<64x128xf32, #tpu.memory_space<any>> -> memref<1x128xf32, #tpu.memory_space<any>>
    %c20_i32_231 = arith.constant 20 : i32
    %c0_i32_232 = arith.constant 0 : i32
    %306 = tpu.memref_slice %arg4[%c20_i32_231, %c0_i32_232] : memref<32x128xf32, #tpu.memory_space<vmem>> -> memref<1x128xf32, #tpu.memory_space<vmem>>
    %307 = tpu.memref_slice %arg5[%c20_i32_228] : memref<32x!tpu.dma_semaphore, #tpu.memory_space<semaphore_mem>> -> memref<1x!tpu.dma_semaphore, #tpu.memory_space<semaphore_mem>>
    %308 = tpu.memref_squeeze %307 : memref<1x!tpu.dma_semaphore, #tpu.memory_space<semaphore_mem>> -> memref<!tpu.dma_semaphore, #tpu.memory_space<semaphore_mem>>
    tpu.wait_dma2 semaphore(%308 : memref<!tpu.dma_semaphore, #tpu.memory_space<semaphore_mem>>) src(%305 : memref<1x128xf32, #tpu.memory_space<any>>) dst(%306 : memref<1x128xf32, #tpu.memory_space<vmem>>)
    %c21_i32_233 = arith.constant 21 : i32
    %c0_i32_234 = arith.constant 0 : i32
    %c0_i32_235 = arith.constant 0 : i32
    %309 = tpu.memref_slice %arg2[%c0_i32_234, %c0_i32_235] : memref<64x128xf32, #tpu.memory_space<any>> -> memref<1x128xf32, #tpu.memory_space<any>>
    %c21_i32_236 = arith.constant 21 : i32
    %c0_i32_237 = arith.constant 0 : i32
    %310 = tpu.memref_slice %arg4[%c21_i32_236, %c0_i32_237] : memref<32x128xf32, #tpu.memory_space<vmem>> -> memref<1x128xf32, #tpu.memory_space<vmem>>
    %311 = tpu.memref_slice %arg5[%c21_i32_233] : memref<32x!tpu.dma_semaphore, #tpu.memory_space<semaphore_mem>> -> memref<1x!tpu.dma_semaphore, #tpu.memory_space<semaphore_mem>>
    %312 = tpu.memref_squeeze %311 : memref<1x!tpu.dma_semaphore, #tpu.memory_space<semaphore_mem>> -> memref<!tpu.dma_semaphore, #tpu.memory_space<semaphore_mem>>
    tpu.wait_dma2 semaphore(%312 : memref<!tpu.dma_semaphore, #tpu.memory_space<semaphore_mem>>) src(%309 : memref<1x128xf32, #tpu.memory_space<any>>) dst(%310 : memref<1x128xf32, #tpu.memory_space<vmem>>)
    %c22_i32_238 = arith.constant 22 : i32
    %c0_i32_239 = arith.constant 0 : i32
    %c0_i32_240 = arith.constant 0 : i32
    %313 = tpu.memref_slice %arg2[%c0_i32_239, %c0_i32_240] : memref<64x128xf32, #tpu.memory_space<any>> -> memref<1x128xf32, #tpu.memory_space<any>>
    %c22_i32_241 = arith.constant 22 : i32
    %c0_i32_242 = arith.constant 0 : i32
    %314 = tpu.memref_slice %arg4[%c22_i32_241, %c0_i32_242] : memref<32x128xf32, #tpu.memory_space<vmem>> -> memref<1x128xf32, #tpu.memory_space<vmem>>
    %315 = tpu.memref_slice %arg5[%c22_i32_238] : memref<32x!tpu.dma_semaphore, #tpu.memory_space<semaphore_mem>> -> memref<1x!tpu.dma_semaphore, #tpu.memory_space<semaphore_mem>>
    %316 = tpu.memref_squeeze %315 : memref<1x!tpu.dma_semaphore, #tpu.memory_space<semaphore_mem>> -> memref<!tpu.dma_semaphore, #tpu.memory_space<semaphore_mem>>
    tpu.wait_dma2 semaphore(%316 : memref<!tpu.dma_semaphore, #tpu.memory_space<semaphore_mem>>) src(%313 : memref<1x128xf32, #tpu.memory_space<any>>) dst(%314 : memref<1x128xf32, #tpu.memory_space<vmem>>)
    %c23_i32_243 = arith.constant 23 : i32
    %c0_i32_244 = arith.constant 0 : i32
    %c0_i32_245 = arith.constant 0 : i32
    %317 = tpu.memref_slice %arg2[%c0_i32_244, %c0_i32_245] : memref<64x128xf32, #tpu.memory_space<any>> -> memref<1x128xf32, #tpu.memory_space<any>>
    %c23_i32_246 = arith.constant 23 : i32
    %c0_i32_247 = arith.constant 0 : i32
    %318 = tpu.memref_slice %arg4[%c23_i32_246, %c0_i32_247] : memref<32x128xf32, #tpu.memory_space<vmem>> -> memref<1x128xf32, #tpu.memory_space<vmem>>
    %319 = tpu.memref_slice %arg5[%c23_i32_243] : memref<32x!tpu.dma_semaphore, #tpu.memory_space<semaphore_mem>> -> memref<1x!tpu.dma_semaphore, #tpu.memory_space<semaphore_mem>>
    %320 = tpu.memref_squeeze %319 : memref<1x!tpu.dma_semaphore, #tpu.memory_space<semaphore_mem>> -> memref<!tpu.dma_semaphore, #tpu.memory_space<semaphore_mem>>
    tpu.wait_dma2 semaphore(%320 : memref<!tpu.dma_semaphore, #tpu.memory_space<semaphore_mem>>) src(%317 : memref<1x128xf32, #tpu.memory_space<any>>) dst(%318 : memref<1x128xf32, #tpu.memory_space<vmem>>)
    %c24_i32_248 = arith.constant 24 : i32
    %c0_i32_249 = arith.constant 0 : i32
    %c0_i32_250 = arith.constant 0 : i32
    %321 = tpu.memref_slice %arg2[%c0_i32_249, %c0_i32_250] : memref<64x128xf32, #tpu.memory_space<any>> -> memref<1x128xf32, #tpu.memory_space<any>>
    %c24_i32_251 = arith.constant 24 : i32
    %c0_i32_252 = arith.constant 0 : i32
    %322 = tpu.memref_slice %arg4[%c24_i32_251, %c0_i32_252] : memref<32x128xf32, #tpu.memory_space<vmem>> -> memref<1x128xf32, #tpu.memory_space<vmem>>
    %323 = tpu.memref_slice %arg5[%c24_i32_248] : memref<32x!tpu.dma_semaphore, #tpu.memory_space<semaphore_mem>> -> memref<1x!tpu.dma_semaphore, #tpu.memory_space<semaphore_mem>>
    %324 = tpu.memref_squeeze %323 : memref<1x!tpu.dma_semaphore, #tpu.memory_space<semaphore_mem>> -> memref<!tpu.dma_semaphore, #tpu.memory_space<semaphore_mem>>
    tpu.wait_dma2 semaphore(%324 : memref<!tpu.dma_semaphore, #tpu.memory_space<semaphore_mem>>) src(%321 : memref<1x128xf32, #tpu.memory_space<any>>) dst(%322 : memref<1x128xf32, #tpu.memory_space<vmem>>)
    %c25_i32_253 = arith.constant 25 : i32
    %c0_i32_254 = arith.constant 0 : i32
    %c0_i32_255 = arith.constant 0 : i32
    %325 = tpu.memref_slice %arg2[%c0_i32_254, %c0_i32_255] : memref<64x128xf32, #tpu.memory_space<any>> -> memref<1x128xf32, #tpu.memory_space<any>>
    %c25_i32_256 = arith.constant 25 : i32
    %c0_i32_257 = arith.constant 0 : i32
    %326 = tpu.memref_slice %arg4[%c25_i32_256, %c0_i32_257] : memref<32x128xf32, #tpu.memory_space<vmem>> -> memref<1x128xf32, #tpu.memory_space<vmem>>
    %327 = tpu.memref_slice %arg5[%c25_i32_253] : memref<32x!tpu.dma_semaphore, #tpu.memory_space<semaphore_mem>> -> memref<1x!tpu.dma_semaphore, #tpu.memory_space<semaphore_mem>>
    %328 = tpu.memref_squeeze %327 : memref<1x!tpu.dma_semaphore, #tpu.memory_space<semaphore_mem>> -> memref<!tpu.dma_semaphore, #tpu.memory_space<semaphore_mem>>
    tpu.wait_dma2 semaphore(%328 : memref<!tpu.dma_semaphore, #tpu.memory_space<semaphore_mem>>) src(%325 : memref<1x128xf32, #tpu.memory_space<any>>) dst(%326 : memref<1x128xf32, #tpu.memory_space<vmem>>)
    %c26_i32_258 = arith.constant 26 : i32
    %c0_i32_259 = arith.constant 0 : i32
    %c0_i32_260 = arith.constant 0 : i32
    %329 = tpu.memref_slice %arg2[%c0_i32_259, %c0_i32_260] : memref<64x128xf32, #tpu.memory_space<any>> -> memref<1x128xf32, #tpu.memory_space<any>>
    %c26_i32_261 = arith.constant 26 : i32
    %c0_i32_262 = arith.constant 0 : i32
    %330 = tpu.memref_slice %arg4[%c26_i32_261, %c0_i32_262] : memref<32x128xf32, #tpu.memory_space<vmem>> -> memref<1x128xf32, #tpu.memory_space<vmem>>
    %331 = tpu.memref_slice %arg5[%c26_i32_258] : memref<32x!tpu.dma_semaphore, #tpu.memory_space<semaphore_mem>> -> memref<1x!tpu.dma_semaphore, #tpu.memory_space<semaphore_mem>>
    %332 = tpu.memref_squeeze %331 : memref<1x!tpu.dma_semaphore, #tpu.memory_space<semaphore_mem>> -> memref<!tpu.dma_semaphore, #tpu.memory_space<semaphore_mem>>
    tpu.wait_dma2 semaphore(%332 : memref<!tpu.dma_semaphore, #tpu.memory_space<semaphore_mem>>) src(%329 : memref<1x128xf32, #tpu.memory_space<any>>) dst(%330 : memref<1x128xf32, #tpu.memory_space<vmem>>)
    %c27_i32_263 = arith.constant 27 : i32
    %c0_i32_264 = arith.constant 0 : i32
    %c0_i32_265 = arith.constant 0 : i32
    %333 = tpu.memref_slice %arg2[%c0_i32_264, %c0_i32_265] : memref<64x128xf32, #tpu.memory_space<any>> -> memref<1x128xf32, #tpu.memory_space<any>>
    %c27_i32_266 = arith.constant 27 : i32
    %c0_i32_267 = arith.constant 0 : i32
    %334 = tpu.memref_slice %arg4[%c27_i32_266, %c0_i32_267] : memref<32x128xf32, #tpu.memory_space<vmem>> -> memref<1x128xf32, #tpu.memory_space<vmem>>
    %335 = tpu.memref_slice %arg5[%c27_i32_263] : memref<32x!tpu.dma_semaphore, #tpu.memory_space<semaphore_mem>> -> memref<1x!tpu.dma_semaphore, #tpu.memory_space<semaphore_mem>>
    %336 = tpu.memref_squeeze %335 : memref<1x!tpu.dma_semaphore, #tpu.memory_space<semaphore_mem>> -> memref<!tpu.dma_semaphore, #tpu.memory_space<semaphore_mem>>
    tpu.wait_dma2 semaphore(%336 : memref<!tpu.dma_semaphore, #tpu.memory_space<semaphore_mem>>) src(%333 : memref<1x128xf32, #tpu.memory_space<any>>) dst(%334 : memref<1x128xf32, #tpu.memory_space<vmem>>)
    %c28_i32_268 = arith.constant 28 : i32
    %c0_i32_269 = arith.constant 0 : i32
    %c0_i32_270 = arith.constant 0 : i32
    %337 = tpu.memref_slice %arg2[%c0_i32_269, %c0_i32_270] : memref<64x128xf32, #tpu.memory_space<any>> -> memref<1x128xf32, #tpu.memory_space<any>>
    %c28_i32_271 = arith.constant 28 : i32
    %c0_i32_272 = arith.constant 0 : i32
    %338 = tpu.memref_slice %arg4[%c28_i32_271, %c0_i32_272] : memref<32x128xf32, #tpu.memory_space<vmem>> -> memref<1x128xf32, #tpu.memory_space<vmem>>
    %339 = tpu.memref_slice %arg5[%c28_i32_268] : memref<32x!tpu.dma_semaphore, #tpu.memory_space<semaphore_mem>> -> memref<1x!tpu.dma_semaphore, #tpu.memory_space<semaphore_mem>>
    %340 = tpu.memref_squeeze %339 : memref<1x!tpu.dma_semaphore, #tpu.memory_space<semaphore_mem>> -> memref<!tpu.dma_semaphore, #tpu.memory_space<semaphore_mem>>
    tpu.wait_dma2 semaphore(%340 : memref<!tpu.dma_semaphore, #tpu.memory_space<semaphore_mem>>) src(%337 : memref<1x128xf32, #tpu.memory_space<any>>) dst(%338 : memref<1x128xf32, #tpu.memory_space<vmem>>)
    %c29_i32_273 = arith.constant 29 : i32
    %c0_i32_274 = arith.constant 0 : i32
    %c0_i32_275 = arith.constant 0 : i32
    %341 = tpu.memref_slice %arg2[%c0_i32_274, %c0_i32_275] : memref<64x128xf32, #tpu.memory_space<any>> -> memref<1x128xf32, #tpu.memory_space<any>>
    %c29_i32_276 = arith.constant 29 : i32
    %c0_i32_277 = arith.constant 0 : i32
    %342 = tpu.memref_slice %arg4[%c29_i32_276, %c0_i32_277] : memref<32x128xf32, #tpu.memory_space<vmem>> -> memref<1x128xf32, #tpu.memory_space<vmem>>
    %343 = tpu.memref_slice %arg5[%c29_i32_273] : memref<32x!tpu.dma_semaphore, #tpu.memory_space<semaphore_mem>> -> memref<1x!tpu.dma_semaphore, #tpu.memory_space<semaphore_mem>>
    %344 = tpu.memref_squeeze %343 : memref<1x!tpu.dma_semaphore, #tpu.memory_space<semaphore_mem>> -> memref<!tpu.dma_semaphore, #tpu.memory_space<semaphore_mem>>
    tpu.wait_dma2 semaphore(%344 : memref<!tpu.dma_semaphore, #tpu.memory_space<semaphore_mem>>) src(%341 : memref<1x128xf32, #tpu.memory_space<any>>) dst(%342 : memref<1x128xf32, #tpu.memory_space<vmem>>)
    %c30_i32_278 = arith.constant 30 : i32
    %c0_i32_279 = arith.constant 0 : i32
    %c0_i32_280 = arith.constant 0 : i32
    %345 = tpu.memref_slice %arg2[%c0_i32_279, %c0_i32_280] : memref<64x128xf32, #tpu.memory_space<any>> -> memref<1x128xf32, #tpu.memory_space<any>>
    %c30_i32_281 = arith.constant 30 : i32
    %c0_i32_282 = arith.constant 0 : i32
    %346 = tpu.memref_slice %arg4[%c30_i32_281, %c0_i32_282] : memref<32x128xf32, #tpu.memory_space<vmem>> -> memref<1x128xf32, #tpu.memory_space<vmem>>
    %347 = tpu.memref_slice %arg5[%c30_i32_278] : memref<32x!tpu.dma_semaphore, #tpu.memory_space<semaphore_mem>> -> memref<1x!tpu.dma_semaphore, #tpu.memory_space<semaphore_mem>>
    %348 = tpu.memref_squeeze %347 : memref<1x!tpu.dma_semaphore, #tpu.memory_space<semaphore_mem>> -> memref<!tpu.dma_semaphore, #tpu.memory_space<semaphore_mem>>
    tpu.wait_dma2 semaphore(%348 : memref<!tpu.dma_semaphore, #tpu.memory_space<semaphore_mem>>) src(%345 : memref<1x128xf32, #tpu.memory_space<any>>) dst(%346 : memref<1x128xf32, #tpu.memory_space<vmem>>)
    %c31_i32_283 = arith.constant 31 : i32
    %c0_i32_284 = arith.constant 0 : i32
    %c0_i32_285 = arith.constant 0 : i32
    %349 = tpu.memref_slice %arg2[%c0_i32_284, %c0_i32_285] : memref<64x128xf32, #tpu.memory_space<any>> -> memref<1x128xf32, #tpu.memory_space<any>>
    %c31_i32_286 = arith.constant 31 : i32
    %c0_i32_287 = arith.constant 0 : i32
    %350 = tpu.memref_slice %arg4[%c31_i32_286, %c0_i32_287] : memref<32x128xf32, #tpu.memory_space<vmem>> -> memref<1x128xf32, #tpu.memory_space<vmem>>
    %351 = tpu.memref_slice %arg5[%c31_i32_283] : memref<32x!tpu.dma_semaphore, #tpu.memory_space<semaphore_mem>> -> memref<1x!tpu.dma_semaphore, #tpu.memory_space<semaphore_mem>>
    %352 = tpu.memref_squeeze %351 : memref<1x!tpu.dma_semaphore, #tpu.memory_space<semaphore_mem>> -> memref<!tpu.dma_semaphore, #tpu.memory_space<semaphore_mem>>
    tpu.wait_dma2 semaphore(%352 : memref<!tpu.dma_semaphore, #tpu.memory_space<semaphore_mem>>) src(%349 : memref<1x128xf32, #tpu.memory_space<any>>) dst(%350 : memref<1x128xf32, #tpu.memory_space<vmem>>)
    %c0 = arith.constant 0 : index
    %c0_288 = arith.constant 0 : index
    %353 = vector.load %arg4[%c0, %c0_288] : memref<32x128xf32, #tpu.memory_space<vmem>>, vector<32x128xf32>
    %cst = arith.constant 11.3137083 : f32
    %354 = vector.broadcast %cst : f32 to vector<32x128xf32>
    %355 = arith.mulf %353, %354 : vector<32x128xf32>
    %c0_289 = arith.constant 0 : index
    %c0_290 = arith.constant 0 : index
    %356 = vector.load %arg3[%c0_289, %c0_290] : memref<32x128xf32, #tpu.memory_space<vmem>>, vector<32x128xf32>
    tpu.vector_store %arg3[%c0_289, %c0_290], %355 {strides = array<i32>} : memref<32x128xf32, #tpu.memory_space<vmem>>, vector<32x128xf32>,
    return
  }
  func.func @transform_1(%arg0: i32, %arg1: memref<64xi32, #tpu.memory_space<smem>>) -> (i32, i32) {
    %c0_i32 = arith.constant 0 : i32
    %c0_i32_0 = arith.constant 0 : i32
    return %arg0, %c0_i32 : i32, i32
  }
}

</mosaic_0001>

<bundles_post_ra>
// kernel: tpu_custom_call.1
= control target key start
LH: loop header
LB: loop body
LE: loop exit
PB: predicated region body
PF: predicated region fallthrough
CT: control target
= control target key end

     0   :  { %s2780_s0 = inlined_call_operand.hbm [shape: s32[64], index: 0, kind: input, shape index: {}]   ;;  %s2781_s1 = inlined_call_operand.hbm [shape: f32[64,128], index: 1, kind: input, shape index: {}]   ;;  %s2782_s2 = inlined_call_operand.hbm [shape: f32[64,128], index: 2, kind: output, shape index: {}]  }
   0x1   :  { %s1160_s11 = scalar_lea.hbm %s2780_s0, 16 }
   0x2   :  { %p1161_p0 = scmp.ne.s32.totalorder %s2780_s0, %s1160_s11  ;;  %p1164_p1 = scmp.lt.u32.totalorder %s1160_s11, %s2780_s0 }
   0x4   :  { %p1166_p2 = pnand %p1164_p1, %p1161_p0 }
   0x6   :  { %1169 = shalt.err (!%p1166_p2)  }
   0x7   :  { %s2060_s16 = smov [#allocation5]  }
   0x8   :  { %8 = dma.hbm_to_smem %s2780_s0, 16, %s2060_s16, [#allocation4] }
   0x9   :  { %1978 = dma.done.wait [#allocation4], 16 }
   0xa   :  { %1979 = vsyncadd [#allocation4], 4294967280 }
   0xb   :  { %10 = sfence }
   0xc   :  { %11 = vsyncpa [#allocation7], 0 }
   0xd   :  { %13 = vsyncpa [#allocation7 + $0x1], 0  ;;  %s2123_s19 = smov 0   ;;  %s2125_s20 = smov 0  }
   0xe   :  { %s2127_s21 = smov 0  }
   0xf LB: > { %s1019_s0 = sadd.s32 4294967295, %s2058_s21   ;;  %s2140_s22 = sadd.s32 1, %s2058_s21   ;;  %s2058_s21 = sphi %s2127_s21, %s2789_s21   ;;  %s2054_s20 = sphi %s2125_s20, %s2788_s20   ;;  %s2050_s19 = sphi %s2123_s19, %s2787_s19  }
  0x10   : > { %s22_s23 = ssub.s32 %s2058_s21, %s2140_s22  ;;  %s25_s24 = sadd.s32 1, %s2054_s20 }
  0x11   : > { %p23_p3 = scmp.eq.s32.totalorder %s22_s23, 0  ;;  %p1020_p4 = scmp.ne.s32.totalorder %s22_s23, 0 }
  0x12   : > { %p29_p5 = scmp.eq.s32.totalorder %s2058_s21, 1  ;;  %p34_p6 = scmp.ne.s32.totalorder %s2054_s20, %s2050_s19 }
  0x13   : > { %s2149_s25 = scalar_select %p23_p3, %s2054_s20, %s25_s24  }
  0x14   : > { %p2151_p7 = por %p1020_p4, %p29_p5  ;;  %p35_p8 = scmp.eq.s32.totalorder %s1019_s0, 1 }
  0x15   : > { %p1021_p10 = scmp.ge.s32.totalorder %s2058_s21, 2 }
  0x16   : > { %p2155_p9 = por %p35_p8, %p34_p6  ;;  %s2783_s28 = sand.u32 (!%p1021_p10), 1, %s2054_s20  }
  0x17   : > { %44 = sbr.rel (%p1021_p10) target bundleno = 835 (0x343), region = 12  ;;  %s2162_s29 = sshll.u32 (!%p1021_p10), %s2058_s21, 5 }
  0x18   : > { %s2166_s30 = sshll.u32 (!%p1021_p10), %s2783_s28, 5  ;;  %s54_s3 = sld [smem:[#allocation5 + %s2162_s29]] (!%p1021_p10) }
  0x19   : > { %s2061_s4 = smov (!%p1021_p10), [#allocation2]   ;;  %s68_s6 = sadd.s32 (!%p1021_p10), 1, %s2162_s29 }
  0x1a   : > { %s64_s5 = sshll.u32 (!%p1021_p10), %s2061_s4, 4  ;;  %s2172_s7 = sld [smem:[#allocation5 + %s68_s6]] (!%p1021_p10)  ;;  %s2170_s5 = int_to_ptr.vmem [resolvable:$true] %s64_s5 }
  0x1b   : > { %s85_s8 = sadd.s32 (!%p1021_p10), 2, %s2162_s29  ;;  %s2062_s9 = smov (!%p1021_p10), [#allocation2 + $0x1]  }
  0x1c   : > { %s81_s10 = sshll.u32 (!%p1021_p10), %s2062_s9, 4  ;;  %s2175_s11 = sld [smem:[#allocation5 + %s85_s8]] (!%p1021_p10)  ;;  %s2177_s10 = int_to_ptr.vmem [resolvable:$true] %s81_s10 }
  0x1d   : > { %s2185_s0 = scalar_lea.hbm (!%p1021_p10), %s2781_s1, 1024 }
  0x1e   : > { %s1024_s12 = sshll.u32 %s54_s3, 4 }
  0x1f   : > { %s56_s15 = scalar_lea.hbm %s2781_s1, %s1024_s12 }
  0x20   : > { %s1170_s16 = scalar_lea.hbm %s56_s15, 16  ;;  %p1173_p12 = scmp.lt.u32.totalorder %s56_s15, %s2781_s1 }
  0x21   : > { %p1171_p11 = scmp.ne.s32.totalorder %s56_s15, %s1170_s16  ;;  %p1174_p13 = scmp.lt.u32.totalorder %s2185_s0, %s1170_s16 }
  0x22   : > { %p1176_p1 = scmp.lt.u32.totalorder %s1170_s16, %s56_s15 }
  0x23   : > { %p1175_p0 = por %p1174_p13, %p1173_p12 }
  0x25   : > { %p1177_p2 = por %p1176_p1, %p1175_p0 }
  0x27   : > { %p1178_p3 = pnand %p1177_p2, %p1171_p11 }
  0x29   : > { %1181 = shalt.err (!%p1178_p3)  }
  0x2a   : > { %s1182_s3 = scalar_lea.vmem %s2170_s5, 16  ;;  %s2194_s4 = scalar_lea.vmem %s2170_s5, 512 }
  0x2b   : > { %p1183_p4 = scmp.ne.s32.totalorder %s2170_s5, %s1182_s3  ;;  %p1187_p5 = scmp.lt.s32.totalorder %s2170_s5, %s2170_s5 }
  0x2c   : > { %p1188_p6 = scmp.lt.s32.totalorder %s2194_s4, %s1182_s3 }
  0x2e   : > { %p1189_p8 = por %p1188_p6, %p1187_p5 }
  0x30   : > { %p1190_p10 = pnand %p1189_p8, %p1183_p4 }
  0x32   : > { %1193 = shalt.err (!%p1190_p10)  }
  0x33   : > { %67 = dma.hbm_to_vmem [thread:$0]  %s56_s15, 16, %s2170_s5, [#allocation3] }
  0x34   : > { %s1025_s6 = sshll.u32 %s2172_s7, 4  ;;  %s2063_s8 = smov [#allocation2 + $0x2]  }
  0x35   : > { %s98_s9 = sshll.u32 %s2063_s8, 4  ;;  %s71_s14 = scalar_lea.hbm %s2781_s1, %s1025_s6  ;;  %s2204_s9 = int_to_ptr.vmem [resolvable:$true] %s98_s9 }
  0x36   : > { %s1194_s16 = scalar_lea.hbm %s71_s14, 16  ;;  %p1197_p12 = scmp.lt.u32.totalorder %s71_s14, %s2781_s1 }
  0x37   : > { %p1195_p11 = scmp.ne.s32.totalorder %s71_s14, %s1194_s16  ;;  %p1198_p13 = scmp.lt.u32.totalorder %s2185_s0, %s1194_s16 }
  0x38   : > { %p1200_p1 = scmp.lt.u32.totalorder %s1194_s16, %s71_s14 }
  0x39   : > { %p1199_p0 = por %p1198_p13, %p1197_p12 }
  0x3b   : > { %p1201_p2 = por %p1200_p1, %p1199_p0 }
  0x3d   : > { %p1202_p3 = pnand %p1201_p2, %p1195_p11 }
  0x3f   : > { %1205 = shalt.err (!%p1202_p3)  }
  0x40   : > { %s1206_s7 = scalar_lea.vmem %s2177_s10, 16  ;;  %p1211_p5 = scmp.lt.s32.totalorder %s2177_s10, %s2170_s5 }
  0x41   : > { %p1207_p4 = scmp.ne.s32.totalorder %s2177_s10, %s1206_s7  ;;  %p1212_p6 = scmp.lt.s32.totalorder %s2194_s4, %s1206_s7 }
  0x43   : > { %p1213_p8 = por %p1212_p6, %p1211_p5 }
  0x45   : > { %p1214_p10 = pnand %p1213_p8, %p1207_p4 }
  0x47   : > { %1217 = shalt.err (!%p1214_p10)  }
  0x48   : > { %84 = dma.hbm_to_vmem [thread:$0]  %s71_s14, 16, %s2177_s10, [#allocation3 + $0x1] }
  0x49   : > { %s1026_s15 = sshll.u32 %s2175_s11, 4  ;;  %s102_s23 = sadd.s32 3, %s2162_s29 }
  0x4a   : > { %s88_s6 = scalar_lea.hbm %s2781_s1, %s1026_s15  ;;  %s2221_s8 = sld [smem:[#allocation5 + %s102_s23]] }
  0x4b   : > { %s1218_s12 = scalar_lea.hbm %s88_s6, 16  ;;  %p1221_p12 = scmp.lt.u32.totalorder %s88_s6, %s2781_s1 }
  0x4c   : > { %p1219_p11 = scmp.ne.s32.totalorder %s88_s6, %s1218_s12  ;;  %p1222_p13 = scmp.lt.u32.totalorder %s2185_s0, %s1218_s12 }
  0x4d   : > { %p1224_p1 = scmp.lt.u32.totalorder %s1218_s12, %s88_s6 }
  0x4e   : > { %p1223_p0 = por %p1222_p13, %p1221_p12 }
  0x50   : > { %p1225_p2 = por %p1224_p1, %p1223_p0 }
  0x52   : > { %p1226_p3 = pnand %p1225_p2, %p1219_p11 }
  0x54   : > { %1229 = shalt.err (!%p1226_p3)  }
  0x55   : > { %s1230_s10 = scalar_lea.vmem %s2204_s9, 16  ;;  %p1235_p5 = scmp.lt.s32.totalorder %s2204_s9, %s2170_s5 }
  0x56   : > { %p1231_p4 = scmp.ne.s32.totalorder %s2204_s9, %s1230_s10  ;;  %p1236_p6 = scmp.lt.s32.totalorder %s2194_s4, %s1230_s10 }
  0x58   : > { %p1237_p8 = por %p1236_p6, %p1235_p5 }
  0x5a   : > { %p1238_p10 = pnand %p1237_p8, %p1231_p4 }
  0x5c   : > { %1241 = shalt.err (!%p1238_p10)  }
  0x5d   : > { %101 = dma.hbm_to_vmem [thread:$0]  %s88_s6, 16, %s2204_s9, [#allocation3 + $0x2] }
  0x5e   : > { %s119_s11 = sadd.s32 4, %s2162_s29  ;;  %s2064_s14 = smov [#allocation2 + $0x3]  }
  0x5f   : > { %s115_s17 = sshll.u32 %s2064_s14, 4  ;;  %s120_s18 = sld [smem:[#allocation5 + %s119_s11]]  ;;  %s116_s17 = int_to_ptr.vmem [resolvable:$true] %s115_s17 }
  0x60   : > { %s2065_s7 = smov [#allocation2 + $0x4]   ;;  %s136_s23 = sadd.s32 5, %s2162_s29 }
  0x61   : > { %s132_s15 = sshll.u32 %s2065_s7, 4  ;;  %s1027_s24 = sshll.u32 %s2221_s8, 4  ;;  %s2236_s15 = int_to_ptr.vmem [resolvable:$true] %s132_s15 }
  0x62   : > { %s105_s13 = scalar_lea.hbm %s2781_s1, %s1027_s24  ;;  %s2241_s16 = sld [smem:[#allocation5 + %s136_s23]] }
  0x63   : > { %s1242_s10 = scalar_lea.hbm %s105_s13, 16  ;;  %p1245_p12 = scmp.lt.u32.totalorder %s105_s13, %s2781_s1 }
  0x64   : > { %p1243_p11 = scmp.ne.s32.totalorder %s105_s13, %s1242_s10  ;;  %p1246_p13 = scmp.lt.u32.totalorder %s2185_s0, %s1242_s10 }
  0x65   : > { %p1248_p1 = scmp.lt.u32.totalorder %s1242_s10, %s105_s13 }
  0x66   : > { %p1247_p0 = por %p1246_p13, %p1245_p12 }
  0x68   : > { %p1249_p2 = por %p1248_p1, %p1247_p0 }
  0x6a   : > { %p1250_p3 = pnand %p1249_p2, %p1243_p11 }
  0x6c   : > { %1253 = shalt.err (!%p1250_p3)  }
  0x6d   : > { %s1254_s8 = scalar_lea.vmem %s116_s17, 16  ;;  %p1259_p5 = scmp.lt.s32.totalorder %s116_s17, %s2170_s5 }
  0x6e   : > { %p1255_p4 = scmp.ne.s32.totalorder %s116_s17, %s1254_s8  ;;  %p1260_p6 = scmp.lt.s32.totalorder %s2194_s4, %s1254_s8 }
  0x70   : > { %p1261_p8 = por %p1260_p6, %p1259_p5 }
  0x72   : > { %p1262_p10 = pnand %p1261_p8, %p1255_p4 }
  0x74   : > { %1265 = shalt.err (!%p1262_p10)  }
  0x75   : > { %118 = dma.hbm_to_vmem [thread:$0]  %s105_s13, 16, %s116_s17, [#allocation3 + $0x3] }
  0x76   : > { %s1028_s11 = sshll.u32 %s120_s18, 4  ;;  %s2066_s24 = smov [#allocation2 + $0x5]  }
  0x77   : > { %s122_s23 = scalar_lea.hbm %s2781_s1, %s1028_s11  ;;  %s149_s3 = sshll.u32 %s2066_s24, 4  ;;  %s150_s3 = int_to_ptr.vmem [resolvable:$true] %s149_s3 }
  0x78   : > { %s1266_s12 = scalar_lea.hbm %s122_s23, 16  ;;  %p1269_p12 = scmp.lt.u32.totalorder %s122_s23, %s2781_s1 }
  0x79   : > { %p1267_p11 = scmp.ne.s32.totalorder %s122_s23, %s1266_s12  ;;  %p1270_p13 = scmp.lt.u32.totalorder %s2185_s0, %s1266_s12 }
  0x7a   : > { %p1272_p1 = scmp.lt.u32.totalorder %s1266_s12, %s122_s23 }
  0x7b   : > { %p1271_p0 = por %p1270_p13, %p1269_p12 }
  0x7d   : > { %p1273_p2 = por %p1272_p1, %p1271_p0 }
  0x7f   : > { %p1274_p3 = pnand %p1273_p2, %p1267_p11 }
  0x81   : > { %1277 = shalt.err (!%p1274_p3)  }
  0x82   : > { %s1278_s17 = scalar_lea.vmem %s2236_s15, 16  ;;  %p1283_p5 = scmp.lt.s32.totalorder %s2236_s15, %s2170_s5 }
  0x83   : > { %p1279_p4 = scmp.ne.s32.totalorder %s2236_s15, %s1278_s17  ;;  %p1284_p6 = scmp.lt.s32.totalorder %s2194_s4, %s1278_s17 }
  0x85   : > { %p1285_p8 = por %p1284_p6, %p1283_p5 }
  0x87   : > { %p1286_p10 = pnand %p1285_p8, %p1279_p4 }
  0x89   : > { %1289 = shalt.err (!%p1286_p10)  }
  0x8a   : > { %135 = dma.hbm_to_vmem [thread:$0]  %s122_s23, 16, %s2236_s15, [#allocation3 + $0x4] }
  0x8b   : > { %s153_s18 = sadd.s32 6, %s2162_s29  ;;  %s1029_s13 = sshll.u32 %s2241_s16, 4 }
  0x8c   : > { %s2264_s6 = sld [smem:[#allocation5 + %s153_s18]]  ;;  %s139_s14 = scalar_lea.hbm %s2781_s1, %s1029_s13 }
  0x8d   : > { %s1290_s7 = scalar_lea.hbm %s139_s14, 16  ;;  %p1293_p12 = scmp.lt.u32.totalorder %s139_s14, %s2781_s1 }
  0x8e   : > { %p1291_p11 = scmp.ne.s32.totalorder %s139_s14, %s1290_s7  ;;  %p1294_p13 = scmp.lt.u32.totalorder %s2185_s0, %s1290_s7 }
  0x8f   : > { %p1296_p1 = scmp.lt.u32.totalorder %s1290_s7, %s139_s14 }
  0x90   : > { %p1295_p0 = por %p1294_p13, %p1293_p12 }
  0x92   : > { %p1297_p2 = por %p1296_p1, %p1295_p0 }
  0x94   : > { %p1298_p3 = pnand %p1297_p2, %p1291_p11 }
  0x96   : > { %1301 = shalt.err (!%p1298_p3)  }
  0x97   : > { %s1302_s15 = scalar_lea.vmem %s150_s3, 16  ;;  %p1307_p5 = scmp.lt.s32.totalorder %s150_s3, %s2170_s5 }
  0x98   : > { %p1303_p4 = scmp.ne.s32.totalorder %s150_s3, %s1302_s15  ;;  %p1308_p6 = scmp.lt.s32.totalorder %s2194_s4, %s1302_s15 }
  0x9a   : > { %p1309_p8 = por %p1308_p6, %p1307_p5 }
  0x9c   : > { %p1310_p10 = pnand %p1309_p8, %p1303_p4 }
  0x9e   : > { %1313 = shalt.err (!%p1310_p10)  }
  0x9f   : > { %152 = dma.hbm_to_vmem [thread:$0]  %s139_s14, 16, %s150_s3, [#allocation3 + $0x5] }
  0xa0   : > { %s2067_s16 = smov [#allocation2 + $0x6]   ;;  %s170_s10 = sadd.s32 7, %s2162_s29 }
  0xa1   : > { %s166_s23 = sshll.u32 %s2067_s16, 4  ;;  %s2276_s9 = sld [smem:[#allocation5 + %s170_s10]]  ;;  %s167_s23 = int_to_ptr.vmem [resolvable:$true] %s166_s23 }
  0xa2   : > { %s187_s17 = sadd.s32 8, %s2162_s29  ;;  %s1030_s18 = sshll.u32 %s2264_s6, 4 }
  0xa3   : > { %s2068_s13 = smov [#allocation2 + $0x7]   ;;  %s156_s24 = scalar_lea.hbm %s2781_s1, %s1030_s18 }
  0xa4   : > { %s183_s8 = sshll.u32 %s2068_s13, 4  ;;  %s1314_s3 = scalar_lea.hbm %s156_s24, 16  ;;  %s2283_s8 = int_to_ptr.vmem [resolvable:$true] %s183_s8 }
  0xa5   : > { %p1315_p11 = scmp.ne.s32.totalorder %s156_s24, %s1314_s3  ;;  %p1317_p12 = scmp.lt.u32.totalorder %s156_s24, %s2781_s1 }
  0xa6   : > { %p1318_p13 = scmp.lt.u32.totalorder %s2185_s0, %s1314_s3  ;;  %p1320_p1 = scmp.lt.u32.totalorder %s1314_s3, %s156_s24 }
  0xa8   : > { %p1319_p0 = por %p1318_p13, %p1317_p12 }
  0xaa   : > { %p1321_p2 = por %p1320_p1, %p1319_p0 }
  0xac   : > { %p1322_p3 = pnand %p1321_p2, %p1315_p11 }
  0xae   : > { %1325 = shalt.err (!%p1322_p3)  }
  0xaf   : > { %s1326_s6 = scalar_lea.vmem %s167_s23, 16  ;;  %p1331_p5 = scmp.lt.s32.totalorder %s167_s23, %s2170_s5 }
  0xb0   : > { %p1327_p4 = scmp.ne.s32.totalorder %s167_s23, %s1326_s6  ;;  %p1332_p6 = scmp.lt.s32.totalorder %s2194_s4, %s1326_s6 }
  0xb2   : > { %p1333_p8 = por %p1332_p6, %p1331_p5 }
  0xb4   : > { %p1334_p10 = pnand %p1333_p8, %p1327_p4 }
  0xb6   : > { %1337 = shalt.err (!%p1334_p10)  }
  0xb7   : > { %169 = dma.hbm_to_vmem [thread:$0]  %s156_s24, 16, %s167_s23, [#allocation3 + $0x6] }
  0xb8   : > { %s2291_s15 = sld [smem:[#allocation5 + %s187_s17]]  ;;  %s1031_s16 = sshll.u32 %s2276_s9, 4 }
  0xb9   : > { %s2069_s10 = smov [#allocation2 + $0x8]   ;;  %s173_s7 = scalar_lea.hbm %s2781_s1, %s1031_s16 }
  0xba   : > { %s200_s18 = sshll.u32 %s2069_s10, 4  ;;  %s1338_s3 = scalar_lea.hbm %s173_s7, 16  ;;  %s2297_s18 = int_to_ptr.vmem [resolvable:$true] %s200_s18 }
  0xbb   : > { %p1339_p11 = scmp.ne.s32.totalorder %s173_s7, %s1338_s3  ;;  %p1341_p12 = scmp.lt.u32.totalorder %s173_s7, %s2781_s1 }
  0xbc   : > { %p1342_p13 = scmp.lt.u32.totalorder %s2185_s0, %s1338_s3  ;;  %p1344_p1 = scmp.lt.u32.totalorder %s1338_s3, %s173_s7 }
  0xbe   : > { %p1343_p0 = por %p1342_p13, %p1341_p12 }
  0xc0   : > { %p1345_p2 = por %p1344_p1, %p1343_p0 }
  0xc2   : > { %p1346_p3 = pnand %p1345_p2, %p1339_p11 }
  0xc4   : > { %1349 = shalt.err (!%p1346_p3)  }
  0xc5   : > { %s1350_s23 = scalar_lea.vmem %s2283_s8, 16  ;;  %p1355_p5 = scmp.lt.s32.totalorder %s2283_s8, %s2170_s5 }
  0xc6   : > { %p1351_p4 = scmp.ne.s32.totalorder %s2283_s8, %s1350_s23  ;;  %p1356_p6 = scmp.lt.s32.totalorder %s2194_s4, %s1350_s23 }
  0xc8   : > { %p1357_p8 = por %p1356_p6, %p1355_p5 }
  0xca   : > { %p1358_p10 = pnand %p1357_p8, %p1351_p4 }
  0xcc   : > { %1361 = shalt.err (!%p1358_p10)  }
  0xcd   : > { %186 = dma.hbm_to_vmem [thread:$0]  %s173_s7, 16, %s2283_s8, [#allocation3 + $0x7] }
  0xce   : > { %s204_s9 = sadd.s32 9, %s2162_s29  ;;  %s2070_s24 = smov [#allocation2 + $0x9]  }
  0xcf   : > { %s2310_s17 = sld [smem:[#allocation5 + %s204_s9]]  ;;  %s217_s6 = sshll.u32 %s2070_s24, 4  ;;  %s2313_s6 = int_to_ptr.vmem [resolvable:$true] %s217_s6 }
  0xd0   : > { %s1032_s16 = sshll.u32 %s2291_s15, 4  ;;  %s221_s3 = sadd.s32 10, %s2162_s29 }
  0xd1   : > { %s190_s11 = scalar_lea.hbm %s2781_s1, %s1032_s16 }
  0xd2   : > { %s1362_s14 = scalar_lea.hbm %s190_s11, 16  ;;  %p1365_p12 = scmp.lt.u32.totalorder %s190_s11, %s2781_s1 }
  0xd3   : > { %p1363_p11 = scmp.ne.s32.totalorder %s190_s11, %s1362_s14  ;;  %p1366_p13 = scmp.lt.u32.totalorder %s2185_s0, %s1362_s14 }
  0xd4   : > { %p1368_p1 = scmp.lt.u32.totalorder %s1362_s14, %s190_s11 }
  0xd5   : > { %p1367_p0 = por %p1366_p13, %p1365_p12 }
  0xd7   : > { %p1369_p2 = por %p1368_p1, %p1367_p0 }
  0xd9   : > { %p1370_p3 = pnand %p1369_p2, %p1363_p11 }
  0xdb   : > { %1373 = shalt.err (!%p1370_p3)  }
  0xdc   : > { %s1374_s8 = scalar_lea.vmem %s2297_s18, 16  ;;  %p1379_p5 = scmp.lt.s32.totalorder %s2297_s18, %s2170_s5 }
  0xdd   : > { %p1375_p4 = scmp.ne.s32.totalorder %s2297_s18, %s1374_s8  ;;  %p1380_p6 = scmp.lt.s32.totalorder %s2194_s4, %s1374_s8 }
  0xdf   : > { %p1381_p8 = por %p1380_p6, %p1379_p5 }
  0xe1   : > { %p1382_p10 = pnand %p1381_p8, %p1375_p4 }
  0xe3   : > { %1385 = shalt.err (!%p1382_p10)  }
  0xe4   : > { %203 = dma.hbm_to_vmem [thread:$0]  %s190_s11, 16, %s2297_s18, [#allocation3 + $0x8] }
  0xe5   : > { %s2329_s15 = sld [smem:[#allocation5 + %s221_s3]]  ;;  %s2071_s7 = smov [#allocation2 + $0xa]  }
  0xe6   : > { %s234_s9 = sshll.u32 %s2071_s7, 4  ;;  %s238_s24 = sadd.s32 11, %s2162_s29  ;;  %s2333_s9 = int_to_ptr.vmem [resolvable:$true] %s234_s9 }
  0xe7   : > { %s1033_s16 = sshll.u32 %s2310_s17, 4  ;;  %s2338_s12 = sld [smem:[#allocation5 + %s238_s24]] }
  0xe8   : > { %s207_s14 = scalar_lea.hbm %s2781_s1, %s1033_s16 }
  0xe9   : > { %s1386_s23 = scalar_lea.hbm %s207_s14, 16  ;;  %p1389_p12 = scmp.lt.u32.totalorder %s207_s14, %s2781_s1 }
  0xea   : > { %p1387_p11 = scmp.ne.s32.totalorder %s207_s14, %s1386_s23  ;;  %p1390_p13 = scmp.lt.u32.totalorder %s2185_s0, %s1386_s23 }
  0xeb   : > { %p1392_p1 = scmp.lt.u32.totalorder %s1386_s23, %s207_s14 }
  0xec   : > { %p1391_p0 = por %p1390_p13, %p1389_p12 }
  0xee   : > { %p1393_p2 = por %p1392_p1, %p1391_p0 }
  0xf0   : > { %p1394_p3 = pnand %p1393_p2, %p1387_p11 }
  0xf2   : > { %1397 = shalt.err (!%p1394_p3)  }
  0xf3   : > { %s1398_s18 = scalar_lea.vmem %s2313_s6, 16  ;;  %p1403_p5 = scmp.lt.s32.totalorder %s2313_s6, %s2170_s5 }
  0xf4   : > { %p1399_p4 = scmp.ne.s32.totalorder %s2313_s6, %s1398_s18  ;;  %p1404_p6 = scmp.lt.s32.totalorder %s2194_s4, %s1398_s18 }
  0xf6   : > { %p1405_p8 = por %p1404_p6, %p1403_p5 }
  0xf8   : > { %p1406_p10 = pnand %p1405_p8, %p1399_p4 }
  0xfa   : > { %1409 = shalt.err (!%p1406_p10)  }
  0xfb   : > { %220 = dma.hbm_to_vmem [thread:$0]  %s207_s14, 16, %s2313_s6, [#allocation3 + $0x9] }
  0xfc   : > { %s255_s28 = sadd.s32 12, %s2162_s29  ;;  %s1034_s17 = sshll.u32 %s2329_s15, 4 }
  0xfd   : > { %s2072_s11 = smov [#allocation2 + $0xb]   ;;  %s224_s16 = scalar_lea.hbm %s2781_s1, %s1034_s17 }
  0xfe   : > { %s251_s3 = sshll.u32 %s2072_s11, 4  ;;  %s1410_s10 = scalar_lea.hbm %s224_s16, 16  ;;  %s2355_s3 = int_to_ptr.vmem [resolvable:$true] %s251_s3 }
  0xff   : > { %p1411_p11 = scmp.ne.s32.totalorder %s224_s16, %s1410_s10  ;;  %p1413_p12 = scmp.lt.u32.totalorder %s224_s16, %s2781_s1 }
 0x100   : > { %p1414_p13 = scmp.lt.u32.totalorder %s2185_s0, %s1410_s10  ;;  %p1416_p1 = scmp.lt.u32.totalorder %s1410_s10, %s224_s16 }
 0x102   : > { %p1415_p0 = por %p1414_p13, %p1413_p12 }
 0x104   : > { %p1417_p2 = por %p1416_p1, %p1415_p0 }
 0x106   : > { %p1418_p3 = pnand %p1417_p2, %p1411_p11 }
 0x108   : > { %1421 = shalt.err (!%p1418_p3)  }
 0x109   : > { %s1422_s6 = scalar_lea.vmem %s2333_s9, 16  ;;  %p1427_p5 = scmp.lt.s32.totalorder %s2333_s9, %s2170_s5 }
 0x10a   : > { %p1423_p4 = scmp.ne.s32.totalorder %s2333_s9, %s1422_s6  ;;  %p1428_p6 = scmp.lt.s32.totalorder %s2194_s4, %s1422_s6 }
 0x10c   : > { %p1429_p8 = por %p1428_p6, %p1427_p5 }
 0x10e   : > { %p1430_p10 = pnand %p1429_p8, %p1423_p4 }
 0x110   : > { %1433 = shalt.err (!%p1430_p10)  }
 0x111   : > { %237 = dma.hbm_to_vmem [thread:$0]  %s224_s16, 16, %s2333_s9, [#allocation3 + $0xa] }
 0x112   : > { %s1035_s15 = sshll.u32 %s2338_s12, 4  ;;  %s2368_s14 = sld [smem:[#allocation5 + %s255_s28]] }
 0x113   : > { %s241_s17 = scalar_lea.hbm %s2781_s1, %s1035_s15 }
 0x114   : > { %s1434_s11 = scalar_lea.hbm %s241_s17, 16  ;;  %p1437_p12 = scmp.lt.u32.totalorder %s241_s17, %s2781_s1 }
 0x115   : > { %p1435_p11 = scmp.ne.s32.totalorder %s241_s17, %s1434_s11  ;;  %p1438_p13 = scmp.lt.u32.totalorder %s2185_s0, %s1434_s11 }
 0x116   : > { %p1440_p1 = scmp.lt.u32.totalorder %s1434_s11, %s241_s17 }
 0x117   : > { %p1439_p0 = por %p1438_p13, %p1437_p12 }
 0x119   : > { %p1441_p2 = por %p1440_p1, %p1439_p0 }
 0x11b   : > { %p1442_p3 = pnand %p1441_p2, %p1435_p11 }
 0x11d   : > { %1445 = shalt.err (!%p1442_p3)  }
 0x11e   : > { %s1446_s9 = scalar_lea.vmem %s2355_s3, 16  ;;  %p1451_p5 = scmp.lt.s32.totalorder %s2355_s3, %s2170_s5 }
 0x11f   : > { %p1447_p4 = scmp.ne.s32.totalorder %s2355_s3, %s1446_s9  ;;  %p1452_p6 = scmp.lt.s32.totalorder %s2194_s4, %s1446_s9 }
 0x121   : > { %p1453_p8 = por %p1452_p6, %p1451_p5 }
 0x123   : > { %p1454_p10 = pnand %p1453_p8, %p1447_p4 }
 0x125   : > { %1457 = shalt.err (!%p1454_p10)  }
 0x126   : > { %254 = dma.hbm_to_vmem [thread:$0]  %s241_s17, 16, %s2355_s3, [#allocation3 + $0xb] }
 0x127   : > { %s2073_s12 = smov [#allocation2 + $0xc]   ;;  %s272_s16 = sadd.s32 13, %s2162_s29 }
 0x128   : > { %s268_s28 = sshll.u32 %s2073_s12, 4  ;;  %s2384_s10 = sld [smem:[#allocation5 + %s272_s16]]  ;;  %s269_s28 = int_to_ptr.vmem [resolvable:$true] %s268_s28 }
 0x129   : > { %s289_s13 = sadd.s32 14, %s2162_s29  ;;  %s1036_s23 = sshll.u32 %s2368_s14, 4 }
 0x12a   : > { %s2074_s6 = smov [#allocation2 + $0xd]   ;;  %s258_s11 = scalar_lea.hbm %s2781_s1, %s1036_s23 }
 0x12b   : > { %s285_s15 = sshll.u32 %s2074_s6, 4  ;;  %s1458_s7 = scalar_lea.hbm %s258_s11, 16  ;;  %s2391_s15 = int_to_ptr.vmem [resolvable:$true] %s285_s15 }
 0x12c   : > { %p1459_p11 = scmp.ne.s32.totalorder %s258_s11, %s1458_s7  ;;  %p1461_p12 = scmp.lt.u32.totalorder %s258_s11, %s2781_s1 }
 0x12d   : > { %p1462_p13 = scmp.lt.u32.totalorder %s2185_s0, %s1458_s7  ;;  %p1464_p1 = scmp.lt.u32.totalorder %s1458_s7, %s258_s11 }
 0x12f   : > { %p1463_p0 = por %p1462_p13, %p1461_p12 }
 0x131   : > { %p1465_p2 = por %p1464_p1, %p1463_p0 }
 0x133   : > { %p1466_p3 = pnand %p1465_p2, %p1459_p11 }
 0x135   : > { %1469 = shalt.err (!%p1466_p3)  }
 0x136   : > { %s1470_s14 = scalar_lea.vmem %s269_s28, 16  ;;  %p1475_p5 = scmp.lt.s32.totalorder %s269_s28, %s2170_s5 }
 0x137   : > { %p1471_p4 = scmp.ne.s32.totalorder %s269_s28, %s1470_s14  ;;  %p1476_p6 = scmp.lt.s32.totalorder %s2194_s4, %s1470_s14 }
 0x139   : > { %p1477_p8 = por %p1476_p6, %p1475_p5 }
 0x13b   : > { %p1478_p10 = pnand %p1477_p8, %p1471_p4 }
 0x13d   : > { %1481 = shalt.err (!%p1478_p10)  }
 0x13e   : > { %271 = dma.hbm_to_vmem [thread:$0]  %s258_s11, 16, %s269_s28, [#allocation3 + $0xc] }
 0x13f   : > { %s2399_s17 = sld [smem:[#allocation5 + %s289_s13]]  ;;  %s1037_s9 = sshll.u32 %s2384_s10, 4 }
 0x140   : > { %s2075_s12 = smov [#allocation2 + $0xe]   ;;  %s275_s8 = scalar_lea.hbm %s2781_s1, %s1037_s9 }
 0x141   : > { %s302_s16 = sshll.u32 %s2075_s12, 4  ;;  %s1482_s18 = scalar_lea.hbm %s275_s8, 16  ;;  %s2405_s16 = int_to_ptr.vmem [resolvable:$true] %s302_s16 }
 0x142   : > { %p1483_p11 = scmp.ne.s32.totalorder %s275_s8, %s1482_s18  ;;  %p1485_p12 = scmp.lt.u32.totalorder %s275_s8, %s2781_s1 }
 0x143   : > { %p1486_p13 = scmp.lt.u32.totalorder %s2185_s0, %s1482_s18  ;;  %p1488_p1 = scmp.lt.u32.totalorder %s1482_s18, %s275_s8 }
 0x145   : > { %p1487_p0 = por %p1486_p13, %p1485_p12 }
 0x147   : > { %p1489_p2 = por %p1488_p1, %p1487_p0 }
 0x149   : > { %p1490_p3 = pnand %p1489_p2, %p1483_p11 }
 0x14b   : > { %1493 = shalt.err (!%p1490_p3)  }
 0x14c   : > { %s1494_s28 = scalar_lea.vmem %s2391_s15, 16  ;;  %p1499_p5 = scmp.lt.s32.totalorder %s2391_s15, %s2170_s5 }
 0x14d   : > { %p1495_p4 = scmp.ne.s32.totalorder %s2391_s15, %s1494_s28  ;;  %p1500_p6 = scmp.lt.s32.totalorder %s2194_s4, %s1494_s28 }
 0x14f   : > { %p1501_p8 = por %p1500_p6, %p1499_p5 }
 0x151   : > { %p1502_p10 = pnand %p1501_p8, %p1495_p4 }
 0x153   : > { %1505 = shalt.err (!%p1502_p10)  }
 0x154   : > { %288 = dma.hbm_to_vmem [thread:$0]  %s275_s8, 16, %s2391_s15, [#allocation3 + $0xd] }
 0x155   : > { %s306_s10 = sadd.s32 15, %s2162_s29  ;;  %s2076_s11 = smov [#allocation2 + $0xf]  }
 0x156   : > { %s2418_s13 = sld [smem:[#allocation5 + %s306_s10]]  ;;  %s319_s3 = sshll.u32 %s2076_s11, 4  ;;  %s2421_s3 = int_to_ptr.vmem [resolvable:$true] %s319_s3 }
 0x157   : > { %s1038_s14 = sshll.u32 %s2399_s17, 4  ;;  %s323_s6 = sadd.s32 16, %s2162_s29 }
 0x158   : > { %s292_s23 = scalar_lea.hbm %s2781_s1, %s1038_s14 }
 0x159   : > { %s1506_s18 = scalar_lea.hbm %s292_s23, 16  ;;  %p1509_p12 = scmp.lt.u32.totalorder %s292_s23, %s2781_s1 }
 0x15a   : > { %p1507_p11 = scmp.ne.s32.totalorder %s292_s23, %s1506_s18  ;;  %p1510_p13 = scmp.lt.u32.totalorder %s2185_s0, %s1506_s18 }
 0x15b   : > { %p1512_p1 = scmp.lt.u32.totalorder %s1506_s18, %s292_s23 }
 0x15c   : > { %p1511_p0 = por %p1510_p13, %p1509_p12 }
 0x15e   : > { %p1513_p2 = por %p1512_p1, %p1511_p0 }
 0x160   : > { %p1514_p3 = pnand %p1513_p2, %p1507_p11 }
 0x162   : > { %1517 = shalt.err (!%p1514_p3)  }
 0x163   : > { %s1518_s15 = scalar_lea.vmem %s2405_s16, 16  ;;  %p1523_p5 = scmp.lt.s32.totalorder %s2405_s16, %s2170_s5 }
 0x164   : > { %p1519_p4 = scmp.ne.s32.totalorder %s2405_s16, %s1518_s15  ;;  %p1524_p6 = scmp.lt.s32.totalorder %s2194_s4, %s1518_s15 }
 0x166   : > { %p1525_p8 = por %p1524_p6, %p1523_p5 }
 0x168   : > { %p1526_p10 = pnand %p1525_p8, %p1519_p4 }
 0x16a   : > { %1529 = shalt.err (!%p1526_p10)  }
 0x16b   : > { %305 = dma.hbm_to_vmem [thread:$0]  %s292_s23, 16, %s2405_s16, [#allocation3 + $0xe] }
 0x16c   : > { %s2437_s17 = sld [smem:[#allocation5 + %s323_s6]]  ;;  %s2077_s8 = smov [#allocation2 + $0x10]  }
 0x16d   : > { %s336_s28 = sshll.u32 %s2077_s8, 4  ;;  %s340_s10 = sadd.s32 17, %s2162_s29  ;;  %s2441_s28 = int_to_ptr.vmem [resolvable:$true] %s336_s28 }
 0x16e   : > { %s1039_s11 = sshll.u32 %s2418_s13, 4  ;;  %s2446_s18 = sld [smem:[#allocation5 + %s340_s10]] }
 0x16f   : > { %s309_s12 = scalar_lea.hbm %s2781_s1, %s1039_s11 }
 0x170   : > { %s1530_s7 = scalar_lea.hbm %s309_s12, 16  ;;  %p1533_p12 = scmp.lt.u32.totalorder %s309_s12, %s2781_s1 }
 0x171   : > { %p1531_p11 = scmp.ne.s32.totalorder %s309_s12, %s1530_s7  ;;  %p1534_p13 = scmp.lt.u32.totalorder %s2185_s0, %s1530_s7 }
 0x172   : > { %p1536_p1 = scmp.lt.u32.totalorder %s1530_s7, %s309_s12 }
 0x173   : > { %p1535_p0 = por %p1534_p13, %p1533_p12 }
 0x175   : > { %p1537_p2 = por %p1536_p1, %p1535_p0 }
 0x177   : > { %p1538_p3 = pnand %p1537_p2, %p1531_p11 }
 0x179   : > { %1541 = shalt.err (!%p1538_p3)  }
 0x17a   : > { %s1542_s16 = scalar_lea.vmem %s2421_s3, 16  ;;  %p1547_p5 = scmp.lt.s32.totalorder %s2421_s3, %s2170_s5 }
 0x17b   : > { %p1543_p4 = scmp.ne.s32.totalorder %s2421_s3, %s1542_s16  ;;  %p1548_p6 = scmp.lt.s32.totalorder %s2194_s4, %s1542_s16 }
 0x17d   : > { %p1549_p8 = por %p1548_p6, %p1547_p5 }
 0x17f   : > { %p1550_p10 = pnand %p1549_p8, %p1543_p4 }
 0x181   : > { %1553 = shalt.err (!%p1550_p10)  }
 0x182   : > { %322 = dma.hbm_to_vmem [thread:$0]  %s309_s12, 16, %s2421_s3, [#allocation3 + $0xf] }
 0x183   : > { %s357_s13 = sadd.s32 18, %s2162_s29  ;;  %s1040_s23 = sshll.u32 %s2437_s17, 4 }
 0x184   : > { %s2078_s6 = smov [#allocation2 + $0x11]   ;;  %s326_s14 = scalar_lea.hbm %s2781_s1, %s1040_s23 }
 0x185   : > { %s353_s8 = sshll.u32 %s2078_s6, 4  ;;  %s1554_s9 = scalar_lea.hbm %s326_s14, 16  ;;  %s2463_s8 = int_to_ptr.vmem [resolvable:$true] %s353_s8 }
 0x186   : > { %p1555_p11 = scmp.ne.s32.totalorder %s326_s14, %s1554_s9  ;;  %p1557_p12 = scmp.lt.u32.totalorder %s326_s14, %s2781_s1 }
 0x187   : > { %p1558_p13 = scmp.lt.u32.totalorder %s2185_s0, %s1554_s9  ;;  %p1560_p1 = scmp.lt.u32.totalorder %s1554_s9, %s326_s14 }
 0x189   : > { %p1559_p0 = por %p1558_p13, %p1557_p12 }
 0x18b   : > { %p1561_p2 = por %p1560_p1, %p1559_p0 }
 0x18d   : > { %p1562_p3 = pnand %p1561_p2, %p1555_p11 }
 0x18f   : > { %1565 = shalt.err (!%p1562_p3)  }
 0x190   : > { %s1566_s3 = scalar_lea.vmem %s2441_s28, 16  ;;  %p1571_p5 = scmp.lt.s32.totalorder %s2441_s28, %s2170_s5 }
 0x191   : > { %p1567_p4 = scmp.ne.s32.totalorder %s2441_s28, %s1566_s3  ;;  %p1572_p6 = scmp.lt.s32.totalorder %s2194_s4, %s1566_s3 }
 0x193   : > { %p1573_p8 = por %p1572_p6, %p1571_p5 }
 0x195   : > { %p1574_p10 = pnand %p1573_p8, %p1567_p4 }
 0x197   : > { %1577 = shalt.err (!%p1574_p10)  }
 0x198   : > { %339 = dma.hbm_to_vmem [thread:$0]  %s326_s14, 16, %s2441_s28, [#allocation3 + $0x10] }
 0x199   : > { %s1041_s17 = sshll.u32 %s2446_s18, 4  ;;  %s2476_s12 = sld [smem:[#allocation5 + %s357_s13]] }
 0x19a   : > { %s343_s23 = scalar_lea.hbm %s2781_s1, %s1041_s17 }
 0x19b   : > { %s1578_s6 = scalar_lea.hbm %s343_s23, 16  ;;  %p1581_p12 = scmp.lt.u32.totalorder %s343_s23, %s2781_s1 }
 0x19c   : > { %p1579_p11 = scmp.ne.s32.totalorder %s343_s23, %s1578_s6  ;;  %p1582_p13 = scmp.lt.u32.totalorder %s2185_s0, %s1578_s6 }
 0x19d   : > { %p1584_p1 = scmp.lt.u32.totalorder %s1578_s6, %s343_s23 }
 0x19e   : > { %p1583_p0 = por %p1582_p13, %p1581_p12 }
 0x1a0   : > { %p1585_p2 = por %p1584_p1, %p1583_p0 }
 0x1a2   : > { %p1586_p3 = pnand %p1585_p2, %p1579_p11 }
 0x1a4   : > { %1589 = shalt.err (!%p1586_p3)  }
 0x1a5   : > { %s1590_s28 = scalar_lea.vmem %s2463_s8, 16  ;;  %p1595_p5 = scmp.lt.s32.totalorder %s2463_s8, %s2170_s5 }
 0x1a6   : > { %p1591_p4 = scmp.ne.s32.totalorder %s2463_s8, %s1590_s28  ;;  %p1596_p6 = scmp.lt.s32.totalorder %s2194_s4, %s1590_s28 }
 0x1a8   : > { %p1597_p8 = por %p1596_p6, %p1595_p5 }
 0x1aa   : > { %p1598_p10 = pnand %p1597_p8, %p1591_p4 }
 0x1ac   : > { %1601 = shalt.err (!%p1598_p10)  }
 0x1ad   : > { %356 = dma.hbm_to_vmem [thread:$0]  %s343_s23, 16, %s2463_s8, [#allocation3 + $0x11] }
 0x1ae   : > { %s2079_s18 = smov [#allocation2 + $0x12]   ;;  %s374_s14 = sadd.s32 19, %s2162_s29 }
 0x1af   : > { %s370_s13 = sshll.u32 %s2079_s18, 4  ;;  %s2492_s9 = sld [smem:[#allocation5 + %s374_s14]]  ;;  %s371_s13 = int_to_ptr.vmem [resolvable:$true] %s370_s13 }
 0x1b0   : > { %s391_s7 = sadd.s32 20, %s2162_s29  ;;  %s1042_s24 = sshll.u32 %s2476_s12, 4 }
 0x1b1   : > { %s2080_s3 = smov [#allocation2 + $0x13]   ;;  %s360_s6 = scalar_lea.hbm %s2781_s1, %s1042_s24 }
 0x1b2   : > { %s387_s17 = sshll.u32 %s2080_s3, 4  ;;  %s1602_s10 = scalar_lea.hbm %s360_s6, 16  ;;  %s2499_s17 = int_to_ptr.vmem [resolvable:$true] %s387_s17 }
 0x1b3   : > { %p1603_p11 = scmp.ne.s32.totalorder %s360_s6, %s1602_s10  ;;  %p1605_p12 = scmp.lt.u32.totalorder %s360_s6, %s2781_s1 }
 0x1b4   : > { %p1606_p13 = scmp.lt.u32.totalorder %s2185_s0, %s1602_s10  ;;  %p1608_p1 = scmp.lt.u32.totalorder %s1602_s10, %s360_s6 }
 0x1b6   : > { %p1607_p0 = por %p1606_p13, %p1605_p12 }
 0x1b8   : > { %p1609_p2 = por %p1608_p1, %p1607_p0 }
 0x1ba   : > { %p1610_p3 = pnand %p1609_p2, %p1603_p11 }
 0x1bc   : > { %1613 = shalt.err (!%p1610_p3)  }
 0x1bd   : > { %s1614_s12 = scalar_lea.vmem %s371_s13, 16  ;;  %p1619_p5 = scmp.lt.s32.totalorder %s371_s13, %s2170_s5 }
 0x1be   : > { %p1615_p4 = scmp.ne.s32.totalorder %s371_s13, %s1614_s12  ;;  %p1620_p6 = scmp.lt.s32.totalorder %s2194_s4, %s1614_s12 }
 0x1c0   : > { %p1621_p8 = por %p1620_p6, %p1619_p5 }
 0x1c2   : > { %p1622_p10 = pnand %p1621_p8, %p1615_p4 }
 0x1c4   : > { %1625 = shalt.err (!%p1622_p10)  }
 0x1c5   : > { %373 = dma.hbm_to_vmem [thread:$0]  %s360_s6, 16, %s371_s13, [#allocation3 + $0x12] }
 0x1c6   : > { %s2507_s23 = sld [smem:[#allocation5 + %s391_s7]]  ;;  %s1043_s28 = sshll.u32 %s2492_s9, 4 }
 0x1c7   : > { %s2081_s18 = smov [#allocation2 + $0x14]   ;;  %s377_s15 = scalar_lea.hbm %s2781_s1, %s1043_s28 }
 0x1c8   : > { %s404_s14 = sshll.u32 %s2081_s18, 4  ;;  %s1626_s16 = scalar_lea.hbm %s377_s15, 16  ;;  %s2513_s14 = int_to_ptr.vmem [resolvable:$true] %s404_s14 }
 0x1c9   : > { %p1627_p11 = scmp.ne.s32.totalorder %s377_s15, %s1626_s16  ;;  %p1629_p12 = scmp.lt.u32.totalorder %s377_s15, %s2781_s1 }
 0x1ca   : > { %p1630_p13 = scmp.lt.u32.totalorder %s2185_s0, %s1626_s16  ;;  %p1632_p1 = scmp.lt.u32.totalorder %s1626_s16, %s377_s15 }
 0x1cc   : > { %p1631_p0 = por %p1630_p13, %p1629_p12 }
 0x1ce   : > { %p1633_p2 = por %p1632_p1, %p1631_p0 }
 0x1d0   : > { %p1634_p3 = pnand %p1633_p2, %p1627_p11 }
 0x1d2   : > { %1637 = shalt.err (!%p1634_p3)  }
 0x1d3   : > { %s1638_s13 = scalar_lea.vmem %s2499_s17, 16  ;;  %p1643_p5 = scmp.lt.s32.totalorder %s2499_s17, %s2170_s5 }
 0x1d4   : > { %p1639_p4 = scmp.ne.s32.totalorder %s2499_s17, %s1638_s13  ;;  %p1644_p6 = scmp.lt.s32.totalorder %s2194_s4, %s1638_s13 }
 0x1d6   : > { %p1645_p8 = por %p1644_p6, %p1643_p5 }
 0x1d8   : > { %p1646_p10 = pnand %p1645_p8, %p1639_p4 }
 0x1da   : > { %1649 = shalt.err (!%p1646_p10)  }
 0x1db   : > { %390 = dma.hbm_to_vmem [thread:$0]  %s377_s15, 16, %s2499_s17, [#allocation3 + $0x13] }
 0x1dc   : > { %s408_s9 = sadd.s32 21, %s2162_s29  ;;  %s2082_s6 = smov [#allocation2 + $0x15]  }
 0x1dd   : > { %s2526_s7 = sld [smem:[#allocation5 + %s408_s9]]  ;;  %s421_s8 = sshll.u32 %s2082_s6, 4  ;;  %s2529_s8 = int_to_ptr.vmem [resolvable:$true] %s421_s8 }
 0x1de   : > { %s1044_s12 = sshll.u32 %s2507_s23, 4  ;;  %s425_s3 = sadd.s32 22, %s2162_s29 }
 0x1df   : > { %s394_s24 = scalar_lea.hbm %s2781_s1, %s1044_s12 }
 0x1e0   : > { %s1650_s16 = scalar_lea.hbm %s394_s24, 16  ;;  %p1653_p12 = scmp.lt.u32.totalorder %s394_s24, %s2781_s1 }
 0x1e1   : > { %p1651_p11 = scmp.ne.s32.totalorder %s394_s24, %s1650_s16  ;;  %p1654_p13 = scmp.lt.u32.totalorder %s2185_s0, %s1650_s16 }
 0x1e2   : > { %p1656_p1 = scmp.lt.u32.totalorder %s1650_s16, %s394_s24 }
 0x1e3   : > { %p1655_p0 = por %p1654_p13, %p1653_p12 }
 0x1e5   : > { %p1657_p2 = por %p1656_p1, %p1655_p0 }
 0x1e7   : > { %p1658_p3 = pnand %p1657_p2, %p1651_p11 }
 0x1e9   : > { %1661 = shalt.err (!%p1658_p3)  }
 0x1ea   : > { %s1662_s17 = scalar_lea.vmem %s2513_s14, 16  ;;  %p1667_p5 = scmp.lt.s32.totalorder %s2513_s14, %s2170_s5 }
 0x1eb   : > { %p1663_p4 = scmp.ne.s32.totalorder %s2513_s14, %s1662_s17  ;;  %p1668_p6 = scmp.lt.s32.totalorder %s2194_s4, %s1662_s17 }
 0x1ed   : > { %p1669_p8 = por %p1668_p6, %p1667_p5 }
 0x1ef   : > { %p1670_p10 = pnand %p1669_p8, %p1663_p4 }
 0x1f1   : > { %1673 = shalt.err (!%p1670_p10)  }
 0x1f2   : > { %407 = dma.hbm_to_vmem [thread:$0]  %s394_s24, 16, %s2513_s14, [#allocation3 + $0x14] }
 0x1f3   : > { %s2545_s23 = sld [smem:[#allocation5 + %s425_s3]]  ;;  %s2083_s15 = smov [#allocation2 + $0x16]  }
 0x1f4   : > { %s438_s13 = sshll.u32 %s2083_s15, 4  ;;  %s442_s9 = sadd.s32 23, %s2162_s29  ;;  %s2549_s13 = int_to_ptr.vmem [resolvable:$true] %s438_s13 }
 0x1f5   : > { %s1045_s6 = sshll.u32 %s2526_s7, 4  ;;  %s2554_s16 = sld [smem:[#allocation5 + %s442_s9]] }
 0x1f6   : > { %s411_s18 = scalar_lea.hbm %s2781_s1, %s1045_s6 }
 0x1f7   : > { %s1674_s10 = scalar_lea.hbm %s411_s18, 16  ;;  %p1677_p12 = scmp.lt.u32.totalorder %s411_s18, %s2781_s1 }
 0x1f8   : > { %p1675_p11 = scmp.ne.s32.totalorder %s411_s18, %s1674_s10  ;;  %p1678_p13 = scmp.lt.u32.totalorder %s2185_s0, %s1674_s10 }
 0x1f9   : > { %p1680_p1 = scmp.lt.u32.totalorder %s1674_s10, %s411_s18 }
 0x1fa   : > { %p1679_p0 = por %p1678_p13, %p1677_p12 }
 0x1fc   : > { %p1681_p2 = por %p1680_p1, %p1679_p0 }
 0x1fe   : > { %p1682_p3 = pnand %p1681_p2, %p1675_p11 }
 0x200   : > { %1685 = shalt.err (!%p1682_p3)  }
 0x201   : > { %s1686_s14 = scalar_lea.vmem %s2529_s8, 16  ;;  %p1691_p5 = scmp.lt.s32.totalorder %s2529_s8, %s2170_s5 }
 0x202   : > { %p1687_p4 = scmp.ne.s32.totalorder %s2529_s8, %s1686_s14  ;;  %p1692_p6 = scmp.lt.s32.totalorder %s2194_s4, %s1686_s14 }
 0x204   : > { %p1693_p8 = por %p1692_p6, %p1691_p5 }
 0x206   : > { %p1694_p10 = pnand %p1693_p8, %p1687_p4 }
 0x208   : > { %1697 = shalt.err (!%p1694_p10)  }
 0x209   : > { %424 = dma.hbm_to_vmem [thread:$0]  %s411_s18, 16, %s2529_s8, [#allocation3 + $0x15] }
 0x20a   : > { %s459_s7 = sadd.s32 24, %s2162_s29  ;;  %s1046_s24 = sshll.u32 %s2545_s23, 4 }
 0x20b   : > { %s2084_s3 = smov [#allocation2 + $0x17]   ;;  %s428_s12 = scalar_lea.hbm %s2781_s1, %s1046_s24 }
 0x20c   : > { %s455_s15 = sshll.u32 %s2084_s3, 4  ;;  %s1698_s28 = scalar_lea.hbm %s428_s12, 16  ;;  %s2571_s15 = int_to_ptr.vmem [resolvable:$true] %s455_s15 }
 0x20d   : > { %p1699_p11 = scmp.ne.s32.totalorder %s428_s12, %s1698_s28  ;;  %p1701_p12 = scmp.lt.u32.totalorder %s428_s12, %s2781_s1 }
 0x20e   : > { %p1702_p13 = scmp.lt.u32.totalorder %s2185_s0, %s1698_s28  ;;  %p1704_p1 = scmp.lt.u32.totalorder %s1698_s28, %s428_s12 }
 0x210   : > { %p1703_p0 = por %p1702_p13, %p1701_p12 }
 0x212   : > { %p1705_p2 = por %p1704_p1, %p1703_p0 }
 0x214   : > { %p1706_p3 = pnand %p1705_p2, %p1699_p11 }
 0x216   : > { %1709 = shalt.err (!%p1706_p3)  }
 0x217   : > { %s1710_s8 = scalar_lea.vmem %s2549_s13, 16  ;;  %p1715_p5 = scmp.lt.s32.totalorder %s2549_s13, %s2170_s5 }
 0x218   : > { %p1711_p4 = scmp.ne.s32.totalorder %s2549_s13, %s1710_s8  ;;  %p1716_p6 = scmp.lt.s32.totalorder %s2194_s4, %s1710_s8 }
 0x21a   : > { %p1717_p8 = por %p1716_p6, %p1715_p5 }
 0x21c   : > { %p1718_p10 = pnand %p1717_p8, %p1711_p4 }
 0x21e   : > { %1721 = shalt.err (!%p1718_p10)  }
 0x21f   : > { %441 = dma.hbm_to_vmem [thread:$0]  %s428_s12, 16, %s2549_s13, [#allocation3 + $0x16] }
 0x220   : > { %s1047_s23 = sshll.u32 %s2554_s16, 4  ;;  %s2584_s18 = sld [smem:[#allocation5 + %s459_s7]] }
 0x221   : > { %s445_s24 = scalar_lea.hbm %s2781_s1, %s1047_s23 }
 0x222   : > { %s1722_s3 = scalar_lea.hbm %s445_s24, 16  ;;  %p1725_p12 = scmp.lt.u32.totalorder %s445_s24, %s2781_s1 }
 0x223   : > { %p1723_p11 = scmp.ne.s32.totalorder %s445_s24, %s1722_s3  ;;  %p1726_p13 = scmp.lt.u32.totalorder %s2185_s0, %s1722_s3 }
 0x224   : > { %p1728_p1 = scmp.lt.u32.totalorder %s1722_s3, %s445_s24 }
 0x225   : > { %p1727_p0 = por %p1726_p13, %p1725_p12 }
 0x227   : > { %p1729_p2 = por %p1728_p1, %p1727_p0 }
 0x229   : > { %p1730_p3 = pnand %p1729_p2, %p1723_p11 }
 0x22b   : > { %1733 = shalt.err (!%p1730_p3)  }
 0x22c   : > { %s1734_s13 = scalar_lea.vmem %s2571_s15, 16  ;;  %p1739_p5 = scmp.lt.s32.totalorder %s2571_s15, %s2170_s5 }
 0x22d   : > { %p1735_p4 = scmp.ne.s32.totalorder %s2571_s15, %s1734_s13  ;;  %p1740_p6 = scmp.lt.s32.totalorder %s2194_s4, %s1734_s13 }
 0x22f   : > { %p1741_p8 = por %p1740_p6, %p1739_p5 }
 0x231   : > { %p1742_p10 = pnand %p1741_p8, %p1735_p4 }
 0x233   : > { %1745 = shalt.err (!%p1742_p10)  }
 0x234   : > { %458 = dma.hbm_to_vmem [thread:$0]  %s445_s24, 16, %s2571_s15, [#allocation3 + $0x17] }
 0x235   : > { %s2085_s16 = smov [#allocation2 + $0x18]   ;;  %s476_s12 = sadd.s32 25, %s2162_s29 }
 0x236   : > { %s472_s7 = sshll.u32 %s2085_s16, 4  ;;  %s2600_s28 = sld [smem:[#allocation5 + %s476_s12]]  ;;  %s473_s7 = int_to_ptr.vmem [resolvable:$true] %s472_s7 }
 0x237   : > { %s493_s10 = sadd.s32 26, %s2162_s29  ;;  %s1048_s11 = sshll.u32 %s2584_s18, 4 }
 0x238   : > { %s2086_s8 = smov [#allocation2 + $0x19]   ;;  %s462_s3 = scalar_lea.hbm %s2781_s1, %s1048_s11 }
 0x239   : > { %s489_s23 = sshll.u32 %s2086_s8, 4  ;;  %s1746_s9 = scalar_lea.hbm %s462_s3, 16  ;;  %s2607_s23 = int_to_ptr.vmem [resolvable:$true] %s489_s23 }
 0x23a   : > { %p1747_p11 = scmp.ne.s32.totalorder %s462_s3, %s1746_s9  ;;  %p1749_p12 = scmp.lt.u32.totalorder %s462_s3, %s2781_s1 }
 0x23b   : > { %p1750_p13 = scmp.lt.u32.totalorder %s2185_s0, %s1746_s9  ;;  %p1752_p1 = scmp.lt.u32.totalorder %s1746_s9, %s462_s3 }
 0x23d   : > { %p1751_p0 = por %p1750_p13, %p1749_p12 }
 0x23f   : > { %p1753_p2 = por %p1752_p1, %p1751_p0 }
 0x241   : > { %p1754_p3 = pnand %p1753_p2, %p1747_p11 }
 0x243   : > { %1757 = shalt.err (!%p1754_p3)  }
 0x244   : > { %s1758_s18 = scalar_lea.vmem %s473_s7, 16  ;;  %p1763_p5 = scmp.lt.s32.totalorder %s473_s7, %s2170_s5 }
 0x245   : > { %p1759_p4 = scmp.ne.s32.totalorder %s473_s7, %s1758_s18  ;;  %p1764_p6 = scmp.lt.s32.totalorder %s2194_s4, %s1758_s18 }
 0x247   : > { %p1765_p8 = por %p1764_p6, %p1763_p5 }
 0x249   : > { %p1766_p10 = pnand %p1765_p8, %p1759_p4 }
 0x24b   : > { %1769 = shalt.err (!%p1766_p10)  }
 0x24c   : > { %475 = dma.hbm_to_vmem [thread:$0]  %s462_s3, 16, %s473_s7, [#allocation3 + $0x18] }
 0x24d   : > { %s2615_s24 = sld [smem:[#allocation5 + %s493_s10]]  ;;  %s1049_s13 = sshll.u32 %s2600_s28, 4 }
 0x24e   : > { %s2087_s16 = smov [#allocation2 + $0x1a]   ;;  %s479_s17 = scalar_lea.hbm %s2781_s1, %s1049_s13 }
 0x24f   : > { %s506_s12 = sshll.u32 %s2087_s16, 4  ;;  %s1770_s14 = scalar_lea.hbm %s479_s17, 16  ;;  %s2621_s12 = int_to_ptr.vmem [resolvable:$true] %s506_s12 }
 0x250   : > { %p1771_p11 = scmp.ne.s32.totalorder %s479_s17, %s1770_s14  ;;  %p1773_p12 = scmp.lt.u32.totalorder %s479_s17, %s2781_s1 }
 0x251   : > { %p1774_p13 = scmp.lt.u32.totalorder %s2185_s0, %s1770_s14  ;;  %p1776_p1 = scmp.lt.u32.totalorder %s1770_s14, %s479_s17 }
 0x253   : > { %p1775_p0 = por %p1774_p13, %p1773_p12 }
 0x255   : > { %p1777_p2 = por %p1776_p1, %p1775_p0 }
 0x257   : > { %p1778_p3 = pnand %p1777_p2, %p1771_p11 }
 0x259   : > { %1781 = shalt.err (!%p1778_p3)  }
 0x25a   : > { %s1782_s7 = scalar_lea.vmem %s2607_s23, 16  ;;  %p1787_p5 = scmp.lt.s32.totalorder %s2607_s23, %s2170_s5 }
 0x25b   : > { %p1783_p4 = scmp.ne.s32.totalorder %s2607_s23, %s1782_s7  ;;  %p1788_p6 = scmp.lt.s32.totalorder %s2194_s4, %s1782_s7 }
 0x25d   : > { %p1789_p8 = por %p1788_p6, %p1787_p5 }
 0x25f   : > { %p1790_p10 = pnand %p1789_p8, %p1783_p4 }
 0x261   : > { %1793 = shalt.err (!%p1790_p10)  }
 0x262   : > { %492 = dma.hbm_to_vmem [thread:$0]  %s479_s17, 16, %s2607_s23, [#allocation3 + $0x19] }
 0x263   : > { %s510_s28 = sadd.s32 27, %s2162_s29  ;;  %s2088_s3 = smov [#allocation2 + $0x1b]  }
 0x264   : > { %s2634_s10 = sld [smem:[#allocation5 + %s510_s28]]  ;;  %s523_s15 = sshll.u32 %s2088_s3, 4  ;;  %s2637_s15 = int_to_ptr.vmem [resolvable:$true] %s523_s15 }
 0x265   : > { %s1050_s18 = sshll.u32 %s2615_s24, 4  ;;  %s527_s8 = sadd.s32 28, %s2162_s29 }
 0x266   : > { %s496_s11 = scalar_lea.hbm %s2781_s1, %s1050_s18 }
 0x267   : > { %s1794_s14 = scalar_lea.hbm %s496_s11, 16  ;;  %p1797_p12 = scmp.lt.u32.totalorder %s496_s11, %s2781_s1 }
 0x268   : > { %p1795_p11 = scmp.ne.s32.totalorder %s496_s11, %s1794_s14  ;;  %p1798_p13 = scmp.lt.u32.totalorder %s2185_s0, %s1794_s14 }
 0x269   : > { %p1800_p1 = scmp.lt.u32.totalorder %s1794_s14, %s496_s11 }
 0x26a   : > { %p1799_p0 = por %p1798_p13, %p1797_p12 }
 0x26c   : > { %p1801_p2 = por %p1800_p1, %p1799_p0 }
 0x26e   : > { %p1802_p3 = pnand %p1801_p2, %p1795_p11 }
 0x270   : > { %1805 = shalt.err (!%p1802_p3)  }
 0x271   : > { %s1806_s23 = scalar_lea.vmem %s2621_s12, 16  ;;  %p1811_p5 = scmp.lt.s32.totalorder %s2621_s12, %s2170_s5 }
 0x272   : > { %p1807_p4 = scmp.ne.s32.totalorder %s2621_s12, %s1806_s23  ;;  %p1812_p6 = scmp.lt.s32.totalorder %s2194_s4, %s1806_s23 }
 0x274   : > { %p1813_p8 = por %p1812_p6, %p1811_p5 }
 0x276   : > { %p1814_p10 = pnand %p1813_p8, %p1807_p4 }
 0x278   : > { %1817 = shalt.err (!%p1814_p10)  }
 0x279   : > { %509 = dma.hbm_to_vmem [thread:$0]  %s496_s11, 16, %s2621_s12, [#allocation3 + $0x1a] }
 0x27a   : > { %s2653_s24 = sld [smem:[#allocation5 + %s527_s8]]  ;;  %s2089_s17 = smov [#allocation2 + $0x1c]  }
 0x27b   : > { %s540_s7 = sshll.u32 %s2089_s17, 4  ;;  %s544_s28 = sadd.s32 29, %s2162_s29  ;;  %s2657_s7 = int_to_ptr.vmem [resolvable:$true] %s540_s7 }
 0x27c   : > { %s1051_s3 = sshll.u32 %s2634_s10, 4  ;;  %s2662_s14 = sld [smem:[#allocation5 + %s544_s28]] }
 0x27d   : > { %s513_s16 = scalar_lea.hbm %s2781_s1, %s1051_s3 }
 0x27e   : > { %s1818_s9 = scalar_lea.hbm %s513_s16, 16  ;;  %p1821_p12 = scmp.lt.u32.totalorder %s513_s16, %s2781_s1 }
 0x27f   : > { %p1819_p11 = scmp.ne.s32.totalorder %s513_s16, %s1818_s9  ;;  %p1822_p13 = scmp.lt.u32.totalorder %s2185_s0, %s1818_s9 }
 0x280   : > { %p1824_p1 = scmp.lt.u32.totalorder %s1818_s9, %s513_s16 }
 0x281   : > { %p1823_p0 = por %p1822_p13, %p1821_p12 }
 0x283   : > { %p1825_p2 = por %p1824_p1, %p1823_p0 }
 0x285   : > { %p1826_p3 = pnand %p1825_p2, %p1819_p11 }
 0x287   : > { %1829 = shalt.err (!%p1826_p3)  }
 0x288   : > { %s1830_s12 = scalar_lea.vmem %s2637_s15, 16  ;;  %p1835_p5 = scmp.lt.s32.totalorder %s2637_s15, %s2170_s5 }
 0x289   : > { %p1831_p4 = scmp.ne.s32.totalorder %s2637_s15, %s1830_s12  ;;  %p1836_p6 = scmp.lt.s32.totalorder %s2194_s4, %s1830_s12 }
 0x28b   : > { %p1837_p8 = por %p1836_p6, %p1835_p5 }
 0x28d   : > { %p1838_p10 = pnand %p1837_p8, %p1831_p4 }
 0x28f   : > { %1841 = shalt.err (!%p1838_p10)  }
 0x290   : > { %526 = dma.hbm_to_vmem [thread:$0]  %s513_s16, 16, %s2637_s15, [#allocation3 + $0x1b] }
 0x291   : > { %s561_s10 = sadd.s32 30, %s2162_s29  ;;  %s1052_s11 = sshll.u32 %s2653_s24, 4 }
 0x292   : > { %s2090_s8 = smov [#allocation2 + $0x1d]   ;;  %s530_s18 = scalar_lea.hbm %s2781_s1, %s1052_s11 }
 0x293   : > { %s557_s17 = sshll.u32 %s2090_s8, 4  ;;  %s1842_s13 = scalar_lea.hbm %s530_s18, 16  ;;  %s2679_s17 = int_to_ptr.vmem [resolvable:$true] %s557_s17 }
 0x294   : > { %p1843_p11 = scmp.ne.s32.totalorder %s530_s18, %s1842_s13  ;;  %p1845_p12 = scmp.lt.u32.totalorder %s530_s18, %s2781_s1 }
 0x295   : > { %p1846_p13 = scmp.lt.u32.totalorder %s2185_s0, %s1842_s13  ;;  %p1848_p1 = scmp.lt.u32.totalorder %s1842_s13, %s530_s18 }
 0x297   : > { %p1847_p0 = por %p1846_p13, %p1845_p12 }
 0x299   : > { %p1849_p2 = por %p1848_p1, %p1847_p0 }
 0x29b   : > { %p1850_p3 = pnand %p1849_p2, %p1843_p11 }
 0x29d   : > { %1853 = shalt.err (!%p1850_p3)  }
 0x29e   : > { %s1854_s15 = scalar_lea.vmem %s2657_s7, 16  ;;  %p1859_p5 = scmp.lt.s32.totalorder %s2657_s7, %s2170_s5 }
 0x29f   : > { %p1855_p4 = scmp.ne.s32.totalorder %s2657_s7, %s1854_s15  ;;  %p1860_p6 = scmp.lt.s32.totalorder %s2194_s4, %s1854_s15 }
 0x2a1   : > { %p1861_p8 = por %p1860_p6, %p1859_p5 }
 0x2a3   : > { %p1862_p10 = pnand %p1861_p8, %p1855_p4 }
 0x2a5   : > { %1865 = shalt.err (!%p1862_p10)  }
 0x2a6   : > { %543 = dma.hbm_to_vmem [thread:$0]  %s530_s18, 16, %s2657_s7, [#allocation3 + $0x1c] }
 0x2a7   : > { %s1053_s24 = sshll.u32 %s2662_s14, 4  ;;  %s562_s16 = sld [smem:[#allocation5 + %s561_s10]] }
 0x2a8   : > { %s547_s11 = scalar_lea.hbm %s2781_s1, %s1053_s24 }
 0x2a9   : > { %s1866_s8 = scalar_lea.hbm %s547_s11, 16  ;;  %p1869_p12 = scmp.lt.u32.totalorder %s547_s11, %s2781_s1 }
 0x2aa   : > { %p1867_p11 = scmp.ne.s32.totalorder %s547_s11, %s1866_s8  ;;  %p1870_p13 = scmp.lt.u32.totalorder %s2185_s0, %s1866_s8 }
 0x2ab   : > { %p1872_p1 = scmp.lt.u32.totalorder %s1866_s8, %s547_s11 }
 0x2ac   : > { %p1871_p0 = por %p1870_p13, %p1869_p12 }
 0x2ae   : > { %p1873_p2 = por %p1872_p1, %p1871_p0 }
 0x2b0   : > { %p1874_p3 = pnand %p1873_p2, %p1867_p11 }
 0x2b2   : > { %1877 = shalt.err (!%p1874_p3)  }
 0x2b3   : > { %s1878_s7 = scalar_lea.vmem %s2679_s17, 16  ;;  %p1883_p5 = scmp.lt.s32.totalorder %s2679_s17, %s2170_s5 }
 0x2b4   : > { %p1879_p4 = scmp.ne.s32.totalorder %s2679_s17, %s1878_s7  ;;  %p1884_p6 = scmp.lt.s32.totalorder %s2194_s4, %s1878_s7 }
 0x2b6   : > { %p1885_p8 = por %p1884_p6, %p1883_p5 }
 0x2b8   : > { %p1886_p10 = pnand %p1885_p8, %p1879_p4 }
 0x2ba   : > { %1889 = shalt.err (!%p1886_p10)  }
 0x2bb   : > { %560 = dma.hbm_to_vmem [thread:$0]  %s547_s11, 16, %s2679_s17, [#allocation3 + $0x1d] }
 0x2bc   : > { %s2091_s14 = smov [#allocation2 + $0x1e]   ;;  %s578_s18 = sadd.s32 31, %s2162_s29 }
 0x2bd   : > { %s574_s10 = sshll.u32 %s2091_s14, 4  ;;  %s579_s13 = sld [smem:[#allocation5 + %s578_s18]]  ;;  %s575_s10 = int_to_ptr.vmem [resolvable:$true] %s574_s10 }
 0x2be   : > { %s1054_s9 = sshll.u32 %s562_s16, 4  ;;  %s2092_s6 = smov [#allocation2 + $0x1f]  }
 0x2bf   : > { %s591_s15 = sshll.u32 %s2092_s6, 4  ;;  %s564_s12 = scalar_lea.hbm %s2781_s1, %s1054_s9  ;;  %s592_s15 = int_to_ptr.vmem [resolvable:$true] %s591_s15 }
 0x2c0   : > { %s1890_s8 = scalar_lea.hbm %s564_s12, 16  ;;  %p1893_p12 = scmp.lt.u32.totalorder %s564_s12, %s2781_s1 }
 0x2c1   : > { %p1891_p11 = scmp.ne.s32.totalorder %s564_s12, %s1890_s8  ;;  %p1894_p13 = scmp.lt.u32.totalorder %s2185_s0, %s1890_s8 }
 0x2c2   : > { %p1896_p1 = scmp.lt.u32.totalorder %s1890_s8, %s564_s12 }
 0x2c3   : > { %p1895_p0 = por %p1894_p13, %p1893_p12 }
 0x2c5   : > { %p1897_p2 = por %p1896_p1, %p1895_p0 }
 0x2c7   : > { %p1898_p3 = pnand %p1897_p2, %p1891_p11 }
 0x2c9   : > { %1901 = shalt.err (!%p1898_p3)  }
 0x2ca   : > { %s1902_s29 = scalar_lea.vmem %s575_s10, 16  ;;  %p1907_p5 = scmp.lt.s32.totalorder %s575_s10, %s2170_s5 }
 0x2cb   : > { %p1903_p4 = scmp.ne.s32.totalorder %s575_s10, %s1902_s29  ;;  %p1908_p6 = scmp.lt.s32.totalorder %s2194_s4, %s1902_s29 }
 0x2cd   : > { %p1909_p8 = por %p1908_p6, %p1907_p5 }
 0x2cf   : > { %p1910_p10 = pnand %p1909_p8, %p1903_p4 }
 0x2d1   : > { %1913 = shalt.err (!%p1910_p10)  }
 0x2d2   : > { %577 = dma.hbm_to_vmem [thread:$0]  %s564_s12, 16, %s575_s10, [#allocation3 + $0x1e] }
 0x2d3   : > { %s1055_s17 = sshll.u32 %s579_s13, 4 }
 0x2d4   : > { %s581_s7 = scalar_lea.hbm %s2781_s1, %s1055_s17 }
 0x2d5   : > { %s1914_s14 = scalar_lea.hbm %s581_s7, 16  ;;  %p1917_p12 = scmp.lt.u32.totalorder %s581_s7, %s2781_s1 }
 0x2d6   : > { %p1915_p11 = scmp.ne.s32.totalorder %s581_s7, %s1914_s14  ;;  %p1918_p13 = scmp.lt.u32.totalorder %s2185_s0, %s1914_s14 }
 0x2d7   : > { %p1920_p1 = scmp.lt.u32.totalorder %s1914_s14, %s581_s7 }
 0x2d8   : > { %p1919_p0 = por %p1918_p13, %p1917_p12 }
 0x2da   : > { %p1921_p2 = por %p1920_p1, %p1919_p0 }
 0x2dc   : > { %p1922_p3 = pnand %p1921_p2, %p1915_p11 }
 0x2de   : > { %1925 = shalt.err (!%p1922_p3)  }
 0x2df   : > { %s1926_s10 = scalar_lea.vmem %s592_s15, 16  ;;  %p1931_p5 = scmp.lt.s32.totalorder %s592_s15, %s2170_s5 }
 0x2e0   : > { %p1927_p4 = scmp.ne.s32.totalorder %s592_s15, %s1926_s10  ;;  %p1932_p6 = scmp.lt.s32.totalorder %s2194_s4, %s1926_s10 }
 0x2e2   : > { %p1933_p8 = por %p1932_p6, %p1931_p5 }
 0x2e4   : > { %p1934_p10 = pnand %p1933_p8, %p1927_p4 }
 0x2e6   : > { %1937 = shalt.err (!%p1934_p10)  }
 0x2e7   : > { %594 = dma.hbm_to_vmem [thread:$0]  %s581_s7, 16, %s592_s15, [#allocation3 + $0x1f] }
 0x2e8   : > { %s2725_s13 = scalar_lea.vmem [#allocation6], %s2166_s30 }
 0x2e9   : > { %1980 = dma.done.wait [#allocation3], 16 }
 0x2ea   : > { %1981 = vsyncadd [#allocation3], 4294967280 }
 0x2eb   : > { %1982 = dma.done.wait [#allocation3 + $0x1], 16 }
 0x2ec   : > { %1983 = vsyncadd [#allocation3 + $0x1], 4294967280 }
 0x2ed   : > { %1984 = dma.done.wait [#allocation3 + $0x2], 16 }
 0x2ee   : > { %1985 = vsyncadd [#allocation3 + $0x2], 4294967280 }
 0x2ef   : > { %1986 = dma.done.wait [#allocation3 + $0x3], 16 }
 0x2f0   : > { %1987 = vsyncadd [#allocation3 + $0x3], 4294967280 }
 0x2f1   : > { %1988 = dma.done.wait [#allocation3 + $0x4], 16 }
 0x2f2   : > { %1989 = vsyncadd [#allocation3 + $0x4], 4294967280 }
 0x2f3   : > { %1990 = dma.done.wait [#allocation3 + $0x5], 16 }
 0x2f4   : > { %1991 = vsyncadd [#allocation3 + $0x5], 4294967280 }
 0x2f5   : > { %1992 = dma.done.wait [#allocation3 + $0x6], 16 }
 0x2f6   : > { %1993 = vsyncadd [#allocation3 + $0x6], 4294967280 }
 0x2f7   : > { %1994 = dma.done.wait [#allocation3 + $0x7], 16 }
 0x2f8   : > { %1995 = vsyncadd [#allocation3 + $0x7], 4294967280 }
 0x2f9   : > { %1996 = dma.done.wait [#allocation3 + $0x8], 16 }
 0x2fa   : > { %1997 = vsyncadd [#allocation3 + $0x8], 4294967280 }
 0x2fb   : > { %1998 = dma.done.wait [#allocation3 + $0x9], 16 }
 0x2fc   : > { %1999 = vsyncadd [#allocation3 + $0x9], 4294967280 }
 0x2fd   : > { %2000 = dma.done.wait [#allocation3 + $0xa], 16 }
 0x2fe   : > { %2001 = vsyncadd [#allocation3 + $0xa], 4294967280 }
 0x2ff   : > { %2002 = dma.done.wait [#allocation3 + $0xb], 16 }
 0x300   : > { %2003 = vsyncadd [#allocation3 + $0xb], 4294967280 }
 0x301   : > { %2004 = dma.done.wait [#allocation3 + $0xc], 16 }
 0x302   : > { %2005 = vsyncadd [#allocation3 + $0xc], 4294967280 }
 0x303   : > { %2006 = dma.done.wait [#allocation3 + $0xd], 16 }
 0x304   : > { %2007 = vsyncadd [#allocation3 + $0xd], 4294967280 }
 0x305   : > { %2008 = dma.done.wait [#allocation3 + $0xe], 16 }
 0x306   : > { %2009 = vsyncadd [#allocation3 + $0xe], 4294967280 }
 0x307   : > { %2010 = dma.done.wait [#allocation3 + $0xf], 16 }
 0x308   : > { %2011 = vsyncadd [#allocation3 + $0xf], 4294967280 }
 0x309   : > { %2012 = dma.done.wait [#allocation3 + $0x10], 16 }
 0x30a   : > { %2013 = vsyncadd [#allocation3 + $0x10], 4294967280 }
 0x30b   : > { %2014 = dma.done.wait [#allocation3 + $0x11], 16 }
 0x30c   : > { %2015 = vsyncadd [#allocation3 + $0x11], 4294967280 }
 0x30d   : > { %2016 = dma.done.wait [#allocation3 + $0x12], 16 }
 0x30e   : > { %2017 = vsyncadd [#allocation3 + $0x12], 4294967280 }
 0x30f   : > { %2018 = dma.done.wait [#allocation3 + $0x13], 16 }
 0x310   : > { %2019 = vsyncadd [#allocation3 + $0x13], 4294967280 }
 0x311   : > { %2020 = dma.done.wait [#allocation3 + $0x14], 16 }
 0x312   : > { %2021 = vsyncadd [#allocation3 + $0x14], 4294967280 }
 0x313   : > { %2022 = dma.done.wait [#allocation3 + $0x15], 16 }
 0x314   : > { %2023 = vsyncadd [#allocation3 + $0x15], 4294967280 }
 0x315   : > { %2024 = dma.done.wait [#allocation3 + $0x16], 16 }
 0x316   : > { %2025 = vsyncadd [#allocation3 + $0x16], 4294967280 }
 0x317   : > { %2026 = dma.done.wait [#allocation3 + $0x17], 16 }
 0x318   : > { %2027 = vsyncadd [#allocation3 + $0x17], 4294967280 }
 0x319   : > { %2028 = dma.done.wait [#allocation3 + $0x18], 16 }
 0x31a   : > { %2029 = vsyncadd [#allocation3 + $0x18], 4294967280 }
 0x31b   : > { %2030 = dma.done.wait [#allocation3 + $0x19], 16 }
 0x31c   : > { %2031 = vsyncadd [#allocation3 + $0x19], 4294967280 }
 0x31d   : > { %2032 = dma.done.wait [#allocation3 + $0x1a], 16 }
 0x31e   : > { %2033 = vsyncadd [#allocation3 + $0x1a], 4294967280 }
 0x31f   : > { %2034 = dma.done.wait [#allocation3 + $0x1b], 16 }
 0x320   : > { %2035 = vsyncadd [#allocation3 + $0x1b], 4294967280 }
 0x321   : > { %2036 = dma.done.wait [#allocation3 + $0x1c], 16 }
 0x322   : > { %2037 = vsyncadd [#allocation3 + $0x1c], 4294967280 }
 0x323   : > { %2038 = dma.done.wait [#allocation3 + $0x1d], 16 }
 0x324   : > { %2039 = vsyncadd [#allocation3 + $0x1d], 4294967280 }
 0x325   : > { %2040 = dma.done.wait [#allocation3 + $0x1e], 16 }
 0x326   : > { %2041 = vsyncadd [#allocation3 + $0x1e], 4294967280 }
 0x327   : > { %2042 = dma.done.wait [#allocation3 + $0x1f], 16 }
 0x328   : > { %2043 = vsyncadd [#allocation3 + $0x1f], 4294967280  ;;  %s1093_s30 = sshll.u32 %s2058_s21, 9  ;;  %s686_s5 = sshll.u32 %s2725_s13, 4  ;;  %v660_v0 = vld [vmem:[#allocation2] sm:$0xff]  ;;  %v661_v1 = vld [vmem:[#allocation2 + $0x8] sm:$0xff]  ;;  %s2734_s5 = int_to_ptr.vmem [resolvable:$true] %s686_s5 }
 0x329   : > { %v662_v2 = vld [vmem:[#allocation2 + $0x10] sm:$0xff]  ;;  %v664_v3 = vmul.f32 11.313708, %v660_v0  ;;  %v665_v4 = vmul.f32 11.313708, %v661_v1  ;;  %v663_v6 = vld [vmem:[#allocation2 + $0x18] sm:$0xff]  ;;  %s2732_s6 = scalar_lea.hbm %s2782_s2, %s1093_s30 }
 0x32a   : > { %v666_v5 = vmul.f32 11.313708, %v662_v2  ;;  %v667_v7 = vmul.f32 11.313708, %v663_v6  ;;  %s2786_s15 = sand.u32 1, %s2054_s20   ;;  %s1938_s23 = scalar_lea.vmem %s2734_s5, 512 }
 0x32b   : > { %668 = vst [vmem:[%s2725_s13] sm:$0xff] %v664_v3  ;;  %669 = vst [vmem:[%s2725_s13 + $0x8] sm:$0xff] %v665_v4  ;;  %s2742_s24 = scalar_lea.sflag [#allocation7], %s2786_s15  ;;  %p1939_p11 = scmp.ne.s32.totalorder %s2734_s5, %s1938_s23 }
 0x32c   : > { %670 = vst [vmem:[%s2725_s13 + $0x10] sm:$0xff] %v666_v5  ;;  %671 = vst [vmem:[%s2725_s13 + $0x18] sm:$0xff] %v667_v7  ;;  %s2093_s12 = smov [#allocation6]  }
 0x32d   : > { %p1940_p12 = pnand %p1939_p11, %p2151_p7  ;;  %s1942_s8 = sshll.u32 %s2093_s12, 4  ;;  %s1943_s8 = int_to_ptr.vmem [resolvable:$false] %s1942_s8 }
 0x32e   : > { %s1944_s28 = scalar_lea.vmem %s1943_s8, 1024  ;;  %p1945_p0 = scmp.lt.s32.totalorder %s2734_s5, %s1943_s8 }
 0x32f   : > { %p1941_p13 = pneg %p1940_p12  ;;  %p1946_p1 = scmp.lt.s32.totalorder %s1944_s28, %s1938_s23 }
 0x331   : > { %p1947_p2 = por %p1946_p1, %p1945_p0 }
 0x333   : > { %p1948_p3 = pnand %p1947_p2, %p1941_p13 }
 0x335   : > { %1951 = shalt.err (!%p1948_p3)
}
 0x336   : > { %s1952_s3 = scalar_lea.hbm %s2732_s6, 512  ;;  %s1956_s16 = scalar_lea.hbm %s2782_s2, 1024 }
 0x337   : > { %p1953_p4 = scmp.ne.s32.totalorder %s2732_s6, %s1952_s3  ;;  %p1957_p8 = scmp.lt.u32.totalorder %s2732_s6, %s2782_s2 }
 0x338   : > { %p1958_p10 = scmp.lt.u32.totalorder %s1956_s16, %s1952_s3  ;;  %p1960_p12 = scmp.lt.u32.totalorder %s1952_s3, %s2732_s6 }
 0x339   : > { %p1954_p5 = pnand %p1953_p4, %p2151_p7 }
 0x33a   : > { %p1959_p11 = por %p1958_p10, %p1957_p8 }
 0x33b   : > { %p1955_p6 = pneg %p1954_p5 }
 0x33c   : > { %p1961_p13 = por %p1960_p12, %p1959_p11 }
 0x33e   : > { %p1962_p0 = pnand %p1961_p13, %p1955_p6 }
 0x340   : > { %1965 = shalt.err (!%p1962_p0)
}
 0x341   : > { %s2094_s14 = smov 128   ;;  %s2095_s18 = smov 8  }
 0x342   : > { %1094 = dma.vmem_to_hbm [thread:$0]  (%p2151_p7), %s2734_s5, 512, %s2732_s6, %s2742_s24, %s2094_s14, %s2094_s14, %s2095_s18  }
 0x343 PF: > { %p1100_p1 = scmp.ge.s32.totalorder %s2058_s21, 1  ;;  %s701_s9 = sand.u32 1, %s2050_s19  }
 0x344   : > { %s702_s10 = scalar_lea.sflag [#allocation7], %s701_s9 }
 0x345   : > { %p1097_p2 = pnand %p1100_p1, %p2155_p9 }
 0x347   : > { %2045 = dma.done.wait (!%p1097_p2), %s702_s10, 512  }
 0x348   : > { %2047 = vsyncadd (!%p1097_p2), %s702_s10, 4294966784  ;;  %p16_p3 = scmp.ge.s32.totalorder %s2140_s22, 3   ;;  %s2787_s19 = smov %s2054_s20 }
 0x349   : > { %s2788_s20 = smov %s2149_s25  ;;  %s2789_s21 = smov %s2140_s22 }
 0x34a   :  { %18 = sbr.rel (!%p16_p3) target bundleno = 15 (0xf), region = 297 }
 0x351   :  { %707 = vsyncpa [#allocation7], 1 }
 0x352   :  { %709 = vsyncpa [#allocation7 + $0x1], 1 }
 0x353   :  { %710 = vsyncmov [#allocation3] }
 0x356   :  { %s711_s21 = vpop.sfrf %710 }
 0x357   :  { %p1061_p7 = scmp.ne.s32.totalorder %s711_s21, 0 }
 0x359   :  { %715 = shalt.err (%p1061_p7)  }
 0x35a   :  { %717 = vsyncmov [#allocation3 + $0x1] }
 0x35d   :  { %s718_s26 = vpop.sfrf %717 }
 0x35e   :  { %p1062_p9 = scmp.ne.s32.totalorder %s718_s26, 0 }
 0x360   :  { %722 = shalt.err (%p1062_p9)  }
 0x361   :  { %724 = vsyncmov [#allocation3 + $0x2] }
 0x364   :  { %s725_s27 = vpop.sfrf %724 }
 0x365   :  { %p1063_p4 = scmp.ne.s32.totalorder %s725_s27, 0 }
 0x367   :  { %729 = shalt.err (%p1063_p4)  }
 0x368   :  { %731 = vsyncmov [#allocation3 + $0x3] }
 0x36b   :  { %s732_s13 = vpop.sfrf %731 }
 0x36c   :  { %p1064_p5 = scmp.ne.s32.totalorder %s732_s13, 0 }
 0x36e   :  { %736 = shalt.err (%p1064_p5)  }
 0x36f   :  { %738 = vsyncmov [#allocation3 + $0x4] }
 0x372   :  { %s739_s22 = vpop.sfrf %738 }
 0x373   :  { %p1065_p6 = scmp.ne.s32.totalorder %s739_s22, 0 }
 0x375   :  { %743 = shalt.err (%p1065_p6)  }
 0x376   :  { %745 = vsyncmov [#allocation3 + $0x5] }
 0x379   :  { %s746_s1 = vpop.sfrf %745 }
 0x37a   :  { %p1066_p8 = scmp.ne.s32.totalorder %s746_s1, 0 }
 0x37c   :  { %750 = shalt.err (%p1066_p8)  }
 0x37d   :  { %752 = vsyncmov [#allocation3 + $0x6] }
 0x380   :  { %s753_s2 = vpop.sfrf %752 }
 0x381   :  { %p1067_p10 = scmp.ne.s32.totalorder %s753_s2, 0 }
 0x383   :  { %757 = shalt.err (%p1067_p10)  }
 0x384   :  { %759 = vsyncmov [#allocation3 + $0x7] }
 0x387   :  { %s760_s19 = vpop.sfrf %759 }
 0x388   :  { %p1068_p11 = scmp.ne.s32.totalorder %s760_s19, 0 }
 0x38a   :  { %764 = shalt.err (%p1068_p11)  }
 0x38b   :  { %766 = vsyncmov [#allocation3 + $0x8] }
 0x38e   :  { %s767_s20 = vpop.sfrf %766 }
 0x38f   :  { %p1069_p12 = scmp.ne.s32.totalorder %s767_s20, 0 }
 0x391   :  { %771 = shalt.err (%p1069_p12)  }
 0x392   :  { %773 = vsyncmov [#allocation3 + $0x9] }
 0x395   :  { %s774_s25 = vpop.sfrf %773 }
 0x396   :  { %p1070_p13 = scmp.ne.s32.totalorder %s774_s25, 0 }
 0x398   :  { %778 = shalt.err (%p1070_p13)  }
 0x399   :  { %780 = vsyncmov [#allocation3 + $0xa] }
 0x39c   :  { %s781_s30 = vpop.sfrf %780 }
 0x39d   :  { %p1071_p0 = scmp.ne.s32.totalorder %s781_s30, 0 }
 0x39f   :  { %785 = shalt.err (%p1071_p0)  }
 0x3a0   :  { %787 = vsyncmov [#allocation3 + $0xb] }
 0x3a3   :  { %s788_s5 = vpop.sfrf %787 }
 0x3a4   :  { %p1072_p1 = scmp.ne.s32.totalorder %s788_s5, 0 }
 0x3a6   :  { %792 = shalt.err (%p1072_p1)  }
 0x3a7   :  { %794 = vsyncmov [#allocation3 + $0xc] }
 0x3aa   :  { %s795_s0 = vpop.sfrf %794 }
 0x3ab   :  { %p1073_p2 = scmp.ne.s32.totalorder %s795_s0, 0 }
 0x3ad   :  { %799 = shalt.err (%p1073_p2)  }
 0x3ae   :  { %801 = vsyncmov [#allocation3 + $0xd] }
 0x3b1   :  { %s802_s4 = vpop.sfrf %801 }
 0x3b2   :  { %p1074_p3 = scmp.ne.s32.totalorder %s802_s4, 0 }
 0x3b4   :  { %806 = shalt.err (%p1074_p3)  }
 0x3b5   :  { %808 = vsyncmov [#allocation3 + $0xe] }
 0x3b8   :  { %s809_s6 = vpop.sfrf %808 }
 0x3b9   :  { %p1075_p7 = scmp.ne.s32.totalorder %s809_s6, 0 }
 0x3bb   :  { %813 = shalt.err (%p1075_p7)  }
 0x3bc   :  { %815 = vsyncmov [#allocation3 + $0xf] }
 0x3bf   :  { %s816_s15 = vpop.sfrf %815 }
 0x3c0   :  { %p1076_p9 = scmp.ne.s32.totalorder %s816_s15, 0 }
 0x3c2   :  { %820 = shalt.err (%p1076_p9)  }
 0x3c3   :  { %822 = vsyncmov [#allocation3 + $0x10] }
 0x3c6   :  { %s823_s24 = vpop.sfrf %822 }
 0x3c7   :  { %p1077_p4 = scmp.ne.s32.totalorder %s823_s24, 0 }
 0x3c9   :  { %827 = shalt.err (%p1077_p4)  }
 0x3ca   :  { %829 = vsyncmov [#allocation3 + $0x11] }
 0x3cd   :  { %s830_s23 = vpop.sfrf %829 }
 0x3ce   :  { %p1078_p5 = scmp.ne.s32.totalorder %s830_s23, 0 }
 0x3d0   :  { %834 = shalt.err (%p1078_p5)  }
 0x3d1   :  { %836 = vsyncmov [#allocation3 + $0x12] }
 0x3d4   :  { %s837_s12 = vpop.sfrf %836 }
 0x3d5   :  { %p1079_p6 = scmp.ne.s32.totalorder %s837_s12, 0 }
 0x3d7   :  { %841 = shalt.err (%p1079_p6)  }
 0x3d8   :  { %843 = vsyncmov [#allocation3 + $0x13] }
 0x3db   :  { %s844_s8 = vpop.sfrf %843 }
 0x3dc   :  { %p1080_p8 = scmp.ne.s32.totalorder %s844_s8, 0 }
 0x3de   :  { %848 = shalt.err (%p1080_p8)  }
 0x3df   :  { %850 = vsyncmov [#allocation3 + $0x14] }
 0x3e2   :  { %s851_s28 = vpop.sfrf %850 }
 0x3e3   :  { %p1081_p10 = scmp.ne.s32.totalorder %s851_s28, 0 }
 0x3e5   :  { %855 = shalt.err (%p1081_p10)  }
 0x3e6   :  { %857 = vsyncmov [#allocation3 + $0x15] }
 0x3e9   :  { %s858_s3 = vpop.sfrf %857 }
 0x3ea   :  { %p1082_p11 = scmp.ne.s32.totalorder %s858_s3, 0 }
 0x3ec   :  { %862 = shalt.err (%p1082_p11)  }
 0x3ed   :  { %864 = vsyncmov [#allocation3 + $0x16] }
 0x3f0   :  { %s865_s29 = vpop.sfrf %864 }
 0x3f1   :  { %p1083_p12 = scmp.ne.s32.totalorder %s865_s29, 0 }
 0x3f3   :  { %869 = shalt.err (%p1083_p12)  }
 0x3f4   :  { %871 = vsyncmov [#allocation3 + $0x17] }
 0x3f7   :  { %s872_s17 = vpop.sfrf %871 }
 0x3f8   :  { %p1084_p13 = scmp.ne.s32.totalorder %s872_s17, 0 }
 0x3fa   :  { %876 = shalt.err (%p1084_p13)  }
 0x3fb   :  { %878 = vsyncmov [#allocation3 + $0x18] }
 0x3fe   :  { %s879_s16 = vpop.sfrf %878 }
 0x3ff   :  { %p1085_p0 = scmp.ne.s32.totalorder %s879_s16, 0 }
 0x401   :  { %883 = shalt.err (%p1085_p0)  }
 0x402   :  { %885 = vsyncmov [#allocation3 + $0x19] }
 0x405   :  { %s886_s11 = vpop.sfrf %885 }
 0x406   :  { %p1086_p1 = scmp.ne.s32.totalorder %s886_s11, 0 }
 0x408   :  { %890 = shalt.err (%p1086_p1)  }
 0x409   :  { %892 = vsyncmov [#allocation3 + $0x1a] }
 0x40c   :  { %s893_s7 = vpop.sfrf %892 }
 0x40d   :  { %p1087_p2 = scmp.ne.s32.totalorder %s893_s7, 0 }
 0x40f   :  { %897 = shalt.err (%p1087_p2)  }
 0x410   :  { %899 = vsyncmov [#allocation3 + $0x1b] }
 0x413   :  { %s900_s14 = vpop.sfrf %899 }
 0x414   :  { %p1088_p3 = scmp.ne.s32.totalorder %s900_s14, 0 }
 0x416   :  { %904 = shalt.err (%p1088_p3)  }
 0x417   :  { %906 = vsyncmov [#allocation3 + $0x1c] }
 0x41a   :  { %s907_s18 = vpop.sfrf %906 }
 0x41b   :  { %p1089_p7 = scmp.ne.s32.totalorder %s907_s18, 0 }
 0x41d   :  { %911 = shalt.err (%p1089_p7)  }
 0x41e   :  { %913 = vsyncmov [#allocation3 + $0x1d] }
 0x421   :  { %s914_s9 = vpop.sfrf %913 }
 0x422   :  { %p1090_p9 = scmp.ne.s32.totalorder %s914_s9, 0 }
 0x424   :  { %918 = shalt.err (%p1090_p9)  }
 0x425   :  { %920 = vsyncmov [#allocation3 + $0x1e] }
 0x428   :  { %s921_s10 = vpop.sfrf %920 }
 0x429   :  { %p1091_p4 = scmp.ne.s32.totalorder %s921_s10, 0 }
 0x42b   :  { %925 = shalt.err (%p1091_p4)  }
 0x42c   :  { %927 = vsyncmov [#allocation3 + $0x1f] }
 0x42f   :  { %s928_s21 = vpop.sfrf %927 }
 0x430   :  { %p1092_p5 = scmp.ne.s32.totalorder %s928_s21, 0 }
 0x432   :  { %932 = shalt.err (%p1092_p5)  }

</bundles_post_ra>
